<compile_context>
chip_gen: v5e
topology: v5e:2x2
jax: 0.10.0
libtpu: 0.0.40
codegen_flags: <defaults>
</compile_context>

<pallas_src>
import jax
import jax.numpy as jnp
from jax.experimental import pallas as pl
from jax.experimental.pallas import tpu as pltpu

_LANES = 128


def _round_up(x, m):
    return (x + m - 1) // m * m


# ---------------------------------------------------------------------------
# Fused Pallas kernel (one grid step == one image)
# ---------------------------------------------------------------------------
def _make_kernel(Hs, Ws8, Hp, Wp, has_id_conv):
    """Hs: output rows, Ws8: output cols (8-aligned), Hp/Wp: padded input tile."""

    def kernel(x_ref, mask_ref, s1_ref, b1_ref, w1_ref, b2_ref, w2_ref,
               b3_ref, w3_ref, bout_ref, *rest):
        if has_id_conv:
            wid_ref, o_ref, y_scr = rest
        else:
            o_ref, y_scr = rest

        cin = x_ref.shape[-1]
        cmid = w1_ref.shape[-1]
        cout = o_ref.shape[-1]

        # ---- BN1 -> ReLU -> conv1 (1x1, BN2 scale folded into w1) -> +b2 -> ReLU
        x4 = x_ref[...].astype(jnp.float32)              # (1, Hp, Wp, cin)
        x2 = x4.reshape(Hp * Wp, cin)
        y = jnp.maximum(x2 * s1_ref[...] + b1_ref[...], 0.0)
        y = jnp.dot(y.astype(jnp.bfloat16), w1_ref[...],
                    preferred_element_type=jnp.float32)
        y = jnp.maximum(y + b2_ref[...], 0.0)            # (Hp*Wp, cmid) f32
        # Zero the spatial halo ring so conv2 sees SAME zero padding.
        y = y * mask_ref[...]
        y_scr[...] = y.reshape(1, Hp, Wp, cmid)

        # ---- conv2: 3x3 SAME as 9 accumulating shifted matmuls (BN3 scale folded)
        acc = jnp.zeros((Hs * Ws8, cmid), jnp.float32)
        for kh in range(3):
            for kw in range(3):
                patch = y_scr[:, kh:kh + Hs, kw:kw + Ws8, :]
                patch = patch.reshape(Hs * Ws8, cmid).astype(jnp.bfloat16)
                acc = acc + jnp.dot(patch, w2_ref[kh * 3 + kw],
                                    preferred_element_type=jnp.float32)
        z = jnp.maximum(acc + b3_ref[...], 0.0)          # BN3 shift -> ReLU

        # ---- conv3 (1x1) + fused bias (bias3 [+ identity-BN shift]) + residual
        out = jnp.dot(z.astype(jnp.bfloat16), w3_ref[...],
                      preferred_element_type=jnp.float32) + bout_ref[...]
        x_in = x4[:, 1:1 + Hs, 1:1 + Ws8, :].reshape(Hs * Ws8, cin)
        if has_id_conv:
            out = out + jnp.dot(x_in.astype(jnp.bfloat16), wid_ref[...],
                                preferred_element_type=jnp.float32)
        else:
            out = out + x_in                             # Cin == Cout here
        o_ref[...] = out.reshape(1, Hs, Ws8, cout)

    return kernel


# ---------------------------------------------------------------------------
# Parameters (deterministic synthetic init; BN as eval-mode scale/shift)
# ---------------------------------------------------------------------------
def init_params(key, in_features, out_features, eps=1e-5):
    Cin, Cmid = in_features, out_features
    Cout = out_features * 4
    if Cin == Cout:
        stride, has_id_conv = 1, False       # nn.Identity
    elif Cin == Cmid:
        stride, has_id_conv = 1, True        # 1x1 conv + BN, stride 1
    else:
        stride, has_id_conv = 2, True        # 1x1 conv + BN, stride 2
    keys = jax.random.split(key, 9)

    def bn(k, c):
        kg, kb, km, kv = jax.random.split(k, 4)
        gamma = 1.0 + 0.1 * jax.random.normal(kg, (c,))
        beta = 0.1 * jax.random.normal(kb, (c,))
        mean = 0.1 * jax.random.normal(km, (c,))
        var = 0.5 + jnp.abs(jax.random.normal(kv, (c,)))
        scale = gamma / jnp.sqrt(var + eps)
        shift = beta - mean * scale
        return (scale.reshape(1, c).astype(jnp.float32),
                shift.reshape(1, c).astype(jnp.float32))

    s1, b1 = bn(keys[0], Cin)
    s2, b2 = bn(keys[1], Cmid)
    s3, b3 = bn(keys[2], Cmid)
    w1 = 0.2 * jax.random.normal(keys[3], (Cin, Cmid), dtype=jnp.float32)
    w2 = 0.2 * jax.random.normal(keys[4], (3, 3, Cmid, Cmid), dtype=jnp.float32)  # HWIO
    w3 = 0.2 * jax.random.normal(keys[5], (Cmid, Cout), dtype=jnp.float32)
    bias3 = 0.1 * jax.random.normal(keys[6], (1, Cout), dtype=jnp.float32)
    if has_id_conv:
        wid = 0.2 * jax.random.normal(keys[7], (Cin, Cout), dtype=jnp.float32)
        sid, bid = bn(keys[8], Cout)
    else:
        wid = sid = bid = None
    return dict(stride=stride, has_id_conv=has_id_conv,
                s1=s1, b1=b1, w1=w1, s2=s2, b2=b2, w2=w2,
                s3=s3, b3=b3, w3=w3, bias3=bias3, wid=wid, sid=sid, bid=bid)


# ---------------------------------------------------------------------------
# Forward (wrapper around the fused Pallas kernel)
# ---------------------------------------------------------------------------
def preact_bottleneck_forward(x_nchw, params):
    p = params
    stride, has_id = p["stride"], p["has_id_conv"]

    x = jnp.transpose(x_nchw, (0, 2, 3, 1)).astype(jnp.float32)  # NCHW -> NHWC
    # stride-s 1x1 conv of a pointwise-transformed input == pointwise on the
    # subsampled input, so subsample once for both branches.
    x_s = x[:, ::stride, ::stride, :]
    N, Hs, Ws, Cin = x_s.shape
    Cmid = p["w1"].shape[1]
    Cout = p["w3"].shape[1]

    Cp_in = _round_up(Cin, _LANES)
    Cp_mid = _round_up(Cmid, _LANES)
    Cp_out = _round_up(Cout, _LANES)
    Ws8 = _round_up(Ws, 8)             # lane-dense / 8-aligned output width
    Wp = _round_up(Ws8 + 2, 8)         # padded (halo) tile width, 8-aligned
    Hp = Hs + 2                        # padded tile height (+1 halo each side)

    # spatially pad (conv2 halo) + channel-pad, cast activations to bf16
    xp = jnp.pad(x_s, ((0, 0), (1, 1), (1, Wp - Ws - 1), (0, Cp_in - Cin)))
    xp = xp.astype(jnp.bfloat16)

    def zpad(a, shape):
        return jnp.pad(a, [(0, t - s) for s, t in zip(a.shape, shape)])

    # fold BN scales into weight columns (host-side, f32), then cast to bf16
    s1 = zpad(p["s1"], (1, Cp_in)).astype(jnp.float32)
    b1 = zpad(p["b1"], (1, Cp_in)).astype(jnp.float32)
    w1 = zpad(p["w1"] * p["s2"], (Cp_in, Cp_mid)).astype(jnp.bfloat16)
    b2 = zpad(p["b2"], (1, Cp_mid)).astype(jnp.float32)
    w2 = (p["w2"] * p["s3"].reshape(1, 1, 1, Cmid)).reshape(9, Cmid, Cmid)
    w2 = zpad(w2, (9, Cp_mid, Cp_mid)).astype(jnp.bfloat16)
    b3 = zpad(p["b3"], (1, Cp_mid)).astype(jnp.float32)
    w3 = zpad(p["w3"], (Cp_mid, Cp_out)).astype(jnp.bfloat16)
    if has_id:
        bout = zpad(p["bias3"] + p["bid"], (1, Cp_out)).astype(jnp.float32)
        wid = zpad(p["wid"] * p["sid"], (Cp_in, Cp_out)).astype(jnp.bfloat16)
    else:
        assert Cin == Cout, "identity path requires Cin == Cout"
        bout = zpad(p["bias3"], (1, Cp_out)).astype(jnp.float32)
        wid = None

    # halo mask: 1 on true interior pixels, 0 on the padded ring / fake columns
    hh = jnp.arange(Hp).reshape(Hp, 1)
    ww = jnp.arange(Wp).reshape(1, Wp)
    mask = ((hh >= 1) & (hh <= Hs) & (ww >= 1) & (ww <= Ws)).astype(jnp.float32)
    mask = mask.reshape(Hp * Wp, 1)

    kernel = _make_kernel(Hs, Ws8, Hp, Wp, has_id)

    def _full_spec(a):
        zeros = (0,) * a.ndim
        return pl.BlockSpec(a.shape, lambda n: zeros)

    inputs = [xp, mask, s1, b1, w1, b2, w2, b3, w3, bout]
    if has_id:
        inputs.append(wid)
    in_specs = ([pl.BlockSpec((1, Hp, Wp, Cp_in), lambda n: (n, 0, 0, 0))]
                + [_full_spec(a) for a in inputs[1:]])

    # VMEM budget: double-buffered x/out tiles + resident weights + scratch + temps
    def nbytes(a):
        return a.size * a.dtype.itemsize

    est = (2 * (nbytes(xp) // N + Hs * Ws8 * Cp_out * 4)
           + sum(nbytes(a) for a in inputs[1:])
           + Hp * Wp * Cp_mid * 4                    # y2 halo scratch
           + (Hp * Wp + 4 * Hs * Ws8) * Cp_mid * 4   # in-kernel temporaries
           + (4 << 20))
    vmem_limit = int(min(max(est, 32 << 20), 64 << 20))

    out = pl.pallas_call(
        kernel,
        out_shape=jax.ShapeDtypeStruct((N, Hs, Ws8, Cp_out), jnp.float32),
        grid=(N,),
        in_specs=in_specs,
        out_specs=pl.BlockSpec((1, Hs, Ws8, Cp_out), lambda n: (n, 0, 0, 0)),
        scratch_shapes=[pltpu.VMEM((1, Hp, Wp, Cp_mid), jnp.float32)],
        compiler_params=pltpu.CompilerParams(
            dimension_semantics=("parallel",),
            vmem_limit_bytes=vmem_limit),
    )(*inputs)

    out = out[:, :, :Ws, :Cout]                      # drop width/channel padding
    return jnp.transpose(out, (0, 3, 1, 2))          # NHWC -> NCHW


# ---------------------------------------------------------------------------
# Pure-JAX f32 reference (for verification)
# ---------------------------------------------------------------------------
def reference_forward(x_nchw, params):
    def conv(x, w, stride, pad):
        return jax.lax.conv_general_dilated(
            x, w, window_strides=(stride, stride), padding=pad,
            dimension_numbers=("NHWC", "HWIO", "NHWC"))

    p = params
    stride = p["stride"]
    x = jnp.transpose(x_nchw, (0, 2, 3, 1)).astype(jnp.float32)
    Cin, Cmid, Cout = p["w1"].shape[0], p["w1"].shape[1], p["w3"].shape[1]
    bn = lambda t, s, b: t * s.reshape(1, 1, 1, -1) + b.reshape(1, 1, 1, -1)

    y = jnp.maximum(bn(x, p["s1"], p["b1"]), 0.0)
    y = conv(y, p["w1"].reshape(1, 1, Cin, Cmid), stride, "VALID")
    y = jnp.maximum(bn(y, p["s2"], p["b2"]), 0.0)
    y = conv(y, p["w2"], 1, ((1, 1), (1, 1)))
    y = jnp.maximum(bn(y, p["s3"], p["b3"]), 0.0)
    y = conv(y, p["w3"].reshape(1, 1, Cmid, Cout), 1, "VALID") + p["bias3"].reshape(1, 1, 1, -1)
    if p["has_id_conv"]:
        res = conv(x, p["wid"].reshape(1, 1, Cin, Cout), stride, "VALID")
        res = bn(res, p["sid"], p["bid"])
    else:
        res = x
    return jnp.transpose(y + res, (0, 3, 1, 2))


if __name__ == "__main__":
    key = jax.random.PRNGKey(0)
    # (in_features, out_features, spatial) covering all three identity variants
    configs = [
        (4, 4, 16),    # in == out       -> 1x1 conv + BN identity, stride 1
        (16, 4, 16),   # in == out * 4   -> nn.Identity residual,   stride 1
        (8, 4, 16),    # otherwise       -> 1x1 conv + BN identity, stride 2
    ]
    for i, (cin, cout, hw) in enumerate(configs):
        key, kx, kp = jax.random.split(key, 3)
        x = jax.random.normal(kx, (2, cin, hw, hw), dtype=jnp.float32)
        params = init_params(kp, cin, cout)

        out = jax.block_until_ready(preact_bottleneck_forward(x, params))
        ref = reference_forward(x, params)

        assert out.shape == ref.shape, (out.shape, ref.shape)
        if i == 0:
            assert out.shape == (2, cout * 4, hw, hw), out.shape
        err = float(jnp.max(jnp.abs(out - ref)))
        scale = float(jnp.max(jnp.abs(ref)))
        # bf16 matmul operands (f32 accumulation) -> relative tolerance vs f32 ref
        assert err <= 5e-2 * scale + 1e-2, (configs[i], err, scale)

    print("KERNEL_OK")
</pallas_src>

<mosaic_0001>
module attributes {stable_mosaic.version = 11 : i64} {
  func.func @kernel(%arg0: i32, %arg1: memref<1x18x24x128xbf16, #tpu.memory_space<vmem>>, %arg2: memref<432x1xf32, #tpu.memory_space<vmem>>, %arg3: memref<1x128xf32, #tpu.memory_space<vmem>>, %arg4: memref<1x128xf32, #tpu.memory_space<vmem>>, %arg5: memref<128x128xbf16, #tpu.memory_space<vmem>>, %arg6: memref<1x128xf32, #tpu.memory_space<vmem>>, %arg7: memref<9x128x128xbf16, #tpu.memory_space<vmem>>, %arg8: memref<1x128xf32, #tpu.memory_space<vmem>>, %arg9: memref<128x128xbf16, #tpu.memory_space<vmem>>, %arg10: memref<1x128xf32, #tpu.memory_space<vmem>>, %arg11: memref<128x128xbf16, #tpu.memory_space<vmem>>, %arg12: memref<1x16x16x128xf32, #tpu.memory_space<vmem>>, %arg13: memref<1x18x24x128xf32, #tpu.memory_space<vmem>>) attributes {dimension_semantics = [#tpu.dimension_semantics<parallel>], iteration_bounds = array<i64: 2>, scalar_prefetch = 0 : i64, scratch_operands = 1 : i64, tpu.core_type = #tpu.core_type<tc>, window_params = [{transform_indices = @transform_0, window_bounds = array<i64: 1, 18, 24, 128>}, {pipeline_mode = #tpu.pipeline_mode<synchronous>, transform_indices = @transform_1, window_bounds = array<i64: 432, 1>}, {pipeline_mode = #tpu.pipeline_mode<synchronous>, transform_indices = @transform_2, window_bounds = array<i64: 1, 128>}, {pipeline_mode = #tpu.pipeline_mode<synchronous>, transform_indices = @transform_3, window_bounds = array<i64: 1, 128>}, {pipeline_mode = #tpu.pipeline_mode<synchronous>, transform_indices = @transform_4, window_bounds = array<i64: 128, 128>}, {pipeline_mode = #tpu.pipeline_mode<synchronous>, transform_indices = @transform_5, window_bounds = array<i64: 1, 128>}, {pipeline_mode = #tpu.pipeline_mode<synchronous>, transform_indices = @transform_6, window_bounds = array<i64: 9, 128, 128>}, {pipeline_mode = #tpu.pipeline_mode<synchronous>, transform_indices = @transform_7, window_bounds = array<i64: 1, 128>}, {pipeline_mode = #tpu.pipeline_mode<synchronous>, transform_indices = @transform_8, window_bounds = array<i64: 128, 128>}, {pipeline_mode = #tpu.pipeline_mode<synchronous>, transform_indices = @transform_9, window_bounds = array<i64: 1, 128>}, {pipeline_mode = #tpu.pipeline_mode<synchronous>, transform_indices = @transform_10, window_bounds = array<i64: 128, 128>}, {transform_indices = @transform_11, window_bounds = array<i64: 1, 16, 16, 128>}]} {
    %c0 = arith.constant 0 : index
    %c0_0 = arith.constant 0 : index
    %c0_1 = arith.constant 0 : index
    %c0_2 = arith.constant 0 : index
    %0 = vector.load %arg1[%c0, %c0_0, %c0_1, %c0_2] : memref<1x18x24x128xbf16, #tpu.memory_space<vmem>>, vector<1x18x24x128xbf16>
    %1 = arith.extf %0 : vector<1x18x24x128xbf16> to vector<1x18x24x128xf32>
    %2 = vector.shape_cast %1 : vector<1x18x24x128xf32> to vector<432x128xf32>
    %c0_3 = arith.constant 0 : index
    %c0_4 = arith.constant 0 : index
    %3 = vector.load %arg3[%c0_3, %c0_4] : memref<1x128xf32, #tpu.memory_space<vmem>>, vector<1x128xf32>
    %4 = vector.broadcast %3 : vector<1x128xf32> to vector<432x128xf32>
    %5 = arith.mulf %2, %4 : vector<432x128xf32>
    %c0_5 = arith.constant 0 : index
    %c0_6 = arith.constant 0 : index
    %6 = vector.load %arg4[%c0_5, %c0_6] : memref<1x128xf32, #tpu.memory_space<vmem>>, vector<1x128xf32>
    %7 = vector.broadcast %6 : vector<1x128xf32> to vector<432x128xf32>
    %8 = arith.addf %5, %7 : vector<432x128xf32>
    %cst = arith.constant 0.000000e+00 : f32
    %9 = vector.broadcast %cst : f32 to vector<432x128xf32>
    %10 = arith.maximumf %8, %9 : vector<432x128xf32>
    %11 = arith.truncf %10 : vector<432x128xf32> to vector<432x128xbf16>
    %c0_7 = arith.constant 0 : index
    %c0_8 = arith.constant 0 : index
    %12 = vector.load %arg5[%c0_7, %c0_8] : memref<128x128xbf16, #tpu.memory_space<vmem>>, vector<128x128xbf16>
    %cst_9 = arith.constant dense<0.000000e+00> : vector<432x128xf32>
    %13 = tpu.matmul %11, %12, %cst_9 {dimension_numbers = #tpu.dot_dimension_numbers<[1], [0], [0], [1], [0, 0, 1, 1], [], []>} : vector<432x128xbf16>, vector<128x128xbf16>, vector<432x128xf32> -> vector<432x128xf32>
    %c0_10 = arith.constant 0 : index
    %c0_11 = arith.constant 0 : index
    %14 = vector.load %arg6[%c0_10, %c0_11] : memref<1x128xf32, #tpu.memory_space<vmem>>, vector<1x128xf32>
    %15 = vector.broadcast %14 : vector<1x128xf32> to vector<432x128xf32>
    %16 = arith.addf %13, %15 : vector<432x128xf32>
    %cst_12 = arith.constant 0.000000e+00 : f32
    %17 = vector.broadcast %cst_12 : f32 to vector<432x128xf32>
    %18 = arith.maximumf %16, %17 : vector<432x128xf32>
    %c0_13 = arith.constant 0 : index
    %c0_14 = arith.constant 0 : index
    %19 = vector.load %arg2[%c0_13, %c0_14] : memref<432x1xf32, #tpu.memory_space<vmem>>, vector<432x1xf32>
    %20 = vector.broadcast %19 : vector<432x1xf32> to vector<432x128xf32>
    %21 = arith.mulf %18, %20 : vector<432x128xf32>
    %22 = vector.shape_cast %21 : vector<432x128xf32> to vector<1x18x24x128xf32>
    %c0_15 = arith.constant 0 : index
    %c0_16 = arith.constant 0 : index
    %c0_17 = arith.constant 0 : index
    %c0_18 = arith.constant 0 : index
    %23 = vector.load %arg13[%c0_15, %c0_16, %c0_17, %c0_18] : memref<1x18x24x128xf32, #tpu.memory_space<vmem>>, vector<1x18x24x128xf32>
    tpu.vector_store %arg13[%c0_15, %c0_16, %c0_17, %c0_18], %22 {strides = array<i32>} : memref<1x18x24x128xf32, #tpu.memory_space<vmem>>, vector<1x18x24x128xf32>,
    %cst_19 = arith.constant 0.000000e+00 : f32
    %24 = vector.broadcast %cst_19 : f32 to vector<256x128xf32>
    %c0_20 = arith.constant 0 : index
    %c0_21 = arith.constant 0 : index
    %c0_22 = arith.constant 0 : index
    %c0_23 = arith.constant 0 : index
    %25 = vector.load %arg13[%c0_20, %c0_21, %c0_22, %c0_23] : memref<1x18x24x128xf32, #tpu.memory_space<vmem>>, vector<1x16x16x128xf32>
    %26 = vector.shape_cast %25 : vector<1x16x16x128xf32> to vector<256x128xf32>
    %27 = arith.truncf %26 : vector<256x128xf32> to vector<256x128xbf16>
    %c0_24 = arith.constant 0 : index
    %c0_25 = arith.constant 0 : index
    %c0_26 = arith.constant 0 : index
    %28 = vector.load %arg7[%c0_24, %c0_25, %c0_26] : memref<9x128x128xbf16, #tpu.memory_space<vmem>>, vector<1x128x128xbf16>
    %29 = vector.shape_cast %28 : vector<1x128x128xbf16> to vector<128x128xbf16>
    %cst_27 = arith.constant dense<0.000000e+00> : vector<256x128xf32>
    %30 = tpu.matmul %27, %29, %cst_27 {dimension_numbers = #tpu.dot_dimension_numbers<[1], [0], [0], [1], [0, 0, 1, 1], [], []>} : vector<256x128xbf16>, vector<128x128xbf16>, vector<256x128xf32> -> vector<256x128xf32>
    %31 = arith.addf %24, %30 : vector<256x128xf32>
    %c0_28 = arith.constant 0 : index
    %c0_29 = arith.constant 0 : index
    %c1 = arith.constant 1 : index
    %c0_30 = arith.constant 0 : index
    %32 = vector.load %arg13[%c0_28, %c0_29, %c1, %c0_30] : memref<1x18x24x128xf32, #tpu.memory_space<vmem>>, vector<1x16x16x128xf32>
    %33 = vector.shape_cast %32 : vector<1x16x16x128xf32> to vector<256x128xf32>
    %34 = arith.truncf %33 : vector<256x128xf32> to vector<256x128xbf16>
    %c1_31 = arith.constant 1 : index
    %c0_32 = arith.constant 0 : index
    %c0_33 = arith.constant 0 : index
    %35 = vector.load %arg7[%c1_31, %c0_32, %c0_33] : memref<9x128x128xbf16, #tpu.memory_space<vmem>>, vector<1x128x128xbf16>
    %36 = vector.shape_cast %35 : vector<1x128x128xbf16> to vector<128x128xbf16>
    %cst_34 = arith.constant dense<0.000000e+00> : vector<256x128xf32>
    %37 = tpu.matmul %34, %36, %cst_34 {dimension_numbers = #tpu.dot_dimension_numbers<[1], [0], [0], [1], [0, 0, 1, 1], [], []>} : vector<256x128xbf16>, vector<128x128xbf16>, vector<256x128xf32> -> vector<256x128xf32>
    %38 = arith.addf %31, %37 : vector<256x128xf32>
    %c0_35 = arith.constant 0 : index
    %c0_36 = arith.constant 0 : index
    %c2 = arith.constant 2 : index
    %c0_37 = arith.constant 0 : index
    %39 = vector.load %arg13[%c0_35, %c0_36, %c2, %c0_37] : memref<1x18x24x128xf32, #tpu.memory_space<vmem>>, vector<1x16x16x128xf32>
    %40 = vector.shape_cast %39 : vector<1x16x16x128xf32> to vector<256x128xf32>
    %41 = arith.truncf %40 : vector<256x128xf32> to vector<256x128xbf16>
    %c2_38 = arith.constant 2 : index
    %c0_39 = arith.constant 0 : index
    %c0_40 = arith.constant 0 : index
    %42 = vector.load %arg7[%c2_38, %c0_39, %c0_40] : memref<9x128x128xbf16, #tpu.memory_space<vmem>>, vector<1x128x128xbf16>
    %43 = vector.shape_cast %42 : vector<1x128x128xbf16> to vector<128x128xbf16>
    %cst_41 = arith.constant dense<0.000000e+00> : vector<256x128xf32>
    %44 = tpu.matmul %41, %43, %cst_41 {dimension_numbers = #tpu.dot_dimension_numbers<[1], [0], [0], [1], [0, 0, 1, 1], [], []>} : vector<256x128xbf16>, vector<128x128xbf16>, vector<256x128xf32> -> vector<256x128xf32>
    %45 = arith.addf %38, %44 : vector<256x128xf32>
    %c0_42 = arith.constant 0 : index
    %c1_43 = arith.constant 1 : index
    %c0_44 = arith.constant 0 : index
    %c0_45 = arith.constant 0 : index
    %46 = vector.load %arg13[%c0_42, %c1_43, %c0_44, %c0_45] : memref<1x18x24x128xf32, #tpu.memory_space<vmem>>, vector<1x16x16x128xf32>
    %47 = vector.shape_cast %46 : vector<1x16x16x128xf32> to vector<256x128xf32>
    %48 = arith.truncf %47 : vector<256x128xf32> to vector<256x128xbf16>
    %c3 = arith.constant 3 : index
    %c0_46 = arith.constant 0 : index
    %c0_47 = arith.constant 0 : index
    %49 = vector.load %arg7[%c3, %c0_46, %c0_47] : memref<9x128x128xbf16, #tpu.memory_space<vmem>>, vector<1x128x128xbf16>
    %50 = vector.shape_cast %49 : vector<1x128x128xbf16> to vector<128x128xbf16>
    %cst_48 = arith.constant dense<0.000000e+00> : vector<256x128xf32>
    %51 = tpu.matmul %48, %50, %cst_48 {dimension_numbers = #tpu.dot_dimension_numbers<[1], [0], [0], [1], [0, 0, 1, 1], [], []>} : vector<256x128xbf16>, vector<128x128xbf16>, vector<256x128xf32> -> vector<256x128xf32>
    %52 = arith.addf %45, %51 : vector<256x128xf32>
    %c0_49 = arith.constant 0 : index
    %c1_50 = arith.constant 1 : index
    %c1_51 = arith.constant 1 : index
    %c0_52 = arith.constant 0 : index
    %53 = vector.load %arg13[%c0_49, %c1_50, %c1_51, %c0_52] : memref<1x18x24x128xf32, #tpu.memory_space<vmem>>, vector<1x16x16x128xf32>
    %54 = vector.shape_cast %53 : vector<1x16x16x128xf32> to vector<256x128xf32>
    %55 = arith.truncf %54 : vector<256x128xf32> to vector<256x128xbf16>
    %c4 = arith.constant 4 : index
    %c0_53 = arith.constant 0 : index
    %c0_54 = arith.constant 0 : index
    %56 = vector.load %arg7[%c4, %c0_53, %c0_54] : memref<9x128x128xbf16, #tpu.memory_space<vmem>>, vector<1x128x128xbf16>
    %57 = vector.shape_cast %56 : vector<1x128x128xbf16> to vector<128x128xbf16>
    %cst_55 = arith.constant dense<0.000000e+00> : vector<256x128xf32>
    %58 = tpu.matmul %55, %57, %cst_55 {dimension_numbers = #tpu.dot_dimension_numbers<[1], [0], [0], [1], [0, 0, 1, 1], [], []>} : vector<256x128xbf16>, vector<128x128xbf16>, vector<256x128xf32> -> vector<256x128xf32>
    %59 = arith.addf %52, %58 : vector<256x128xf32>
    %c0_56 = arith.constant 0 : index
    %c1_57 = arith.constant 1 : index
    %c2_58 = arith.constant 2 : index
    %c0_59 = arith.constant 0 : index
    %60 = vector.load %arg13[%c0_56, %c1_57, %c2_58, %c0_59] : memref<1x18x24x128xf32, #tpu.memory_space<vmem>>, vector<1x16x16x128xf32>
    %61 = vector.shape_cast %60 : vector<1x16x16x128xf32> to vector<256x128xf32>
    %62 = arith.truncf %61 : vector<256x128xf32> to vector<256x128xbf16>
    %c5 = arith.constant 5 : index
    %c0_60 = arith.constant 0 : index
    %c0_61 = arith.constant 0 : index
    %63 = vector.load %arg7[%c5, %c0_60, %c0_61] : memref<9x128x128xbf16, #tpu.memory_space<vmem>>, vector<1x128x128xbf16>
    %64 = vector.shape_cast %63 : vector<1x128x128xbf16> to vector<128x128xbf16>
    %cst_62 = arith.constant dense<0.000000e+00> : vector<256x128xf32>
    %65 = tpu.matmul %62, %64, %cst_62 {dimension_numbers = #tpu.dot_dimension_numbers<[1], [0], [0], [1], [0, 0, 1, 1], [], []>} : vector<256x128xbf16>, vector<128x128xbf16>, vector<256x128xf32> -> vector<256x128xf32>
    %66 = arith.addf %59, %65 : vector<256x128xf32>
    %c0_63 = arith.constant 0 : index
    %c2_64 = arith.constant 2 : index
    %c0_65 = arith.constant 0 : index
    %c0_66 = arith.constant 0 : index
    %67 = vector.load %arg13[%c0_63, %c2_64, %c0_65, %c0_66] : memref<1x18x24x128xf32, #tpu.memory_space<vmem>>, vector<1x16x16x128xf32>
    %68 = vector.shape_cast %67 : vector<1x16x16x128xf32> to vector<256x128xf32>
    %69 = arith.truncf %68 : vector<256x128xf32> to vector<256x128xbf16>
    %c6 = arith.constant 6 : index
    %c0_67 = arith.constant 0 : index
    %c0_68 = arith.constant 0 : index
    %70 = vector.load %arg7[%c6, %c0_67, %c0_68] : memref<9x128x128xbf16, #tpu.memory_space<vmem>>, vector<1x128x128xbf16>
    %71 = vector.shape_cast %70 : vector<1x128x128xbf16> to vector<128x128xbf16>
    %cst_69 = arith.constant dense<0.000000e+00> : vector<256x128xf32>
    %72 = tpu.matmul %69, %71, %cst_69 {dimension_numbers = #tpu.dot_dimension_numbers<[1], [0], [0], [1], [0, 0, 1, 1], [], []>} : vector<256x128xbf16>, vector<128x128xbf16>, vector<256x128xf32> -> vector<256x128xf32>
    %73 = arith.addf %66, %72 : vector<256x128xf32>
    %c0_70 = arith.constant 0 : index
    %c2_71 = arith.constant 2 : index
    %c1_72 = arith.constant 1 : index
    %c0_73 = arith.constant 0 : index
    %74 = vector.load %arg13[%c0_70, %c2_71, %c1_72, %c0_73] : memref<1x18x24x128xf32, #tpu.memory_space<vmem>>, vector<1x16x16x128xf32>
    %75 = vector.shape_cast %74 : vector<1x16x16x128xf32> to vector<256x128xf32>
    %76 = arith.truncf %75 : vector<256x128xf32> to vector<256x128xbf16>
    %c7 = arith.constant 7 : index
    %c0_74 = arith.constant 0 : index
    %c0_75 = arith.constant 0 : index
    %77 = vector.load %arg7[%c7, %c0_74, %c0_75] : memref<9x128x128xbf16, #tpu.memory_space<vmem>>, vector<1x128x128xbf16>
    %78 = vector.shape_cast %77 : vector<1x128x128xbf16> to vector<128x128xbf16>
    %cst_76 = arith.constant dense<0.000000e+00> : vector<256x128xf32>
    %79 = tpu.matmul %76, %78, %cst_76 {dimension_numbers = #tpu.dot_dimension_numbers<[1], [0], [0], [1], [0, 0, 1, 1], [], []>} : vector<256x128xbf16>, vector<128x128xbf16>, vector<256x128xf32> -> vector<256x128xf32>
    %80 = arith.addf %73, %79 : vector<256x128xf32>
    %c0_77 = arith.constant 0 : index
    %c2_78 = arith.constant 2 : index
    %c2_79 = arith.constant 2 : index
    %c0_80 = arith.constant 0 : index
    %81 = vector.load %arg13[%c0_77, %c2_78, %c2_79, %c0_80] : memref<1x18x24x128xf32, #tpu.memory_space<vmem>>, vector<1x16x16x128xf32>
    %82 = vector.shape_cast %81 : vector<1x16x16x128xf32> to vector<256x128xf32>
    %83 = arith.truncf %82 : vector<256x128xf32> to vector<256x128xbf16>
    %c8 = arith.constant 8 : index
    %c0_81 = arith.constant 0 : index
    %c0_82 = arith.constant 0 : index
    %84 = vector.load %arg7[%c8, %c0_81, %c0_82] : memref<9x128x128xbf16, #tpu.memory_space<vmem>>, vector<1x128x128xbf16>
    %85 = vector.shape_cast %84 : vector<1x128x128xbf16> to vector<128x128xbf16>
    %cst_83 = arith.constant dense<0.000000e+00> : vector<256x128xf32>
    %86 = tpu.matmul %83, %85, %cst_83 {dimension_numbers = #tpu.dot_dimension_numbers<[1], [0], [0], [1], [0, 0, 1, 1], [], []>} : vector<256x128xbf16>, vector<128x128xbf16>, vector<256x128xf32> -> vector<256x128xf32>
    %87 = arith.addf %80, %86 : vector<256x128xf32>
    %c0_84 = arith.constant 0 : index
    %c0_85 = arith.constant 0 : index
    %88 = vector.load %arg8[%c0_84, %c0_85] : memref<1x128xf32, #tpu.memory_space<vmem>>, vector<1x128xf32>
    %89 = vector.broadcast %88 : vector<1x128xf32> to vector<256x128xf32>
    %90 = arith.addf %87, %89 : vector<256x128xf32>
    %cst_86 = arith.constant 0.000000e+00 : f32
    %91 = vector.broadcast %cst_86 : f32 to vector<256x128xf32>
    %92 = arith.maximumf %90, %91 : vector<256x128xf32>
    %93 = arith.truncf %92 : vector<256x128xf32> to vector<256x128xbf16>
    %c0_87 = arith.constant 0 : index
    %c0_88 = arith.constant 0 : index
    %94 = vector.load %arg9[%c0_87, %c0_88] : memref<128x128xbf16, #tpu.memory_space<vmem>>, vector<128x128xbf16>
    %cst_89 = arith.constant dense<0.000000e+00> : vector<256x128xf32>
    %95 = tpu.matmul %93, %94, %cst_89 {dimension_numbers = #tpu.dot_dimension_numbers<[1], [0], [0], [1], [0, 0, 1, 1], [], []>} : vector<256x128xbf16>, vector<128x128xbf16>, vector<256x128xf32> -> vector<256x128xf32>
    %c0_90 = arith.constant 0 : index
    %c0_91 = arith.constant 0 : index
    %96 = vector.load %arg10[%c0_90, %c0_91] : memref<1x128xf32, #tpu.memory_space<vmem>>, vector<1x128xf32>
    %97 = vector.broadcast %96 : vector<1x128xf32> to vector<256x128xf32>
    %98 = arith.addf %95, %97 : vector<256x128xf32>
    %99 = vector.extract_strided_slice %1 {offsets = [0, 1, 1, 0], sizes = [1, 16, 16, 128], strides = [1, 1, 1, 1]} : vector<1x18x24x128xf32> to vector<1x16x16x128xf32>
    %100 = vector.shape_cast %99 : vector<1x16x16x128xf32> to vector<256x128xf32>
    %101 = arith.truncf %100 : vector<256x128xf32> to vector<256x128xbf16>
    %c0_92 = arith.constant 0 : index
    %c0_93 = arith.constant 0 : index
    %102 = vector.load %arg11[%c0_92, %c0_93] : memref<128x128xbf16, #tpu.memory_space<vmem>>, vector<128x128xbf16>
    %cst_94 = arith.constant dense<0.000000e+00> : vector<256x128xf32>
    %103 = tpu.matmul %101, %102, %cst_94 {dimension_numbers = #tpu.dot_dimension_numbers<[1], [0], [0], [1], [0, 0, 1, 1], [], []>} : vector<256x128xbf16>, vector<128x128xbf16>, vector<256x128xf32> -> vector<256x128xf32>
    %104 = arith.addf %98, %103 : vector<256x128xf32>
    %105 = vector.shape_cast %104 : vector<256x128xf32> to vector<1x16x16x128xf32>
    %c0_95 = arith.constant 0 : index
    %c0_96 = arith.constant 0 : index
    %c0_97 = arith.constant 0 : index
    %c0_98 = arith.constant 0 : index
    %106 = vector.load %arg12[%c0_95, %c0_96, %c0_97, %c0_98] : memref<1x16x16x128xf32, #tpu.memory_space<vmem>>, vector<1x16x16x128xf32>
    tpu.vector_store %arg12[%c0_95, %c0_96, %c0_97, %c0_98], %105 {strides = array<i32>} : memref<1x16x16x128xf32, #tpu.memory_space<vmem>>, vector<1x16x16x128xf32>,
    return
  }
  func.func @transform_0(%arg0: i32) -> (i32, i32, i32, i32) {
    %c0_i32 = arith.constant 0 : i32
    %c0_i32_0 = arith.constant 0 : i32
    %c0_i32_1 = arith.constant 0 : i32
    %c0_i32_2 = arith.constant 0 : i32
    return %arg0, %c0_i32, %c0_i32_0, %c0_i32_1 : i32, i32, i32, i32
  }
  func.func @transform_1(%arg0: i32) -> (i32, i32) {
    %c0_i32 = arith.constant 0 : i32
    %c0_i32_0 = arith.constant 0 : i32
    %c0_i32_1 = arith.constant 0 : i32
    return %c0_i32, %c0_i32_0 : i32, i32
  }
  func.func @transform_2(%arg0: i32) -> (i32, i32) {
    %c0_i32 = arith.constant 0 : i32
    %c0_i32_0 = arith.constant 0 : i32
    %c0_i32_1 = arith.constant 0 : i32
    return %c0_i32, %c0_i32_0 : i32, i32
  }
  func.func @transform_3(%arg0: i32) -> (i32, i32) {
    %c0_i32 = arith.constant 0 : i32
    %c0_i32_0 = arith.constant 0 : i32
    %c0_i32_1 = arith.constant 0 : i32
    return %c0_i32, %c0_i32_0 : i32, i32
  }
  func.func @transform_4(%arg0: i32) -> (i32, i32) {
    %c0_i32 = arith.constant 0 : i32
    %c0_i32_0 = arith.constant 0 : i32
    %c0_i32_1 = arith.constant 0 : i32
    return %c0_i32, %c0_i32_0 : i32, i32
  }
  func.func @transform_5(%arg0: i32) -> (i32, i32) {
    %c0_i32 = arith.constant 0 : i32
    %c0_i32_0 = arith.constant 0 : i32
    %c0_i32_1 = arith.constant 0 : i32
    return %c0_i32, %c0_i32_0 : i32, i32
  }
  func.func @transform_6(%arg0: i32) -> (i32, i32, i32) {
    %c0_i32 = arith.constant 0 : i32
    %c0_i32_0 = arith.constant 0 : i32
    %c0_i32_1 = arith.constant 0 : i32
    %c0_i32_2 = arith.constant 0 : i32
    return %c0_i32, %c0_i32_0, %c0_i32_1 : i32, i32, i32
  }
  func.func @transform_7(%arg0: i32) -> (i32, i32) {
    %c0_i32 = arith.constant 0 : i32
    %c0_i32_0 = arith.constant 0 : i32
    %c0_i32_1 = arith.constant 0 : i32
    return %c0_i32, %c0_i32_0 : i32, i32
  }
  func.func @transform_8(%arg0: i32) -> (i32, i32) {
    %c0_i32 = arith.constant 0 : i32
    %c0_i32_0 = arith.constant 0 : i32
    %c0_i32_1 = arith.constant 0 : i32
    return %c0_i32, %c0_i32_0 : i32, i32
  }
  func.func @transform_9(%arg0: i32) -> (i32, i32) {
    %c0_i32 = arith.constant 0 : i32
    %c0_i32_0 = arith.constant 0 : i32
    %c0_i32_1 = arith.constant 0 : i32
    return %c0_i32, %c0_i32_0 : i32, i32
  }
  func.func @transform_10(%arg0: i32) -> (i32, i32) {
    %c0_i32 = arith.constant 0 : i32
    %c0_i32_0 = arith.constant 0 : i32
    %c0_i32_1 = arith.constant 0 : i32
    return %c0_i32, %c0_i32_0 : i32, i32
  }
  func.func @transform_11(%arg0: i32) -> (i32, i32, i32, i32) {
    %c0_i32 = arith.constant 0 : i32
    %c0_i32_0 = arith.constant 0 : i32
    %c0_i32_1 = arith.constant 0 : i32
    %c0_i32_2 = arith.constant 0 : i32
    return %arg0, %c0_i32, %c0_i32_0, %c0_i32_1 : i32, i32, i32, i32
  }
}

</mosaic_0001>

<bundles_post_ra>
// kernel: tpu_custom_call.1
= control target key start
LH: loop header
LB: loop body
LE: loop exit
PB: predicated region body
PF: predicated region fallthrough
CT: control target
= control target key end

     0   :  { %s6964_s0 = inlined_call_operand.vmem [shape: bf16[2,18,24,128], index: 0, kind: input, shape index: {}]   ;;  %s6965_s1 = inlined_call_operand.vmem [shape: f32[432,1], index: 1, kind: input, shape index: {}]   ;;  %s6966_s2 = inlined_call_operand.vmem [shape: f32[1,128], index: 2, kind: input, shape index: {}]   ;;  %s6967_s3 = inlined_call_operand.vmem [shape: f32[1,128], index: 3, kind: input, shape index: {}]   ;;  %s6968_s4 = inlined_call_operand.hbm [shape: bf16[128,128], index: 4, kind: input, shape index: {}]   ;;  %s6969_s5 = inlined_call_operand.vmem [shape: f32[1,128], index: 5, kind: input, shape index: {}]   ;;  %s6970_s6 = inlined_call_operand.hbm [shape: bf16[9,128,128], index: 6, kind: input, shape index: {}]   ;;  %s6971_s7 = inlined_call_operand.vmem [shape: f32[1,128], index: 7, kind: input, shape index: {}]   ;;  %s6972_s8 = inlined_call_operand.hbm [shape: bf16[128,128], index: 8, kind: input, shape index: {}]   ;;  %s6973_s9 = inlined_call_operand.vmem [shape: f32[1,128], index: 9, kind: input, shape index: {}]   ;;  %s6974_s10 = inlined_call_operand.hbm [shape: bf16[128,128], index: 10, kind: input, shape index: {}]   ;;  %s6975_s11 = inlined_call_operand.hbm [shape: f32[2,16,16,128], index: 11, kind: output, shape index: {}]  }
   0x1   :  { %7090 = sst [smem:[#allocation91_spill]] %s6968_s4 }
   0x2   :  { %7091 = sst [smem:[#allocation92_spill]] %s6970_s6 }
   0x3   :  { %16 = vsyncpa [#allocation4], 0 }
   0x4   :  { %17 = vsyncpa [#allocation7], 0 }
   0x5   :  { %18 = vsyncpa [#allocation10], 0 }
   0x6   :  { %19 = vsyncpa [#allocation5], 0 }
   0x7   :  { %21 = vsyncpa [#allocation5 + $0x1], 0  ;;  %s5272_s17 = smov 0   ;;  %s5274_s18 = smov 0  }
   0x8   :  { %s5276_s19 = smov 0   ;;  %s5278_s20 = smov 0  }
   0x9 LB: > { %7092 = sst [smem:[#allocation16_spill]] %s5189_s17  ;;  %s5293_s21 = sadd.s32 4294967295, %s5201_s20   ;;  %s5201_s20 = sphi %s5278_s20, %s7327_s20   ;;  %s5197_s19 = sphi %s5276_s19, %s7329_s19   ;;  %s5193_s18 = sphi %s5274_s18, %s7331_s18   ;;  %s5189_s17 = sphi %s5272_s17, %s7330_s17  }
   0xa   : > { %7093 = sst [smem:[#allocation17_spill]] %s5197_s19  ;;  %s4252_s22 = sadd.s32 4294967294, %s5201_s20  }
   0xb   : > { %s5297_s23 = sadd.s32 1, %s5201_s20   ;;  %s270_s24 = sadd.s32 1, %s5197_s19 }
   0xc   : > { %7094 = sst [smem:[#allocation18_spill]] %s5297_s23  ;;  %s267_s25 = ssub.s32 %s5201_s20, %s5297_s23 }
   0xd   : > { %p280_p0 = scmp.ne.s32.totalorder %s5197_s19, %s5193_s18  ;;  %p268_p1 = scmp.eq.s32.totalorder %s267_s25, 0 }
   0xe   : > { %p281_p2 = scmp.eq.s32.totalorder %s5293_s21, 1  ;;  %p286_p3 = scmp.ne.s32.totalorder %s5193_s18, %s5189_s17 }
   0xf   : > { %p287_p4 = scmp.eq.s32.totalorder %s4252_s22, 1  ;;  %p4253_p7 = scmp.ge.s32.totalorder %s5201_s20, 1 }
  0x10   : > { %s5308_s26 = scalar_select %p268_p1, %s5197_s19, %s270_s24  }
  0x11   : > { %p5310_p5 = por %p281_p2, %p280_p0  ;;  %p5314_p6 = por %p287_p4, %p286_p3 }
  0x12   : > { %7095 = sst [smem:[#allocation19_spill]] %s5308_s26  ;;  %p294_p8 = scmp.lt.s32.totalorder %s5201_s20, 3 }
  0x13   : > { %s7097_s28 = scalar_select %p5314_p6, 1, 0 }
  0x14   : > { %p4946_p9 = scmp.eq.s32.totalorder %s5293_s21, 0  ;;  %p5321_p10 = pnand %p4253_p7, %p294_p8 }
  0x15   : > { %7098 = sst [smem:[#allocation20_spill]] %s7097_s28  ;;  %s5203_s24 = smov [#allocation6]  }
  0x16   : > { %s7100_s6 = sld [smem:[#allocation92_spill]]  ;;  %p4929_p11 = pneg %p5321_p10 }
  0x17   : > { %s7101_s4 = sld [smem:[#allocation91_spill]]  ;;  %s333_s25 = sshll.u32 %s5203_s24, 4  ;;  %s334_s25 = int_to_ptr.vmem [resolvable:$true] %s333_s25 }
  0x18   : > { %p5335_p12 = pnand %p4946_p9, %p4929_p11  ;;  %s5204_s30 = smov 64  }
  0x19   : > { %s5205_s12 = smov 4   ;;  %s348_s26 = sshll.u32 %s6972_s8, 4  ;;  %s349_s26 = int_to_ptr.hbm [resolvable:$true] %s348_s26 }
  0x1a   : > { %s365_s23 = sshll.u32 %s6974_s10, 4  ;;  %s5207_s28 = smov [#allocation8]   ;;  %s366_s23 = int_to_ptr.hbm [resolvable:$true] %s365_s23 }
  0x1b   : > { %s350_s17 = sshll.u32 %s5207_s28, 4  ;;  %s351_s17 = int_to_ptr.vmem [resolvable:$true] %s350_s17 }
  0x1c   : > { %s331_s13 = sshll.u32 %s7100_s6, 4  ;;  %s5206_s6 = smov [#allocation3]   ;;  %s332_s13 = int_to_ptr.hbm [resolvable:$true] %s331_s13 }
  0x1d   : > { %s314_s16 = sshll.u32 %s7101_s4, 4  ;;  %s316_s14 = sshll.u32 %s5206_s6, 4  ;;  %s315_s16 = int_to_ptr.hbm [resolvable:$true] %s314_s16  ;;  %s317_s14 = int_to_ptr.vmem [resolvable:$true] %s316_s14 }
  0x1e   : > { %4935 = dma.hbm_to_vmem [thread:$0]  (!%p5335_p12), %s332_s13, 9216, %s334_s25, [#allocation7], %s5204_s30, %s5204_s30, %s5205_s12  }
  0x1f   : > { %4932 = dma.hbm_to_vmem [thread:$0]  (!%p5335_p12), %s315_s16, 1024, %s317_s14, [#allocation4], %s5204_s30, %s5204_s30, %s5205_s12  }
  0x20   : > { %4938 = dma.hbm_to_vmem [thread:$0]  (!%p5335_p12), %s349_s26, 1024, %s351_s17, [#allocation7], %s5204_s30, %s5204_s30, %s5205_s12  }
  0x21   : > { %s5208_s13 = smov [#allocation9]   ;;  %391 = sbr.rel (%p5321_p10) target bundleno = 1367 (0x557), region = 64 }
  0x22   : > { %s367_s6 = sshll.u32 %s5208_s13, 4  ;;  %s368_s6 = int_to_ptr.vmem [resolvable:$true] %s367_s6 }
  0x23   : > { %4941 = dma.hbm_to_vmem [thread:$0]  (!%p5335_p12), %s366_s23, 1024, %s368_s6, [#allocation10], %s5204_s30, %s5204_s30, %s5205_s12  }
  0x26   : > { %5172 = dma.done.wait (%p4946_p9), [#allocation4], 1024  }
  0x27   : > { %5174 = vsyncadd (%p4946_p9), [#allocation4], 4294966272 }
  0x28   : > { %5176 = dma.done.wait (%p4946_p9), [#allocation7], 10240  }
  0x29   : > { %5178 = vsyncadd (%p4946_p9), [#allocation7], 4294957056 }
  0x2a   : > { %5180 = dma.done.wait (%p4946_p9), [#allocation10], 1024  }
  0x2b   : > { %5182 = vsyncadd (%p4946_p9), [#allocation10], 4294966272  ;;  %v5209_v0 = vmov 0   ;;  %p447_p13 = scmp.lt.s32.totalorder %s5293_s21, 1  ;;  %v4662_v1 = vld [vmem:[#allocation3 + $0x38] sm:$0xff]  ;;  %v1025_v2 = vld [vmem:[%s6965_s1 + $0x10] sm:$0xff] }
  0x2c   : > { %4997 = vset.pattern.permute.xlu1 %v5209_v0  ;;  %4996 = vset.pattern.permute.xlu0 %v5209_v0  ;;  %v1023_v3 = vld [vmem:[%s6965_s1] sm:$0xff]  ;;  %v4660_v6 = vld [vmem:[#allocation3 + $0x28] sm:$0xff]  ;;  %v1024_v8 = vld [vmem:[%s6965_s1 + $0x8] sm:$0xff]  ;;  %vm3787_vm0 = vcmask 1046528   ;;  %s444_s24 = sand.u32 1, %s5193_s18   ;;  %s4751_s19 = sshll.u32 %s5293_s21, 8 }
  0x2d   : > { %4998 = vset.pattern.permute.xlu2 %v5209_v0  ;;  %s448_s4 = scalar_select %p447_p13, %s5293_s21, 1  ;;  %1089 = vperm.xlu1 %4997, %v1025_v2   ;;  %v4661_v4 = vld [vmem:[#allocation3 + $0x30] sm:$0xff]  ;;  %v1026_v7 = vld [vmem:[%s6965_s1 + $0x18] sm:$0xff]  ;;  %v4659_v9 = vld [vmem:[#allocation3 + $0x20] sm:$0xff] }
  0x2e   : > { %825 = vmatpush.bf16.msra.mxu0 %v4662_v1  ;;  %1079 = vperm.xlu0 %4996, %v1023_v3   ;;  %v1027_v5 = vld [vmem:[%s6965_s1 + $0x20] sm:$0xff]  ;;  %v1028_v11 = vld [vmem:[%s6965_s1 + $0x28] sm:$0xff]  ;;  %v1030_v16 = vld [vmem:[%s6965_s1 + $0x38] sm:$0xff]  ;;  %s4134_s22 = scalar_lea.sflag [#allocation5], %s444_s24  ;;  %s5147_s12 = scalar_lea.hbm %s6975_s11, 512 }
  0x2f   : > { %s4910_s28 = smul.u32 216, %s448_s4  ;;  %4888 = vmatpush.bf16.msra.mxu3 %v4662_v1  ;;  %4886 = vmatpush.bf16.msra.mxu1 %v4662_v1  ;;  %v5396_v14 = vld [vmem:[%s6966_s2] ss:$0 sm:$0xff]  ;;  %v4658_v15 = vld [vmem:[#allocation3 + $0x18] sm:$0xff]  ;;  %v1029_v17 = vld [vmem:[%s6965_s1 + $0x30] sm:$0xff]  ;;  %s4264_s4 = sshll.u32 %s444_s24, 8 }
  0x30   : > { %4887 = vmatpush.bf16.msra.mxu2 %v4662_v1  ;;  %1099 = vperm.xlu2 %4998, %v1027_v5   ;;  %v5409_v20 = vld [vmem:[%s6967_s3] ss:$0 sm:$0xff]  ;;  %v4656_v25 = vld [vmem:[#allocation3 + $0x8] sm:$0xff]  ;;  %v1033_v26 = vld [vmem:[%s6965_s1 + $0x50] sm:$0xff]  ;;  %s6751_s17 = scalar_lea.vmem [#allocation11], %s4264_s4 }
  0x31   : > { %s5384_s14 = scalar_lea.vmem %s6964_s0, %s4910_s28  ;;  %v4657_v21 = vld [vmem:[#allocation3 + $0x10] sm:$0xff]  ;;  %v1032_v27 = vld [vmem:[%s6965_s1 + $0x48] sm:$0xff]  ;;  %v4655_v30 = vld [vmem:[#allocation3] sm:$0xff]  ;;  %s4145_s28 = scalar_lea.hbm %s6975_s11, %s4751_s19 }
  0x32   : > { %826 = vmatpush.bf16.msra.mxu0 %v4661_v4  ;;  %v4753_v10 = vld [vmem:[%s5384_s14] sm:$0xff]   ;;  %v5423_v31 = vld [vmem:[%s5384_s14 + $0x8] sm:$0xff]   ;;  %v1034_v32 = vld [vmem:[%s6965_s1 + $0x58] sm:$0xff]  ;;  %s4146_s29 = sshll.u32 %s6751_s17, 4  ;;  %s4148_s16 = sshll.u32 %s4145_s28, 4  ;;  %s4147_s29 = int_to_ptr.vmem [resolvable:$true] %s4146_s29  ;;  %s4149_s16 = int_to_ptr.hbm [resolvable:$true] %s4148_s16 }
  0x33   : > { %4891 = vmatpush.bf16.msra.mxu3 %v4661_v4  ;;  %4889 = vmatpush.bf16.msra.mxu1 %v4661_v4  ;;  %v4754_v12 = vunpack.c.l.bf16 %v4753_v10  ;;  %v4755_v13 = vunpack.c.h.bf16 %v4753_v10  ;;  %v1031_v22 = vld [vmem:[%s6965_s1 + $0x40] sm:$0xff]  ;;  %7103 = vst [vmem:[#allocation21_spill] sm:$0xff] %v5423_v31  ;;  %v4758_v34 = vunpack.c.l.bf16 %v5423_v31  ;;  %v7012_v35 = vunpack.c.h.bf16 %v5423_v31  ;;  %v1036_v36 = vld [vmem:[%s6965_s1 + $0x68] sm:$0xff]  ;;  %v1037_v40 = vld [vmem:[%s6965_s1 + $0x70] sm:$0xff]  ;;  %s5141_s21 = sshra.s32 %s4149_s16, 4  ;;  %s5142_s21 = int_to_ptr.hbm [resolvable:$true] %s5141_s21 }
  0x34   : > { %4890 = vmatpush.bf16.msra.mxu2 %v4661_v4  ;;  %v1035_v37 = vld [vmem:[%s6965_s1 + $0x60] sm:$0xff]  ;;  %v1038_v44 = vld [vmem:[%s6965_s1 + $0x78] sm:$0xff]  ;;  %v5455_v48 = vld [vmem:[%s5384_s14 + $0x10] sm:$0xff]   ;;  %s5143_s25 = scalar_lea.hbm %s5142_s21, 256  ;;  %p5148_p3 = scmp.lt.s32.totalorder %s5142_s21, %s6975_s11 }
  0x35   : > { %1094 = vperm.xlu1 %4997, %v1026_v7   ;;  %v564_v18 = vmul.f32 %v5396_v14, %v4754_v12  ;;  %v565_v19 = vmul.f32 %v5396_v14, %v4755_v13  ;;  %v566_v38 = vmul.f32 %v5396_v14, %v4758_v34  ;;  %v567_v39 = vmul.f32 %v5396_v14, %v7012_v35  ;;  %v1039_v43 = vld [vmem:[%s6965_s1 + $0x80] sm:$0xff]  ;;  %v1040_v51 = vld [vmem:[%s6965_s1 + $0x88] sm:$0xff]  ;;  %v1042_v59 = vld [vmem:[%s6965_s1 + $0x98] sm:$0xff]  ;;  %p5144_p0 = scmp.ne.s32.totalorder %s5142_s21, %s5143_s25  ;;  %p5149_p4 = scmp.lt.s32.totalorder %s5147_s12, %s5143_s25 }
  0x36   : > { %827 = vmatpush.bf16.msra.mxu0 %v4660_v6  ;;  %1084 = vperm.xlu0 %4996, %v1024_v8   ;;  %v5452_v45 = vld [vmem:[%s5384_s14 + $0xc0] sm:$0xff]   ;;  %7105 = vst [vmem:[#allocation23_spill] sm:$0xff] %v5455_v48  ;;  %v7011_v54 = vunpack.c.l.bf16 %v5455_v48  ;;  %v7010_v56 = vunpack.c.h.bf16 %v5455_v48  ;;  %v5476_v60 = vld [vmem:[%s5384_s14 + $0x98] sm:$0xff]   ;;  %v1041_v61 = vld [vmem:[%s6965_s1 + $0x90] sm:$0xff] }
  0x37   : > { %4894 = vmatpush.bf16.msra.mxu3 %v4660_v6  ;;  %4892 = vmatpush.bf16.msra.mxu1 %v4660_v6  ;;  %v622_v23 = vadd.f32 %v5409_v20, %v564_v18  ;;  %v623_v24 = vadd.f32 %v5409_v20, %v565_v19  ;;  %v624_v41 = vadd.f32 %v5409_v20, %v566_v38  ;;  %v6983_v49 = vunpack.c.l.bf16 %v5452_v45  ;;  %v1045_v13 = vld [vmem:[%s6965_s1 + $0xb0] sm:$0xff]  ;;  %v5512_v19 = vld [vmem:[%s5384_s14 + $0xc8] sm:$0xff]   ;;  %p5145_p1 = pnand %p5144_p0, %p5310_p5  ;;  %p5150_p7 = por %p5149_p4, %p5148_p3 }
  0x38   : > { %4893 = vmatpush.bf16.msra.mxu2 %v4660_v6  ;;  %1104 = vperm.xlu2 %4998, %v1028_v11   ;;  %v625_v42 = vadd.f32 %v5409_v20, %v567_v39  ;;  %7104 = vst [vmem:[#allocation22_spill] sm:$0xff] %v5452_v45  ;;  %v6982_v50 = vunpack.c.h.bf16 %v5452_v45  ;;  %v6993_v0 = vunpack.c.l.bf16 %v5476_v60  ;;  %v568_v1 = vmul.f32 %v5396_v14, %v7011_v54  ;;  %v1043_v6 = vld [vmem:[%s6965_s1 + $0xa0] sm:$0xff]  ;;  %v5509_v18 = vld [vmem:[%s5384_s14 + $0xb0] sm:$0xff]  }
  0x39   : > { %v676_v28 = vmax.f32 %v622_v23, 0.0  ;;  %v677_v29 = vmax.f32 %v623_v24, 0.0  ;;  %v678_v46 = vmax.f32 %v624_v41, 0.0  ;;  %v612_v52 = vmul.f32 %v5396_v14, %v6983_v49  ;;  %7106 = vst [vmem:[#allocation24_spill] sm:$0xff] %v5476_v60  ;;  %v5515_v23 = vld [vmem:[%s5384_s14 + $0x18] sm:$0xff]   ;;  %p5146_p2 = pneg %p5145_p1 }
  0x3a   : > { %828 = vmatpush.bf16.msra.mxu0 %v4659_v9  ;;  %v679_v47 = vmax.f32 %v625_v42, 0.0  ;;  %v613_v53 = vmul.f32 %v5396_v14, %v6982_v50  ;;  %v6992_v2 = vunpack.c.h.bf16 %v5476_v60  ;;  %v569_v3 = vmul.f32 %v5396_v14, %v7010_v56  ;;  %7107 = vst [vmem:[#allocation25_spill] sm:$0xff] %v5509_v18  ;;  %v1074_v50 = vld [vmem:[%s6965_s1 + $0x198] sm:$0xff] }
  0x3b   : > { %4897 = vmatpush.bf16.msra.mxu3 %v4659_v9  ;;  %4895 = vmatpush.bf16.msra.mxu1 %v4659_v9  ;;  %v730_v33 = vpack.c.bf16 %v677_v29, %v676_v28  ;;  %v670_v57 = vadd.f32 %v5409_v20, %v612_v52  ;;  %v602_v5 = vmul.f32 %v5396_v14, %v6993_v0  ;;  %v6987_v24 = vunpack.c.l.bf16 %v5509_v18  ;;  %p5151_p8 = pnand %p5150_p7, %p5146_p2 }
  0x3c   : > { %4896 = vmatpush.bf16.msra.mxu2 %v4659_v9  ;;  %v731_v55 = vpack.c.bf16 %v679_v47, %v678_v46  ;;  %v671_v58 = vadd.f32 %v5409_v20, %v613_v53  ;;  %v603_v7 = vmul.f32 %v5396_v14, %v6992_v2  ;;  %v626_v10 = vadd.f32 %v5409_v20, %v568_v1  ;;  %v4679_v2 = vld [vmem:[#allocation6 + $0x80] sm:$0xff] }
  0x3d   : > { %1114 = vperm.xlu1 %4997, %v1030_v16   ;;  %v724_v62 = vmax.f32 %v670_v57, 0.0  ;;  %v660_v8 = vadd.f32 %v5409_v20, %v602_v5  ;;  %v627_v11 = vadd.f32 %v5409_v20, %v569_v3  ;;  %v1044_v16 = vld [vmem:[%s6965_s1 + $0xa8] sm:$0xff]  ;;  %7108 = vst [vmem:[#allocation26_spill] sm:$0xff] %v5512_v19  ;;  %v4855_v28 = vunpack.c.h.bf16 %v5512_v19 }
  0x3e   : > { %829 = vmatpush.bf16.msra.mxu0 %v4658_v15  ;;  %1109 = vperm.xlu0 %4996, %v1029_v17   ;;  %v725_v63 = vmax.f32 %v671_v58, 0.0  ;;  %v661_v9 = vadd.f32 %v5409_v20, %v603_v7  ;;  %7109 = vst [vmem:[#allocation27_spill] sm:$0xff] %v5515_v23  ;;  %v608_v29 = vmul.f32 %v5396_v14, %v6987_v24 }
  0x3f   : > { %4900 = vmatpush.bf16.msra.mxu3 %v4658_v15  ;;  %4898 = vmatpush.bf16.msra.mxu1 %v4658_v15  ;;  %v714_v12 = vmax.f32 %v660_v8, 0.0  ;;  %v615_v34 = vmul.f32 %v5396_v14, %v4855_v28  ;;  %v1051_v8 = vld [vmem:[%s6965_s1 + $0xe0] sm:$0xff] }
  0x40   : > { %4899 = vmatpush.bf16.msra.mxu2 %v4658_v15  ;;  %1119 = vperm.xlu2 %4998, %v1031_v22   ;;  %v754_v4 = vpack.c.bf16 %v725_v63, %v724_v62  ;;  %v715_v15 = vmax.f32 %v661_v9, 0.0  ;;  %v681_v22 = vmax.f32 %v627_v11, 0.0  ;;  %v666_v38 = vadd.f32 %v5409_v20, %v608_v29  ;;  %v1049_v62 = vld [vmem:[%s6965_s1 + $0xd0] sm:$0xff] }
  0x41   : > { %v673_v42 = vadd.f32 %v5409_v20, %v615_v34 }
  0x42   : > { %830 = vmatpush.bf16.msra.mxu0 %v4657_v21  ;;  %v749_v17 = vpack.c.bf16 %v715_v15, %v714_v12  ;;  %v720_v46 = vmax.f32 %v666_v38, 0.0  ;;  %v5577_v12 = vld [vmem:[%s5384_s14 + $0xb8] sm:$0xff]  }
  0x43   : > { %4903 = vmatpush.bf16.msra.mxu3 %v4657_v21  ;;  %4901 = vmatpush.bf16.msra.mxu1 %v4657_v21  ;;  %7111 = vst [vmem:[#allocation29_spill] sm:$0xff] %v5577_v12 }
  0x44   : > { %4902 = vmatpush.bf16.msra.mxu2 %v4657_v21  ;;  %v680_v21 = vmax.f32 %v626_v10, 0.0  ;;  %v1050_v10 = vld [vmem:[%s6965_s1 + $0xd8] sm:$0xff] }
  0x45   : > { %1129 = vperm.xlu1 %4997, %v1033_v26   ;;  %v1046_v26 = vld [vmem:[%s6965_s1 + $0xb8] sm:$0xff] }
  0x46   : > { %831 = vmatpush.bf16.msra.mxu0 %v4656_v25  ;;  %1124 = vperm.xlu0 %4996, %v1032_v27   ;;  %v6981_v27 = vunpack.c.l.bf16 %v5512_v19 }
  0x47   : > { %4906 = vmatpush.bf16.msra.mxu3 %v4656_v25  ;;  %4904 = vmatpush.bf16.msra.mxu1 %v4656_v25 }
  0x48   : > { %4905 = vmatpush.bf16.msra.mxu2 %v4656_v25  ;;  %1134 = vperm.xlu2 %4998, %v1034_v32   ;;  %v6986_v25 = vunpack.c.h.bf16 %v5509_v18  ;;  %v7009_v32 = vunpack.c.l.bf16 %v5515_v23 }
  0x4a   : > { %832 = vmatpush.bf16.msra.mxu0 %v4655_v30  ;;  %v570_v52 = vmul.f32 %v5396_v14, %v7009_v32 }
  0x4b   : > { %4909 = vmatpush.bf16.msra.mxu3 %v4655_v30  ;;  %4907 = vmatpush.bf16.msra.mxu1 %v4655_v30 }
  0x4c   : > { %4908 = vmatpush.bf16.msra.mxu2 %v4655_v30  ;;  %v609_v30 = vmul.f32 %v5396_v14, %v6986_v25  ;;  %v628_v5 = vadd.f32 %v5409_v20, %v570_v52  ;;  %v5606_v52 = vld [vmem:[%s5384_s14 + $0xa8] sm:$0xff]  }
  0x4d   : > { %833 = vmatmul.bf16.vlgmr.msra.gmra.mxu0 %v730_v33  ;;  %1144 = vperm.xlu1 %4997, %v1036_v36   ;;  %v614_v33 = vmul.f32 %v5396_v14, %v6981_v27  ;;  %v732_v36 = vpack.c.bf16 %v681_v22, %v680_v21  ;;  %v6985_v21 = vunpack.c.l.bf16 %v5577_v12  ;;  %v6984_v22 = vunpack.c.h.bf16 %v5577_v12  ;;  %7113 = vst [vmem:[#allocation31_spill] sm:$0xff] %v5606_v52  ;;  %v4684_v27 = vld [vmem:[#allocation6 + $0xa8] sm:$0xff] }
  0x4e   : > { %1139 = vperm.xlu0 %4996, %v1035_v37   ;;  %953 = vmatmul.bf16.vlgmr.msra.gmra.mxu3 %v754_v4  ;;  %v7008_v37 = vunpack.c.h.bf16 %v5515_v23  ;;  %v667_v39 = vadd.f32 %v5409_v20, %v609_v30  ;;  %v682_v15 = vmax.f32 %v628_v5, 0.0 }
  0x4f   : > { %928 = vmatmul.bf16.vlgmr.msra.gmra.mxu1 %v749_v17  ;;  %v672_v41 = vadd.f32 %v5409_v20, %v614_v33  ;;  %v5581_v17 = vld [vmem:[%s5384_s14 + $0x20] sm:$0xff]   ;;  %v610_v30 = vmul.f32 %v5396_v14, %v6985_v21  ;;  %v611_v33 = vmul.f32 %v5396_v14, %v6984_v22 }
  0x50   : > { %1149 = vperm.xlu2 %4998, %v1037_v40   ;;  %v1048_v40 = vld [vmem:[%s6965_s1 + $0xc8] sm:$0xff]  ;;  %v721_v47 = vmax.f32 %v667_v39, 0.0  ;;  %v571_v58 = vmul.f32 %v5396_v14, %v7008_v37  ;;  %7112 = vst [vmem:[#allocation30_spill] sm:$0xff] %v5581_v17  ;;  %v7006_v34 = vunpack.c.l.bf16 %v5581_v17  ;;  %v5756_v22 = vld [vmem:[%s5384_s14 + $0x40] sm:$0xff]  }
  0x51   : > { %v726_v53 = vmax.f32 %v672_v41, 0.0  ;;  %v668_v41 = vadd.f32 %v5409_v20, %v610_v30  ;;  %7117 = vst [vmem:[#allocation35_spill] sm:$0xff] %v5756_v22 }
  0x55   : > { %1159 = vperm.xlu1 %4997, %v1039_v43   ;;  %v5544_v43 = vld [vmem:[%s5384_s14 + $0xa0] sm:$0xff]  }
  0x56   : > { %1154 = vperm.xlu0 %4996, %v1038_v44   ;;  %7110 = vst [vmem:[#allocation28_spill] sm:$0xff] %v5544_v43  ;;  %v1047_v44 = vld [vmem:[%s6965_s1 + $0xc0] sm:$0xff]  ;;  %v6990_v57 = vunpack.c.h.bf16 %v5544_v43 }
  0x58   : > { %1164 = vperm.xlu2 %4998, %v1040_v51   ;;  %v6991_v51 = vunpack.c.l.bf16 %v5544_v43  ;;  %v605_v1 = vmul.f32 %v5396_v14, %v6990_v57  ;;  %v5784_v57 = vld [vmem:[%s5384_s14 + $0x48] sm:$0xff]   ;;  %v5876_v43 = vld [vmem:[%s5384_s14 + $0x60] sm:$0xff]  }
  0x59   : > { %7118 = vst [vmem:[#allocation36_spill] sm:$0xff] %v5784_v57 }
  0x5a   : > { %v663_v4 = vadd.f32 %v5409_v20, %v605_v1  ;;  %v6988_v1 = vunpack.c.h.bf16 %v5606_v52  ;;  %7121 = vst [vmem:[#allocation39_spill] sm:$0xff] %v5876_v43 }
  0x5c   : > { %v717_v9 = vmax.f32 %v663_v4, 0.0 }
  0x5d   : > { %838 = vmatmul.bf16.gmra.mxu0 %v731_v55  ;;  %1174 = vperm.xlu1 %4997, %v1042_v59   ;;  %v727_v55 = vmax.f32 %v673_v42, 0.0  ;;  %v752_v59 = vpack.c.bf16 %v721_v47, %v720_v46  ;;  %v669_v42 = vadd.f32 %v5409_v20, %v611_v33 }
  0x5e   : > { %1169 = vperm.xlu0 %4996, %v1041_v61   ;;  %v604_v61 = vmul.f32 %v5396_v14, %v6991_v51  ;;  %v4671_v51 = vld [vmem:[#allocation6 + $0x40] sm:$0xff] }
  0x5f   : > { %v755_v63 = vpack.c.bf16 %v727_v55, %v726_v53  ;;  %943 = vmatmul.bf16.vlgmr.msra.gmra.mxu2 %v752_v59  ;;  %v1053_v53 = vld [vmem:[%s6965_s1 + $0xf0] sm:$0xff]  ;;  %v722_v55 = vmax.f32 %v668_v41, 0.0  ;;  %v6989_v59 = vunpack.c.l.bf16 %v5606_v52 }
  0x60   : > { %1179 = vperm.xlu2 %4998, %v1043_v6   ;;  %v662_v3 = vadd.f32 %v5409_v20, %v604_v61  ;;  %v629_v6 = vadd.f32 %v5409_v20, %v571_v58  ;;  %v723_v58 = vmax.f32 %v669_v42, 0.0  ;;  %v572_v61 = vmul.f32 %v5396_v14, %v7006_v34 }
  0x61   : > { %958 = vmatmul.bf16.gmra.mxu3 %v755_v63  ;;  %v606_v5 = vmul.f32 %v5396_v14, %v6989_v59 }
  0x62   : > { %v716_v7 = vmax.f32 %v662_v3, 0.0  ;;  %v753_v4 = vpack.c.bf16 %v723_v58, %v722_v55  ;;  %v1061_v58 = vld [vmem:[%s6965_s1 + $0x130] sm:$0xff] }
  0x64   : > { %v750_v11 = vpack.c.bf16 %v717_v9, %v716_v7  ;;  %v664_v9 = vadd.f32 %v5409_v20, %v606_v5 }
  0x65   : > { %1189 = vperm.xlu1 %4997, %v1045_v13   ;;  %v4885_v13 = vld [vmem:[%s5384_s14 + $0xd0] sm:$0xff]  }
  0x66   : > { %1184 = vperm.xlu0 %4996, %v1044_v16   ;;  %v683_v16 = vmax.f32 %v629_v6, 0.0  ;;  %933 = vmatmul.bf16.gmra.mxu1 %v750_v11  ;;  %v4858_v28 = vunpack.c.l.bf16 %v4885_v13  ;;  %v4859_v29 = vunpack.c.h.bf16 %v4885_v13  ;;  %v1055_v6 = vld [vmem:[%s6965_s1 + $0x100] sm:$0xff]  ;;  %v630_v11 = vadd.f32 %v5409_v20, %v572_v61 }
  0x68   : > { %1194 = vperm.xlu2 %4998, %v1046_v26   ;;  %v1052_v26 = vld [vmem:[%s6965_s1 + $0xe8] sm:$0xff]  ;;  %v617_v38 = vmul.f32 %v5396_v14, %v4859_v29  ;;  %v733_v39 = vpack.c.bf16 %v683_v16, %v682_v15  ;;  %v718_v15 = vmax.f32 %v664_v9, 0.0  ;;  %v1057_v16 = vld [vmem:[%s6965_s1 + $0x110] sm:$0xff]  ;;  %v684_v30 = vmax.f32 %v630_v11, 0.0 }
  0x6a   : > { %v675_v47 = vadd.f32 %v5409_v20, %v617_v38  ;;  %v1058_v38 = vld [vmem:[%s6965_s1 + $0x118] sm:$0xff] }
  0x6c   : > { %v729_v63 = vmax.f32 %v675_v47, 0.0 }
  0x6d   : > { %843 = vmatmul.bf16.gmra.mxu0 %v732_v36  ;;  %1204 = vperm.xlu1 %4997, %v1048_v40   ;;  %v616_v36 = vmul.f32 %v5396_v14, %v4858_v28  ;;  %v7004_v40 = vunpack.c.h.bf16 %v5581_v17  ;;  %v1056_v28 = vld [vmem:[%s6965_s1 + $0x108] sm:$0xff] }
  0x6e   : > { %1199 = vperm.xlu0 %4996, %v1047_v44   ;;  %v1054_v44 = vld [vmem:[%s6965_s1 + $0xf8] sm:$0xff]  ;;  %v5909_v17 = vld [vmem:[%s5384_s14 + $0x68] sm:$0xff]  }
  0x6f   : > { %v674_v46 = vadd.f32 %v5409_v20, %v616_v36  ;;  %v573_v3 = vmul.f32 %v5396_v14, %v7004_v40  ;;  %948 = vmatmul.bf16.gmra.mxu2 %v753_v4  ;;  %v5639_v36 = vld [vmem:[%s5384_s14 + $0x28] sm:$0xff]   ;;  %7122 = vst [vmem:[#allocation40_spill] sm:$0xff] %v5909_v17  ;;  %v7064_v23 = vunpack.c.l.bf16 %v5909_v17 }
  0x70   : > { %1209 = vperm.xlu2 %4998, %v1049_v62   ;;  %7114 = vst [vmem:[#allocation32_spill] sm:$0xff] %v5639_v36  ;;  %v7003_v41 = vunpack.c.l.bf16 %v5639_v36  ;;  %v7002_v42 = vunpack.c.h.bf16 %v5639_v36 }
  0x71   : > { %v728_v62 = vmax.f32 %v674_v46, 0.0  ;;  %v631_v13 = vadd.f32 %v5409_v20, %v573_v3  ;;  %v1059_v46 = vld [vmem:[%s6965_s1 + $0x120] sm:$0xff]  ;;  %v1062_v3 = vld [vmem:[%s6965_s1 + $0x138] sm:$0xff] }
  0x72   : > { %v575_v55 = vmul.f32 %v5396_v14, %v7002_v42 }
  0x73   : > { %v756_v7 = vpack.c.bf16 %v729_v63, %v728_v62  ;;  %v685_v33 = vmax.f32 %v631_v13, 0.0  ;;  %v1063_v63 = vld [vmem:[%s6965_s1 + $0x140] sm:$0xff]  ;;  %v1066_v13 = vld [vmem:[%s6965_s1 + $0x158] sm:$0xff] }
  0x74   : > { %v633_v62 = vadd.f32 %v5409_v20, %v575_v55  ;;  %v4668_v55 = vld [vmem:[#allocation6 + $0x28] sm:$0xff] }
  0x75   : > { %1219 = vperm.xlu1 %4997, %v1051_v8   ;;  %v607_v8 = vmul.f32 %v5396_v14, %v6988_v1  ;;  %963 = vmatmul.bf16.gmra.mxu3 %v756_v7  ;;  %v5674_v7 = vld [vmem:[%s5384_s14 + $0x30] sm:$0xff]  }
  0x76   : > { %1214 = vperm.xlu0 %4996, %v1050_v10   ;;  %7115 = vst [vmem:[#allocation33_spill] sm:$0xff] %v5674_v7  ;;  %v6999_v11 = vunpack.c.h.bf16 %v5674_v7 }
  0x77   : > { %v665_v10 = vadd.f32 %v5409_v20, %v607_v8  ;;  %v1064_v8 = vld [vmem:[%s6965_s1 + $0x148] sm:$0xff] }
  0x78   : > { %1224 = vperm.xlu2 %4998, %v1052_v26  }
  0x79   : > { %v719_v26 = vmax.f32 %v665_v10, 0.0  ;;  %v7000_v10 = vunpack.c.l.bf16 %v5674_v7 }
  0x7b   : > { %v751_v29 = vpack.c.bf16 %v719_v26, %v718_v15  ;;  %v4670_v15 = vld [vmem:[#allocation6 + $0x38] sm:$0xff] }
  0x7c   : > { %1769 = vmatpush.bf16.msrb.mxu2 %v4670_v15  ;;  %v1072_v15 = vld [vmem:[%s6965_s1 + $0x188] sm:$0xff] }
  0x7d   : > { %848 = vmatmul.bf16.gmra.mxu0 %v733_v39  ;;  %1234 = vperm.xlu1 %4997, %v1054_v44   ;;  %v734_v39 = vpack.c.bf16 %v685_v33, %v684_v30  ;;  %v1060_v44 = vld [vmem:[%s6965_s1 + $0x128] sm:$0xff]  ;;  %v1067_v30 = vld [vmem:[%s6965_s1 + $0x160] sm:$0xff] }
  0x7e   : > { %1229 = vperm.xlu0 %4996, %v1053_v53   ;;  %938 = vmatmul.bf16.gmra.mxu1 %v751_v29  ;;  %v574_v53 = vmul.f32 %v5396_v14, %v7003_v41  ;;  %v577_v29 = vmul.f32 %v5396_v14, %v6999_v11  ;;  %v4669_v33 = vld [vmem:[#allocation6 + $0x30] sm:$0xff] }
  0x80   : > { %1239 = vperm.xlu2 %4998, %v1055_v6   ;;  %v632_v61 = vadd.f32 %v5409_v20, %v574_v53  ;;  %v687_v6 = vmax.f32 %v633_v62, 0.0  ;;  %1770 = vmatpush.bf16.msrb.mxu2 %v4669_v33  ;;  %v1069_v53 = vld [vmem:[%s6965_s1 + $0x170] sm:$0xff]  ;;  %v4666_v33 = vld [vmem:[#allocation6 + $0x18] sm:$0xff] }
  0x82   : > { %v686_v5 = vmax.f32 %v632_v61, 0.0 }
  0x84   : > { %v735_v9 = vpack.c.bf16 %v687_v6, %v686_v5  ;;  %1771 = vmatpush.bf16.msrb.mxu2 %v4668_v55  ;;  %v1070_v5 = vld [vmem:[%s6965_s1 + $0x178] sm:$0xff]  ;;  %v4667_v6 = vld [vmem:[#allocation6 + $0x20] sm:$0xff] }
  0x85   : > { %1249 = vperm.xlu1 %4997, %v1057_v16   ;;  %v1065_v16 = vld [vmem:[%s6965_s1 + $0x150] sm:$0xff] }
  0x86   : > { %1244 = vperm.xlu0 %4996, %v1056_v28   ;;  %v576_v28 = vmul.f32 %v5396_v14, %v7000_v10 }
  0x88   : > { %1254 = vperm.xlu2 %4998, %v1058_v38   ;;  %1772 = vmatpush.bf16.msrb.mxu2 %v4667_v6 }
  0x8a   : > { %v5652_v47 = vpop.permute.xlu2 %1099 }
  0x8c   : > { %1773 = vmatpush.bf16.msrb.mxu2 %v4666_v33  ;;  %v4664_v33 = vld [vmem:[#allocation6 + $0x8] sm:$0xff] }
  0x8d   : > { %853 = vmatmul.bf16.gmra.mxu0 %v734_v39  ;;  %1264 = vperm.xlu1 %4997, %v1060_v44   ;;  %v634_v44 = vadd.f32 %v5409_v20, %v576_v28 }
  0x8e   : > { %1259 = vperm.xlu0 %4996, %v1059_v46   ;;  %v635_v46 = vadd.f32 %v5409_v20, %v577_v29  ;;  %v4678_v29 = vld [vmem:[#allocation6 + $0x78] sm:$0xff] }
  0x8f   : > { %v688_v62 = vmax.f32 %v634_v44, 0.0  ;;  %v1071_v44 = vld [vmem:[%s6965_s1 + $0x180] sm:$0xff]  ;;  %1632 = vmatpush.bf16.msrb.mxu1 %v4678_v29 }
  0x90   : > { %1269 = vperm.xlu2 %4998, %v1061_v58   ;;  %v1068_v58 = vld [vmem:[%s6965_s1 + $0x168] sm:$0xff] }
  0x92   : > { %v5671_v4 = vpop.permute.xlu2 %1104 }
  0x95   : > { %1279 = vperm.xlu1 %4997, %v1063_v63   ;;  %v689_v63 = vmax.f32 %v635_v46, 0.0 }
  0x96   : > { %1274 = vperm.xlu0 %4996, %v1062_v3   ;;  %v5713_v3 = vld [vmem:[%s5384_s14 + $0x38] sm:$0xff]  }
  0x97   : > { %7116 = vst [vmem:[#allocation34_spill] sm:$0xff] %v5713_v3  ;;  %v6996_v28 = vunpack.c.h.bf16 %v5713_v3 }
  0x98   : > { %1284 = vperm.xlu2 %4998, %v1064_v8  }
  0x99   : > { %v579_v55 = vmul.f32 %v5396_v14, %v6996_v28 }
  0x9a   : > { %v5687_v26 = vpop.permute.xlu2 %1119 }
  0x9d   : > { %858 = vmatmul.bf16.gmra.mxu0 %v735_v9  ;;  %1294 = vperm.xlu1 %4997, %v1066_v13   ;;  %v736_v13 = vpack.c.bf16 %v689_v63, %v688_v62  ;;  %v4677_v62 = vld [vmem:[#allocation6 + $0x70] sm:$0xff] }
  0x9e   : > { %1289 = vperm.xlu0 %4996, %v1065_v16   ;;  %v6997_v16 = vunpack.c.l.bf16 %v5713_v3  ;;  %v4685_v63 = vld [vmem:[#allocation6 + $0xb0] sm:$0xff]  ;;  %1633 = vmatpush.bf16.msrb.mxu1 %v4677_v62 }
  0x9f   : > { %v5698_v38 = vpop.permute.xlu1 %1089 }
  0xa0   : > { %v5700_v39 = vpop.permute.xlu0 %1079  ;;  %1299 = vperm.xlu2 %4998, %v1067_v30   ;;  %v4686_v30 = vld [vmem:[#allocation6 + $0xb8] sm:$0xff] }
  0xa1   : > { %1971 = vmatpush.bf16.msrb.mxu3 %v4686_v30  ;;  %v637_v30 = vadd.f32 %v5409_v20, %v579_v55  ;;  %v4675_v55 = vld [vmem:[#allocation6 + $0x60] sm:$0xff] }
  0xa2   : > { %v5710_v61 = vpop.permute.xlu2 %1134 }
  0xa3   : > { %v691_v49 = vmax.f32 %v637_v30, 0.0  ;;  %v4674_v30 = vld [vmem:[#allocation6 + $0x58] sm:$0xff] }
  0xa5   : > { %1309 = vperm.xlu1 %4997, %v1069_v53   ;;  %v578_v53 = vmul.f32 %v5396_v14, %v6997_v16  ;;  %1972 = vmatpush.bf16.msrb.mxu3 %v4685_v63 }
  0xa6   : > { %1304 = vperm.xlu0 %4996, %v1068_v58   ;;  %v1073_v58 = vld [vmem:[%s6965_s1 + $0x190] sm:$0xff] }
  0xa7   : > { %v5718_v8 = vpop.permute.xlu1 %1094  ;;  %v636_v29 = vadd.f32 %v5409_v20, %v578_v53  ;;  %v1076_v53 = vld [vmem:[%s6965_s1 + $0x1a8] sm:$0xff] }
  0xa8   : > { %v5720_v9 = vpop.permute.xlu0 %1084  ;;  %1314 = vperm.xlu2 %4998, %v1070_v5   ;;  %v4665_v5 = vld [vmem:[#allocation6 + $0x10] sm:$0xff] }
  0xa9   : > { %1774 = vmatpush.bf16.msrb.mxu2 %v4665_v5  ;;  %1973 = vmatpush.bf16.msrb.mxu3 %v4684_v27  ;;  %v690_v63 = vmax.f32 %v636_v29, 0.0  ;;  %v4663_v5 = vld [vmem:[#allocation6] sm:$0xff]  ;;  %v6994_v29 = vunpack.c.h.bf16 %v5756_v22 }
  0xaa   : > { %v5730_v46 = vpop.permute.xlu2 %1149 }
  0xab   : > { %v737_v27 = vpack.c.bf16 %v691_v49, %v690_v63  ;;  %v581_v49 = vmul.f32 %v5396_v14, %v6994_v29  ;;  %v4673_v63 = vld [vmem:[#allocation6 + $0x50] sm:$0xff] }
  0xad   : > { %863 = vmatmul.bf16.gmra.mxu0 %v736_v13  ;;  %1324 = vperm.xlu1 %4997, %v1072_v15   ;;  %v1075_v15 = vld [vmem:[%s6965_s1 + $0x1a0] sm:$0xff] }
  0xae   : > { %1319 = vperm.xlu0 %4996, %v1071_v44   ;;  %v4676_v44 = vld [vmem:[#allocation6 + $0x68] sm:$0xff]  ;;  %1775 = vmatpush.bf16.msrb.mxu2 %v4664_v33 }
  0xaf   : > { %v5741_v6 = vpop.permute.xlu1 %1114  ;;  %1634 = vmatpush.bf16.msrb.mxu1 %v4676_v44  ;;  %v4682_v44 = vld [vmem:[#allocation6 + $0x98] sm:$0xff] }
  0xb0   : > { %v5743_v13 = vpop.permute.xlu0 %1109  ;;  %1329 = vperm.xlu2 %4998, %v1073_v58   ;;  %v4683_v58 = vld [vmem:[#allocation6 + $0xa0] sm:$0xff] }
  0xb1   : > { %1974 = vmatpush.bf16.msrb.mxu3 %v4683_v58 }
  0xb2   : > { %v5753_v62 = vpop.permute.xlu2 %1164  ;;  %1776 = vmatpush.bf16.msrb.mxu2 %v4663_v5 }
  0xb3   : > { %1635 = vmatpush.bf16.msrb.mxu1 %v4675_v55  ;;  %v4681_v55 = vld [vmem:[#allocation6 + $0x90] sm:$0xff] }
  0xb5   : > { %1339 = vperm.xlu1 %4997, %v1075_v15   ;;  %v6995_v15 = vunpack.c.l.bf16 %v5756_v22  ;;  %1975 = vmatpush.bf16.msrb.mxu3 %v4682_v44  ;;  %v4680_v44 = vld [vmem:[#allocation6 + $0x88] sm:$0xff] }
  0xb6   : > { %1334 = vperm.xlu0 %4996, %v1074_v50  }
  0xb7   : > { %v5761_v21 = vpop.permute.xlu1 %1129  ;;  %1636 = vmatpush.bf16.msrb.mxu1 %v4674_v30  ;;  %v580_v33 = vmul.f32 %v5396_v14, %v6995_v15  ;;  %v4672_v30 = vld [vmem:[#allocation6 + $0x48] sm:$0xff] }
  0xb8   : > { %v5763_v25 = vpop.permute.xlu0 %1124  ;;  %1344 = vperm.xlu2 %4998, %v1076_v53  }
  0xb9   : > { %1976 = vmatpush.bf16.msrb.mxu3 %v4681_v55  ;;  %v638_v5 = vadd.f32 %v5409_v20, %v580_v33 }
  0xba   : > { %v5767_v50 = vpop.permute.xlu2 %1179 }
  0xbb   : > { %1637 = vmatpush.bf16.msrb.mxu1 %v4673_v63  ;;  %v692_v1 = vmax.f32 %v638_v5, 0.0  ;;  %v5789_v63 = vld [vmem:[%s6969_s5] ss:$0 sm:$0xff]  ;;  %v7001_v5 = vunpack.c.h.bf16 %v5784_v57 }
  0xbd   : > { %868 = vmatmul.bf16.gmra.mxu0 %v737_v27  ;;  %v639_v27 = vadd.f32 %v5409_v20, %v581_v49  ;;  %1977 = vmatpush.bf16.msrb.mxu3 %v4680_v44 }
  0xbf   : > { %v5775_v53 = vpop.permute.xlu1 %1144  ;;  %1638 = vmatpush.bf16.msrb.mxu1 %v4672_v30  ;;  %v693_v59 = vmax.f32 %v639_v27, 0.0  ;;  %v6998_v30 = vunpack.c.l.bf16 %v5784_v57 }
  0xc0   : > { %v5777_v58 = vpop.permute.xlu0 %1139 }
  0xc1   : > { %1978 = vmatpush.bf16.msrb.mxu3 %v4679_v2  ;;  %v738_v55 = vpack.c.bf16 %v693_v59, %v692_v1  ;;  %v582_v15 = vmul.f32 %v5396_v14, %v6998_v30  ;;  %v583_v2 = vmul.f32 %v5396_v14, %v7001_v5  ;;  %v5817_v5 = vld [vmem:[%s5384_s14 + $0x50] sm:$0xff]  }
  0xc2   : > { %v5781_v24 = vpop.permute.xlu2 %1194  ;;  %7119 = vst [vmem:[#allocation37_spill] sm:$0xff] %v5817_v5 }
  0xc3   : > { %1639 = vmatpush.bf16.msrb.mxu1 %v4671_v51 }
  0xc7   : > { %v5791_v33 = vpop.permute.xlu1 %1159 }
  0xc8   : > { %v5793_v49 = vpop.permute.xlu0 %1154 }
  0xca   : > { %v834_v27 = vpop.f32.mrf.mxu0  ;;  %v5798_v0 = vpop.permute.xlu2 %1209 }
  0xcb   : > { %v835_v44 = vadd.f32 %v5789_v63, %v834_v27  ;;  %v640_v27 = vadd.f32 %v5409_v20, %v582_v15  ;;  %v7005_v15 = vunpack.c.l.bf16 %v5817_v5 }
  0xcd   : > { %v969_v29 = vmax.f32 %v835_v44, 0.0  ;;  %873 = vmatmul.bf16.gmra.mxu0 %v738_v55  ;;  %v641_v44 = vadd.f32 %v5409_v20, %v583_v2  ;;  %v694_v11 = vmax.f32 %v640_v27, 0.0  ;;  %v7007_v2 = vunpack.c.h.bf16 %v5817_v5 }
  0xcf   : > { %v1347_v51 = vmul.f32 %v5700_v39, %v969_v29  ;;  %v5807_v59 = vpop.permute.xlu1 %1174  ;;  %v695_v10 = vmax.f32 %v641_v44, 0.0 }
  0xd0   : > { %v5809_v1 = vpop.permute.xlu0 %1169 }
  0xd1   : > { %1401 = vst [vmem:[#allocation2] sm:$0xff] %v1347_v51  ;;  %v739_v41 = vpack.c.bf16 %v695_v10, %v694_v11 }
  0xd2   : > { %v836_v55 = vpop.f32.mrf.mxu0  ;;  %v5814_v16 = vpop.permute.xlu2 %1224 }
  0xd3   : > { %v837_v28 = vadd.f32 %v5789_v63, %v836_v55 }
  0xd5   : > { %v970_v30 = vmax.f32 %v837_v28, 0.0 }
  0xd7   : > { %v1348_v39 = vmul.f32 %v5720_v9, %v970_v30  ;;  %v5820_v29 = vpop.permute.xlu1 %1189  ;;  %v584_v9 = vmul.f32 %v5396_v14, %v7005_v15  ;;  %v585_v30 = vmul.f32 %v5396_v14, %v7007_v2  ;;  %v5842_v15 = vpop.f32.mrf.mxu3 }
  0xd8   : > { %v5822_v42 = vpop.permute.xlu0 %1184 }
  0xd9   : > { %1402 = vst [vmem:[#allocation2 + $0x8] sm:$0xff] %v1348_v39  ;;  %v1487_v55 = vpack.c.bf16 %v1348_v39, %v1347_v51  ;;  %v643_v39 = vadd.f32 %v5409_v20, %v585_v30 }
  0xda   : > { %v839_v40 = vpop.f32.mrf.mxu0  ;;  %v5827_v27 = vpop.permute.xlu2 %1239 }
  0xdb   : > { %v840_v28 = vadd.f32 %v5789_v63, %v839_v40  ;;  %1777 = vmatmul.bf16.vlgmr.msrb.gmra.mxu2 %v1487_v55  ;;  %v642_v40 = vadd.f32 %v5409_v20, %v584_v9  ;;  %v697_v37 = vmax.f32 %v643_v39, 0.0 }
  0xdd   : > { %v971_v44 = vmax.f32 %v840_v28, 0.0  ;;  %878 = vmatmul.bf16.gmra.mxu0 %v739_v41  ;;  %v929_v28 = vpop.f32.mrf.mxu1  ;;  %v696_v41 = vmax.f32 %v642_v40, 0.0 }
  0xde   : > { %v930_v39 = vadd.f32 %v5789_v63, %v929_v28 }
  0xdf   : > { %v1349_v10 = vmul.f32 %v5698_v38, %v971_v44  ;;  %v5836_v11 = vpop.permute.xlu1 %1204  ;;  %v5848_v44 = vld [vmem:[%s5384_s14 + $0x58] sm:$0xff]   ;;  %v740_v35 = vpack.c.bf16 %v697_v37, %v696_v41 }
  0xe0   : > { %v5838_v51 = vpop.permute.xlu0 %1199  ;;  %7120 = vst [vmem:[#allocation38_spill] sm:$0xff] %v5848_v44  ;;  %v1519_v56 = vld [vmem:[#allocation2 + $0x1] sm:$0xff]  ;;  %v1007_v18 = vmax.f32 %v930_v39, 0.0 }
  0xe1   : > { %1403 = vst [vmem:[#allocation2 + $0x10] sm:$0xff] %v1349_v10  ;;  %v1858_v10 = vld [vmem:[#allocation2 + $0x2] sm:$0xff] }
  0xe2   : > { %v841_v55 = vpop.f32.mrf.mxu0  ;;  %v5845_v2 = vpop.permute.xlu2 %1254 }
  0xe3   : > { %v842_v34 = vadd.f32 %v5789_v63, %v841_v55  ;;  %v7022_v55 = vunpack.c.l.bf16 %v5848_v44 }
  0xe5   : > { %v972_v38 = vmax.f32 %v842_v34, 0.0  ;;  %v7023_v34 = vunpack.c.h.bf16 %v5848_v44  ;;  %v931_v41 = vpop.f32.mrf.mxu1 }
  0xe7   : > { %v1350_v32 = vmul.f32 %v5718_v8, %v972_v38  ;;  %v5851_v9 = vpop.permute.xlu1 %1219  ;;  %v5858_v8 = vpop.f32.mrf.mxu3 }
  0xe8   : > { %v1520_v30 = vld [vmem:[#allocation2 + $0x9] sm:$0xff]  ;;  %v5853_v19 = vpop.permute.xlu0 %1214 }
  0xe9   : > { %v1859_v54 = vld [vmem:[#allocation2 + $0xa] sm:$0xff]  ;;  %1404 = vst [vmem:[#allocation2 + $0x18] sm:$0xff] %v1350_v32  ;;  %v1551_v45 = vpack.c.bf16 %v1520_v30, %v1519_v56  ;;  %v587_v56 = vmul.f32 %v5396_v14, %v7023_v34 }
  0xea   : > { %v1890_v40 = vpack.c.bf16 %v1859_v54, %v1858_v10  ;;  %v844_v12 = vpop.f32.mrf.mxu0  ;;  %v1270_v37 = vpop.permute.xlu2 %1269  ;;  %v586_v54 = vmul.f32 %v5396_v14, %v7022_v55 }
  0xeb   : > { %v845_v38 = vadd.f32 %v5789_v63, %v844_v12  ;;  %1640 = vmatmul.bf16.vlgmr.msrb.gmra.mxu1 %v1551_v45  ;;  %v1385_v28 = vmul.f32 %v1270_v37, %v1007_v18 }
  0xec   : > { %1979 = vmatmul.bf16.vlgmr.msrb.gmra.mxu3 %v1890_v40  ;;  %v645_v40 = vadd.f32 %v5409_v20, %v587_v56  ;;  %v7040_v56 = vunpack.c.l.bf16 %v5876_v43 }
  0xed   : > { %v973_v52 = vmax.f32 %v845_v38, 0.0  ;;  %883 = vmatmul.bf16.gmra.mxu0 %v740_v35  ;;  %1439 = vst [vmem:[#allocation2 + $0x130] sm:$0xff] %v1385_v28  ;;  %v644_v35 = vadd.f32 %v5409_v20, %v586_v54  ;;  %v944_v38 = vpop.f32.mrf.mxu2  ;;  %v934_v37 = vpop.f32.mrf.mxu1 }
  0xee   : > { %v699_v28 = vmax.f32 %v645_v40, 0.0 }
  0xef   : > { %v1351_v30 = vmul.f32 %v5652_v47, %v973_v52  ;;  %v5868_v10 = vpop.permute.xlu1 %1234  ;;  %v959_v52 = vpop.f32.mrf.mxu3  ;;  %v698_v34 = vmax.f32 %v644_v35, 0.0 }
  0xf0   : > { %v5870_v45 = vpop.permute.xlu0 %1229 }
  0xf1   : > { %1405 = vst [vmem:[#allocation2 + $0x20] sm:$0xff] %v1351_v30  ;;  %v1488_v12 = vpack.c.bf16 %v1351_v30, %v1350_v32  ;;  %v7043_v30 = vunpack.c.h.bf16 %v5876_v43 }
  0xf2   : > { %v846_v39 = vpop.f32.mrf.mxu0  ;;  %v1285_v18 = vpop.permute.xlu2 %1284 }
  0xf3   : > { %v847_v55 = vadd.f32 %v5789_v63, %v846_v39  ;;  %1782 = vmatmul.bf16.gmra.mxu2 %v1488_v12  ;;  %v741_v12 = vpack.c.bf16 %v699_v28, %v698_v34  ;;  %v945_v39 = vadd.f32 %v5789_v63, %v944_v38  ;;  %v589_v57 = vmul.f32 %v5396_v14, %v7043_v30 }
  0xf5   : > { %v974_v47 = vmax.f32 %v847_v55, 0.0  ;;  %v5886_v55 = vpop.f32.mrf.mxu2  ;;  %v1013_v40 = vmax.f32 %v945_v39, 0.0 }
  0xf7   : > { %v1352_v60 = vmul.f32 %v5671_v4, %v974_v47  ;;  %v5879_v32 = vpop.permute.xlu1 %1249  ;;  %v936_v4 = vpop.f32.mrf.mxu1  ;;  %v588_v47 = vmul.f32 %v5396_v14, %v7040_v56  ;;  %v647_v14 = vadd.f32 %v5409_v20, %v589_v57 }
  0xf8   : > { %v5881_v54 = vpop.permute.xlu0 %1244  ;;  %v1521_v22 = vld [vmem:[#allocation2 + $0x19] sm:$0xff] }
  0xf9   : > { %1406 = vst [vmem:[#allocation2 + $0x28] sm:$0xff] %v1352_v60  ;;  %v5895_v60 = vpop.f32.mrf.mxu3  ;;  %v1860_v3 = vld [vmem:[#allocation2 + $0x1a] sm:$0xff]  ;;  %v646_v43 = vadd.f32 %v5409_v20, %v588_v47 }
  0xfa   : > { %v849_v44 = vpop.f32.mrf.mxu0  ;;  %v1300_v5 = vpop.permute.xlu2 %1299 }
  0xfb   : > { %v850_v35 = vadd.f32 %v5789_v63, %v849_v44  ;;  %v1391_v38 = vmul.f32 %v1300_v5, %v1013_v40  ;;  %v937_v40 = vadd.f32 %v5789_v63, %v936_v4  ;;  %v700_v57 = vmax.f32 %v646_v43, 0.0 }
  0xfc   : > { %v701_v4 = vmax.f32 %v647_v14, 0.0 }
  0xfd   : > { %v975_v34 = vmax.f32 %v850_v35, 0.0  ;;  %888 = vmatmul.bf16.gmra.mxu0 %v741_v12  ;;  %1445 = vst [vmem:[#allocation2 + $0x160] sm:$0xff] %v1391_v38  ;;  %v935_v35 = vadd.f32 %v5789_v63, %v934_v37  ;;  %v949_v38 = vpop.f32.mrf.mxu2  ;;  %v1010_v36 = vmax.f32 %v937_v40, 0.0  ;;  %v7063_v40 = vunpack.c.h.bf16 %v5909_v17 }
  0xff   : > { %v1353_v28 = vmul.f32 %v5743_v13, %v975_v34  ;;  %v5898_v44 = vpop.permute.xlu1 %1264  ;;  %v932_v13 = vadd.f32 %v5789_v63, %v931_v41  ;;  %v939_v20 = vpop.f32.mrf.mxu1  ;;  %v1009_v37 = vmax.f32 %v935_v35, 0.0  ;;  %v742_v35 = vpack.c.bf16 %v701_v4, %v700_v57 }
 0x100   : > { %v1522_v39 = vld [vmem:[#allocation2 + $0x21] sm:$0xff]  ;;  %v5900_v56 = vpop.permute.xlu0 %1259 }
 0x101   : > { %v1861_v7 = vld [vmem:[#allocation2 + $0x22] sm:$0xff]  ;;  %1407 = vst [vmem:[#allocation2 + $0x30] sm:$0xff] %v1353_v28  ;;  %v1552_v5 = vpack.c.bf16 %v1522_v39, %v1521_v22  ;;  %v960_v22 = vadd.f32 %v5789_v63, %v959_v52  ;;  %v1008_v41 = vmax.f32 %v932_v13, 0.0  ;;  %v1388_v39 = vmul.f32 %v1285_v18, %v1010_v36  ;;  %v5923_v36 = vld [vmem:[%s6966_s2] ss:$0 sm:$0xff] }
 0x102   : > { %v1891_v12 = vpack.c.bf16 %v1861_v7, %v1860_v3  ;;  %v851_v34 = vpop.f32.mrf.mxu0  ;;  %v1315_v47 = vpop.permute.xlu2 %1314 }
 0x103   : > { %v852_v30 = vadd.f32 %v5789_v63, %v851_v34  ;;  %1645 = vmatmul.bf16.gmra.mxu1 %v1552_v5  ;;  %v5912_v7 = vpop.f32.mrf.mxu3  ;;  %1442 = vst [vmem:[#allocation2 + $0x148] sm:$0xff] %v1388_v39  ;;  %v1019_v43 = vmax.f32 %v960_v22, 0.0 }
 0x104   : > { %1984 = vmatmul.bf16.gmra.mxu3 %v1891_v12 }
 0x105   : > { %v976_v3 = vmax.f32 %v852_v30, 0.0  ;;  %v940_v30 = vadd.f32 %v5789_v63, %v939_v20  ;;  %v951_v18 = vpop.f32.mrf.mxu2 }
 0x106   : > { %v952_v57 = vadd.f32 %v5789_v63, %v951_v18 }
 0x107   : > { %v1354_v5 = vmul.f32 %v5741_v6, %v976_v3  ;;  %v1280_v12 = vpop.permute.xlu1 %1279  ;;  %v590_v6 = vmul.f32 %v5923_v36, %v7064_v23  ;;  %v941_v20 = vpop.f32.mrf.mxu1  ;;  %v1011_v4 = vmax.f32 %v940_v30, 0.0  ;;  %v4726_v23 = vld [vmem:[#allocation6 + $0x1f8] sm:$0xff] }
 0x108   : > { %v1275_v34 = vpop.permute.xlu0 %1274  ;;  %v1387_v48 = vmul.f32 %v1280_v12, %v1009_v37  ;;  %v942_v22 = vadd.f32 %v5789_v63, %v941_v20  ;;  %v1016_v39 = vmax.f32 %v952_v57, 0.0 }
 0x109   : > { %1408 = vst [vmem:[#allocation2 + $0x38] sm:$0xff] %v1354_v5  ;;  %v1386_v52 = vmul.f32 %v1275_v34, %v1008_v41  ;;  %v5917_v31 = vpack.c.bf16 %v1354_v5, %v1353_v28  ;;  %v591_v28 = vmul.f32 %v5923_v36, %v7063_v40 }
 0x10a   : > { %v854_v14 = vpop.f32.mrf.mxu0  ;;  %1441 = vst [vmem:[#allocation2 + $0x140] sm:$0xff] %v1387_v48  ;;  %v1330_v48 = vpop.permute.xlu2 %1329  ;;  %v1012_v12 = vmax.f32 %v942_v22, 0.0 }
 0x10b   : > { %v855_v13 = vadd.f32 %v5789_v63, %v854_v14  ;;  %1440 = vst [vmem:[#allocation2 + $0x138] sm:$0xff] %v1386_v52  ;;  %1787 = vmatmul.bf16.gmra.mxu2 %v5917_v31  ;;  %v1397_v37 = vmul.f32 %v1330_v48, %v1019_v43  ;;  %v966_v3 = vpop.f32.mrf.mxu3  ;;  %v5940_v14 = vld [vmem:[%s6967_s3] ss:$0 sm:$0xff]  ;;  %v1394_v48 = vmul.f32 %v1315_v47, %v1016_v39  ;;  %v5949_v39 = vld [vmem:[%s5384_s14 + $0x70] sm:$0xff]  }
 0x10c   : > { %v967_v5 = vadd.f32 %v5789_v63, %v966_v3  ;;  %v648_v43 = vadd.f32 %v5940_v14, %v590_v6  ;;  %v649_v18 = vadd.f32 %v5940_v14, %v591_v28  ;;  %7123 = vst [vmem:[#allocation41_spill] sm:$0xff] %v5949_v39 }
 0x10d   : > { %v977_v41 = vmax.f32 %v855_v13, 0.0  ;;  %893 = vmatmul.bf16.gmra.mxu0 %v742_v35  ;;  %1451 = vst [vmem:[#allocation2 + $0x190] sm:$0xff] %v1397_v37  ;;  %v950_v35 = vadd.f32 %v5789_v63, %v949_v38 }
 0x10e   : > { %v1022_v20 = vmax.f32 %v967_v5, 0.0  ;;  %v702_v3 = vmax.f32 %v648_v43, 0.0  ;;  %v703_v28 = vmax.f32 %v649_v18, 0.0  ;;  %1448 = vst [vmem:[#allocation2 + $0x178] sm:$0xff] %v1394_v48 }
 0x10f   : > { %v1355_v34 = vmul.f32 %v5687_v26, %v977_v41  ;;  %v1295_v52 = vpop.permute.xlu1 %1294  ;;  %v947_v26 = vadd.f32 %v5789_v63, %v5886_v55  ;;  %v1015_v41 = vmax.f32 %v950_v35, 0.0  ;;  %v955_v55 = vadd.f32 %v5789_v63, %v5842_v15 }
 0x110   : > { %v1290_v13 = vpop.permute.xlu0 %1289  ;;  %v1390_v30 = vmul.f32 %v1295_v52, %v1012_v12  ;;  %v1523_v5 = vld [vmem:[#allocation2 + $0x31] sm:$0xff]  ;;  %v957_v52 = vadd.f32 %v5789_v63, %v5858_v8  ;;  %v743_v35 = vpack.c.bf16 %v703_v28, %v702_v3  ;;  %v7061_v15 = vunpack.c.h.bf16 %v5949_v39 }
 0x111   : > { %1409 = vst [vmem:[#allocation2 + $0x40] sm:$0xff] %v1355_v34  ;;  %v1389_v57 = vmul.f32 %v1290_v13, %v1011_v4  ;;  %v1014_v47 = vmax.f32 %v947_v26, 0.0  ;;  %v1862_v18 = vld [vmem:[#allocation2 + $0x32] sm:$0xff] }
 0x112   : > { %v856_v37 = vpop.f32.mrf.mxu0  ;;  %1444 = vst [vmem:[#allocation2 + $0x158] sm:$0xff] %v1390_v30  ;;  %v1345_v6 = vpop.permute.xlu2 %1344  ;;  %v1018_v8 = vmax.f32 %v957_v52, 0.0 }
 0x113   : > { %v857_v22 = vadd.f32 %v5789_v63, %v856_v37  ;;  %1443 = vst [vmem:[#allocation2 + $0x150] sm:$0xff] %v1389_v57  ;;  %v1400_v38 = vmul.f32 %v1345_v6, %v1022_v20  ;;  %v7062_v20 = vunpack.c.l.bf16 %v5949_v39  ;;  %v1017_v6 = vmax.f32 %v955_v55, 0.0 }
 0x115   : > { %v978_v12 = vmax.f32 %v857_v22, 0.0  ;;  %1454 = vst [vmem:[#allocation2 + $0x1a8] sm:$0xff] %v1400_v38  ;;  %v592_v28 = vmul.f32 %v5923_v36, %v7062_v20 }
 0x117   : > { %v1356_v4 = vmul.f32 %v5763_v25, %v978_v12  ;;  %v1310_v34 = vpop.permute.xlu1 %1309 }
 0x118   : > { %v1524_v43 = vld [vmem:[#allocation2 + $0x39] sm:$0xff]  ;;  %v1305_v30 = vpop.permute.xlu0 %1304  ;;  %v1393_v48 = vmul.f32 %v1310_v34, %v1015_v41  ;;  %v593_v41 = vmul.f32 %v5923_v36, %v7061_v15 }
 0x119   : > { %v1863_v13 = vld [vmem:[#allocation2 + $0x3a] sm:$0xff]  ;;  %1410 = vst [vmem:[#allocation2 + $0x48] sm:$0xff] %v1356_v4  ;;  %v1553_v26 = vpack.c.bf16 %v1524_v43, %v1523_v5  ;;  %v1392_v37 = vmul.f32 %v1305_v30, %v1014_v47  ;;  %v962_v47 = vadd.f32 %v5789_v63, %v5895_v60  ;;  %v965_v5 = vadd.f32 %v5789_v63, %v5912_v7 }
 0x11a   : > { %v1892_v57 = vpack.c.bf16 %v1863_v13, %v1862_v18  ;;  %v859_v25 = vpop.f32.mrf.mxu0  ;;  %1447 = vst [vmem:[#allocation2 + $0x170] sm:$0xff] %v1393_v48  ;;  %v650_v18 = vadd.f32 %v5940_v14, %v592_v28  ;;  %v651_v13 = vadd.f32 %v5940_v14, %v593_v41  ;;  %v4702_v41 = vld [vmem:[#allocation6 + $0x138] sm:$0xff]  ;;  %v4705_v15 = vld [vmem:[#allocation6 + $0x150] sm:$0xff] }
 0x11b   : > { %v860_v22 = vadd.f32 %v5789_v63, %v859_v25  ;;  %1650 = vmatmul.bf16.gmra.mxu1 %v1553_v26  ;;  %1446 = vst [vmem:[#allocation2 + $0x168] sm:$0xff] %v1392_v37  ;;  %v1021_v60 = vmax.f32 %v965_v5, 0.0  ;;  %v1020_v7 = vmax.f32 %v962_v47, 0.0  ;;  %2440 = vmatpush.bf16.msra.mxu2 %v4702_v41 }
 0x11c   : > { %1989 = vmatmul.bf16.gmra.mxu3 %v1892_v57  ;;  %v704_v48 = vmax.f32 %v650_v18, 0.0  ;;  %v705_v26 = vmax.f32 %v651_v13, 0.0  ;;  %v5977_v57 = vld [vmem:[%s5384_s14 + $0x78] sm:$0xff]  }
 0x11d   : > { %v979_v3 = vmax.f32 %v860_v22, 0.0  ;;  %898 = vmatmul.bf16.gmra.mxu0 %v743_v35  ;;  %7124 = vst [vmem:[#allocation42_spill] sm:$0xff] %v5977_v57  ;;  %v7059_v28 = vunpack.c.h.bf16 %v5977_v57 }
 0x11f   : > { %v1357_v38 = vmul.f32 %v5761_v21, %v979_v3  ;;  %v1325_v12 = vpop.permute.xlu1 %1324  ;;  %v7060_v3 = vunpack.c.l.bf16 %v5977_v57 }
 0x120   : > { %v1396_v55 = vmul.f32 %v1325_v12, %v1018_v8  ;;  %v1320_v34 = vpop.permute.xlu0 %1319  ;;  %v744_v8 = vpack.c.bf16 %v705_v26, %v704_v48 }
 0x121   : > { %1411 = vst [vmem:[#allocation2 + $0x50] sm:$0xff] %v1357_v38  ;;  %v1395_v52 = vmul.f32 %v1320_v34, %v1017_v6  ;;  %v5970_v43 = vpack.c.bf16 %v1357_v38, %v1356_v4  ;;  %v4694_v38 = vld [vmem:[#allocation6 + $0xf8] sm:$0xff]  ;;  %v594_v5 = vmul.f32 %v5923_v36, %v7060_v3 }
 0x122   : > { %v861_v35 = vpop.f32.mrf.mxu0  ;;  %1450 = vst [vmem:[#allocation2 + $0x188] sm:$0xff] %v1396_v55  ;;  %2206 = vmatpush.bf16.msra.mxu1 %v4694_v38  ;;  %v595_v55 = vmul.f32 %v5923_v36, %v7059_v28  ;;  %v1484_v28 = vld [vmem:[#allocation2 + $0x158] sm:$0xff]  ;;  %v1888_v57 = vld [vmem:[#allocation2 + $0x16a] sm:$0xff] }
 0x123   : > { %v862_v21 = vadd.f32 %v5789_v63, %v861_v35  ;;  %1449 = vst [vmem:[#allocation2 + $0x180] sm:$0xff] %v1395_v52  ;;  %1792 = vmatmul.bf16.gmra.mxu2 %v5970_v43 }
 0x125   : > { %v980_v30 = vmax.f32 %v862_v21, 0.0 }
 0x127   : > { %v1358_v4 = vmul.f32 %v5710_v61, %v980_v30  ;;  %v1340_v37 = vpop.permute.xlu1 %1339  ;;  %v653_v30 = vadd.f32 %v5940_v14, %v595_v55 }
 0x128   : > { %v1399_v25 = vmul.f32 %v1340_v37, %v1021_v60  ;;  %v1335_v22 = vpop.permute.xlu0 %1334  ;;  %v1525_v52 = vld [vmem:[#allocation2 + $0x49] sm:$0xff] }
 0x129   : > { %1412 = vst [vmem:[#allocation2 + $0x58] sm:$0xff] %v1358_v4  ;;  %v1398_v6 = vmul.f32 %v1335_v22, %v1020_v7  ;;  %v1864_v13 = vld [vmem:[#allocation2 + $0x4a] sm:$0xff]  ;;  %v652_v7 = vadd.f32 %v5940_v14, %v594_v5 }
 0x12a   : > { %v864_v12 = vpop.f32.mrf.mxu0  ;;  %1453 = vst [vmem:[#allocation2 + $0x1a0] sm:$0xff] %v1399_v25  ;;  %v5994_v25 = vld [vmem:[%s5384_s14 + $0x80] sm:$0xff]   ;;  %v4718_v5 = vld [vmem:[#allocation6 + $0x1b8] sm:$0xff] }
 0x12b   : > { %v865_v47 = vadd.f32 %v5789_v63, %v864_v12  ;;  %1452 = vst [vmem:[#allocation2 + $0x198] sm:$0xff] %v1398_v6  ;;  %v706_v37 = vmax.f32 %v652_v7, 0.0  ;;  %v7057_v6 = vunpack.c.h.bf16 %v5994_v25  ;;  %2909 = vmatpush.bf16.msrb.mxu0 %v4718_v5 }
 0x12c   : > { %7125 = vst [vmem:[#allocation43_spill] sm:$0xff] %v5994_v25 }
 0x12d   : > { %v981_v61 = vmax.f32 %v865_v47, 0.0  ;;  %903 = vmatmul.bf16.gmra.mxu0 %v744_v8  ;;  %v7058_v8 = vunpack.c.l.bf16 %v5994_v25 }
 0x12f   : > { %v1359_v34 = vmul.f32 %v5777_v58, %v981_v61  ;;  %v707_v58 = vmax.f32 %v653_v30, 0.0  ;;  %v596_v61 = vmul.f32 %v5923_v36, %v7058_v8  ;;  %v4716_v30 = vld [vmem:[#allocation6 + $0x1a8] sm:$0xff] }
 0x130   : > { %v1526_v18 = vld [vmem:[#allocation2 + $0x51] sm:$0xff] }
 0x131   : > { %v1865_v35 = vld [vmem:[#allocation2 + $0x52] sm:$0xff]  ;;  %1413 = vst [vmem:[#allocation2 + $0x60] sm:$0xff] %v1359_v34  ;;  %v1554_v21 = vpack.c.bf16 %v1526_v18, %v1525_v52  ;;  %v745_v41 = vpack.c.bf16 %v707_v58, %v706_v37  ;;  %v654_v52 = vadd.f32 %v5940_v14, %v596_v61 }
 0x132   : > { %v1893_v60 = vpack.c.bf16 %v1865_v35, %v1864_v13  ;;  %v866_v48 = vpop.f32.mrf.mxu0  ;;  %v4717_v13 = vld [vmem:[#allocation6 + $0x1b0] sm:$0xff] }
 0x133   : > { %v867_v26 = vadd.f32 %v5789_v63, %v866_v48  ;;  %1655 = vmatmul.bf16.gmra.mxu1 %v1554_v21  ;;  %2910 = vmatpush.bf16.msrb.mxu0 %v4717_v13 }
 0x134   : > { %1994 = vmatmul.bf16.gmra.mxu3 %v1893_v60  ;;  %v708_v60 = vmax.f32 %v654_v52, 0.0 }
 0x135   : > { %v982_v4 = vmax.f32 %v867_v26, 0.0  ;;  %v6014_v26 = vld [vmem:[%s5384_s14 + $0x88] sm:$0xff]  }
 0x136   : > { %7126 = vst [vmem:[#allocation44_spill] sm:$0xff] %v6014_v26  ;;  %v7055_v5 = vunpack.c.h.bf16 %v6014_v26 }
 0x137   : > { %v1360_v22 = vmul.f32 %v5775_v53, %v982_v4  ;;  %v597_v53 = vmul.f32 %v5923_v36, %v7057_v6  ;;  %2911 = vmatpush.bf16.msrb.mxu0 %v4716_v30 }
 0x139   : > { %1414 = vst [vmem:[#allocation2 + $0x68] sm:$0xff] %v1360_v22  ;;  %v5999_v38 = vpack.c.bf16 %v1360_v22, %v1359_v34  ;;  %v655_v18 = vadd.f32 %v5940_v14, %v597_v53  ;;  %v7056_v53 = vunpack.c.l.bf16 %v6014_v26 }
 0x13a   : > { %v869_v12 = vpop.f32.mrf.mxu0 }
 0x13b   : > { %v870_v47 = vadd.f32 %v5789_v63, %v869_v12  ;;  %1797 = vmatmul.bf16.gmra.mxu2 %v5999_v38  ;;  %v709_v7 = vmax.f32 %v655_v18, 0.0  ;;  %v4715_v12 = vld [vmem:[#allocation6 + $0x1a0] sm:$0xff] }
 0x13c   : > { %2912 = vmatpush.bf16.msrb.mxu0 %v4715_v12 }
 0x13d   : > { %v983_v55 = vmax.f32 %v870_v47, 0.0  ;;  %908 = vmatmul.bf16.gmra.mxu0 %v745_v41  ;;  %v746_v41 = vpack.c.bf16 %v709_v7, %v708_v60  ;;  %v4713_v7 = vld [vmem:[#allocation6 + $0x190] sm:$0xff] }
 0x13f   : > { %v1361_v34 = vmul.f32 %v5730_v46, %v983_v55  ;;  %v4701_v55 = vld [vmem:[#allocation6 + $0x130] sm:$0xff] }
 0x140   : > { %v1527_v46 = vld [vmem:[#allocation2 + $0x61] sm:$0xff]  ;;  %2441 = vmatpush.bf16.msra.mxu2 %v4701_v55 }
 0x141   : > { %1415 = vst [vmem:[#allocation2 + $0x70] sm:$0xff] %v1361_v34  ;;  %v1866_v37 = vld [vmem:[#allocation2 + $0x62] sm:$0xff] }
 0x142   : > { %v871_v35 = vpop.f32.mrf.mxu0  ;;  %v4693_v34 = vld [vmem:[#allocation6 + $0xf0] sm:$0xff] }
 0x143   : > { %v872_v21 = vadd.f32 %v5789_v63, %v871_v35  ;;  %2207 = vmatpush.bf16.msra.mxu1 %v4693_v34  ;;  %v598_v35 = vmul.f32 %v5923_v36, %v7056_v53 }
 0x145   : > { %v984_v48 = vmax.f32 %v872_v21, 0.0  ;;  %v599_v21 = vmul.f32 %v5923_v36, %v7055_v5  ;;  %v4707_v5 = vld [vmem:[#allocation6 + $0x160] sm:$0xff] }
 0x147   : > { %v1362_v4 = vmul.f32 %v5793_v49, %v984_v48  ;;  %v4714_v49 = vld [vmem:[#allocation6 + $0x198] sm:$0xff]  ;;  %v656_v48 = vadd.f32 %v5940_v14, %v598_v35 }
 0x148   : > { %v1528_v58 = vld [vmem:[#allocation2 + $0x69] sm:$0xff]  ;;  %2913 = vmatpush.bf16.msrb.mxu0 %v4714_v49 }
 0x149   : > { %v1867_v22 = vld [vmem:[#allocation2 + $0x6a] sm:$0xff]  ;;  %1416 = vst [vmem:[#allocation2 + $0x78] sm:$0xff] %v1362_v4  ;;  %v1555_v47 = vpack.c.bf16 %v1528_v58, %v1527_v46  ;;  %v657_v46 = vadd.f32 %v5940_v14, %v599_v21  ;;  %v710_v12 = vmax.f32 %v656_v48, 0.0 }
 0x14a   : > { %v1894_v61 = vpack.c.bf16 %v1867_v22, %v1866_v37  ;;  %v874_v52 = vpop.f32.mrf.mxu0  ;;  %v4712_v22 = vld [vmem:[#allocation6 + $0x188] sm:$0xff] }
 0x14b   : > { %v875_v18 = vadd.f32 %v5789_v63, %v874_v52  ;;  %1660 = vmatmul.bf16.gmra.mxu1 %v1555_v47  ;;  %v711_v47 = vmax.f32 %v657_v46, 0.0 }
 0x14c   : > { %1999 = vmatmul.bf16.gmra.mxu3 %v1894_v61  ;;  %2914 = vmatpush.bf16.msrb.mxu0 %v4713_v7  ;;  %v6034_v61 = vld [vmem:[%s5384_s14 + $0x90] sm:$0xff]  }
 0x14d   : > { %v985_v13 = vmax.f32 %v875_v18, 0.0  ;;  %913 = vmatmul.bf16.gmra.mxu0 %v746_v41  ;;  %7127 = vst [vmem:[#allocation45_spill] sm:$0xff] %v6034_v61  ;;  %v747_v55 = vpack.c.bf16 %v711_v47, %v710_v12  ;;  %v7054_v34 = vunpack.c.l.bf16 %v6034_v61  ;;  %v7053_v52 = vunpack.c.h.bf16 %v6034_v61 }
 0x14f   : > { %v1363_v60 = vmul.f32 %v5791_v33, %v985_v13  ;;  %v600_v35 = vmul.f32 %v5923_v36, %v7054_v34 }
 0x150   : > { %2915 = vmatpush.bf16.msrb.mxu0 %v4712_v22 }
 0x151   : > { %1417 = vst [vmem:[#allocation2 + $0x80] sm:$0xff] %v1363_v60  ;;  %v6027_v30 = vpack.c.bf16 %v1363_v60, %v1362_v4  ;;  %v4711_v4 = vld [vmem:[#allocation6 + $0x180] sm:$0xff]  ;;  %v658_v22 = vadd.f32 %v5940_v14, %v600_v35  ;;  %v4700_v35 = vld [vmem:[#allocation6 + $0x128] sm:$0xff] }
 0x152   : > { %v876_v37 = vpop.f32.mrf.mxu0  ;;  %2442 = vmatpush.bf16.msra.mxu2 %v4700_v35 }
 0x153   : > { %v877_v58 = vadd.f32 %v5789_v63, %v876_v37  ;;  %1802 = vmatmul.bf16.gmra.mxu2 %v6027_v30 }
 0x154   : > { %2916 = vmatpush.bf16.msrb.mxu0 %v4711_v4 }
 0x155   : > { %v986_v41 = vmax.f32 %v877_v58, 0.0 }
 0x157   : > { %v1364_v33 = vmul.f32 %v5753_v62, %v986_v41  ;;  %v601_v62 = vmul.f32 %v5923_v36, %v7053_v52  ;;  %v712_v36 = vmax.f32 %v658_v22, 0.0 }
 0x158   : > { %v1529_v60 = vld [vmem:[#allocation2 + $0x79] sm:$0xff] }
 0x159   : > { %1418 = vst [vmem:[#allocation2 + $0x88] sm:$0xff] %v1364_v33  ;;  %v1868_v48 = vld [vmem:[#allocation2 + $0x7a] sm:$0xff]  ;;  %v659_v41 = vadd.f32 %v5940_v14, %v601_v62 }
 0x15a   : > { %v879_v18 = vpop.f32.mrf.mxu0 }
 0x15b   : > { %v880_v49 = vadd.f32 %v5789_v63, %v879_v18  ;;  %v713_v4 = vmax.f32 %v659_v41, 0.0 }
 0x15d   : > { %v987_v13 = vmax.f32 %v880_v49, 0.0  ;;  %918 = vmatmul.bf16.gmra.mxu0 %v747_v55 }
 0x15e   : > { %v1778_v55 = vpop.f32.mrf.mxu2 }
 0x15f   : > { %v1365_v21 = vmul.f32 %v5809_v1, %v987_v13  ;;  %v748_v13 = vpack.c.bf16 %v713_v4, %v712_v36 }
 0x160   : > { %v1530_v7 = vld [vmem:[#allocation2 + $0x81] sm:$0xff] }
 0x161   : > { %v1869_v46 = vld [vmem:[#allocation2 + $0x82] sm:$0xff]  ;;  %1419 = vst [vmem:[#allocation2 + $0x90] sm:$0xff] %v1365_v21  ;;  %v1556_v37 = vpack.c.bf16 %v1530_v7, %v1529_v60  ;;  %v4692_v7 = vld [vmem:[#allocation6 + $0xe8] sm:$0xff] }
 0x162   : > { %v1895_v58 = vpack.c.bf16 %v1869_v46, %v1868_v48  ;;  %v881_v12 = vpop.f32.mrf.mxu0  ;;  %2208 = vmatpush.bf16.msra.mxu1 %v4692_v7 }
 0x163   : > { %v882_v47 = vadd.f32 %v5789_v63, %v881_v12  ;;  %1665 = vmatmul.bf16.gmra.mxu1 %v1556_v37 }
 0x164   : > { %2004 = vmatmul.bf16.gmra.mxu3 %v1895_v58 }
 0x165   : > { %v988_v33 = vmax.f32 %v882_v47, 0.0 }
 0x166   : > { %v6060_v47 = vpop.f32.mrf.mxu2 }
 0x167   : > { %v1366_v1 = vmul.f32 %v5807_v59, %v988_v33 }
 0x168   : > { %v1641_v18 = vpop.f32.mrf.mxu1 }
 0x169   : > { %1420 = vst [vmem:[#allocation2 + $0x98] sm:$0xff] %v1366_v1  ;;  %v1779_v49 = vadd.f32 %v1778_v55, %v1641_v18  ;;  %v6051_v60 = vpack.c.bf16 %v1366_v1, %v1365_v21 }
 0x16a   : > { %v884_v14 = vpop.f32.mrf.mxu0 }
 0x16b   : > { %v885_v62 = vadd.f32 %v5789_v63, %v884_v14  ;;  %1807 = vmatmul.bf16.gmra.mxu2 %v6051_v60 }
 0x16d   : > { %v989_v48 = vmax.f32 %v885_v62, 0.0  ;;  %923 = vmatmul.bf16.gmra.mxu0 %v748_v13 }
 0x16f   : > { %v1980_v46 = vpop.f32.mrf.mxu3  ;;  %v1367_v59 = vmul.f32 %v5767_v50, %v989_v48 }
 0x170   : > { %v6056_v37 = vadd.f32 %v1980_v46, %v1779_v49  ;;  %v1531_v12 = vld [vmem:[#allocation2 + $0x91] sm:$0xff]  ;;  %v6062_v33 = vpop.f32.mrf.mxu1 }
 0x171   : > { %1421 = vst [vmem:[#allocation2 + $0xa0] sm:$0xff] %v1367_v59  ;;  %v1870_v4 = vld [vmem:[#allocation2 + $0x92] sm:$0xff] }
 0x172   : > { %v886_v58 = vpop.f32.mrf.mxu0 }
 0x173   : > { %v887_v21 = vadd.f32 %v5789_v63, %v886_v58 }
 0x175   : > { %v990_v22 = vmax.f32 %v887_v21, 0.0 }
 0x176   : > { %v1783_v7 = vpop.f32.mrf.mxu2 }
 0x177   : > { %v1368_v41 = vmul.f32 %v5822_v42, %v990_v22  ;;  %v6066_v42 = vpop.f32.mrf.mxu3 }
 0x178   : > { %v1532_v36 = vld [vmem:[#allocation2 + $0x99] sm:$0xff] }
 0x179   : > { %v1871_v1 = vld [vmem:[#allocation2 + $0x9a] sm:$0xff]  ;;  %1422 = vst [vmem:[#allocation2 + $0xa8] sm:$0xff] %v1368_v41  ;;  %v1557_v55 = vpack.c.bf16 %v1532_v36, %v1531_v12  ;;  %v4699_v12 = vld [vmem:[#allocation6 + $0x120] sm:$0xff] }
 0x17a   : > { %v1896_v50 = vpack.c.bf16 %v1871_v1, %v1870_v4  ;;  %v889_v18 = vpop.f32.mrf.mxu0  ;;  %2443 = vmatpush.bf16.msra.mxu2 %v4699_v12 }
 0x17b   : > { %v890_v49 = vadd.f32 %v5789_v63, %v889_v18  ;;  %1670 = vmatmul.bf16.gmra.mxu1 %v1557_v55 }
 0x17c   : > { %2009 = vmatmul.bf16.gmra.mxu3 %v1896_v50 }
 0x17d   : > { %v991_v13 = vmax.f32 %v890_v49, 0.0  ;;  %2917 = vmatmul.bf16.vlgmr.msrb.gmra.mxu0 %v5917_v31 }
 0x17e   : > { %v6079_v50 = vpop.f32.mrf.mxu2 }
 0x17f   : > { %v1369_v35 = vmul.f32 %v5820_v29, %v991_v13  ;;  %v4691_v29 = vld [vmem:[#allocation6 + $0xe0] sm:$0xff] }
 0x180   : > { %v1646_v14 = vpop.f32.mrf.mxu1  ;;  %2209 = vmatpush.bf16.msra.mxu1 %v4691_v29 }
 0x181   : > { %1423 = vst [vmem:[#allocation2 + $0xb0] sm:$0xff] %v1369_v35  ;;  %v1784_v62 = vadd.f32 %v1783_v7, %v1646_v14  ;;  %v6069_v48 = vpack.c.bf16 %v1369_v35, %v1368_v41 }
 0x182   : > { %v891_v46 = vpop.f32.mrf.mxu0 }
 0x183   : > { %v892_v59 = vadd.f32 %v5789_v63, %v891_v46  ;;  %1812 = vmatmul.bf16.gmra.mxu2 %v6069_v48 }
 0x185   : > { %v992_v58 = vmax.f32 %v892_v59, 0.0 }
 0x187   : > { %v1985_v21 = vpop.f32.mrf.mxu3  ;;  %v1370_v22 = vmul.f32 %v5781_v24, %v992_v58 }
 0x188   : > { %v6074_v31 = vadd.f32 %v1985_v21, %v1784_v62  ;;  %v1533_v55 = vld [vmem:[#allocation2 + $0xa9] sm:$0xff]  ;;  %v6081_v18 = vpop.f32.mrf.mxu1 }
 0x189   : > { %1424 = vst [vmem:[#allocation2 + $0xb8] sm:$0xff] %v1370_v22  ;;  %v1872_v49 = vld [vmem:[#allocation2 + $0xaa] sm:$0xff] }
 0x18a   : > { %v894_v36 = vpop.f32.mrf.mxu0 }
 0x18b   : > { %v895_v4 = vadd.f32 %v5789_v63, %v894_v36 }
 0x18d   : > { %v993_v41 = vmax.f32 %v895_v4, 0.0  ;;  %2922 = vmatmul.bf16.gmra.mxu0 %v5970_v43 }
 0x18e   : > { %v1788_v59 = vpop.f32.mrf.mxu2 }
 0x18f   : > { %v1371_v1 = vmul.f32 %v5838_v51, %v993_v41  ;;  %v6084_v43 = vpop.f32.mrf.mxu3 }
 0x190   : > { %v1534_v24 = vld [vmem:[#allocation2 + $0xb1] sm:$0xff] }
 0x191   : > { %v1873_v13 = vld [vmem:[#allocation2 + $0xb2] sm:$0xff]  ;;  %1425 = vst [vmem:[#allocation2 + $0xc0] sm:$0xff] %v1371_v1  ;;  %v1558_v35 = vpack.c.bf16 %v1534_v24, %v1533_v55 }
 0x192   : > { %v1897_v7 = vpack.c.bf16 %v1873_v13, %v1872_v49  ;;  %v896_v14 = vpop.f32.mrf.mxu0 }
 0x193   : > { %v897_v62 = vadd.f32 %v5789_v63, %v896_v14  ;;  %1675 = vmatmul.bf16.gmra.mxu1 %v1558_v35 }
 0x194   : > { %2014 = vmatmul.bf16.gmra.mxu3 %v1897_v7 }
 0x195   : > { %v994_v46 = vmax.f32 %v897_v62, 0.0 }
 0x196   : > { %v6097_v35 = vpop.f32.mrf.mxu2 }
 0x197   : > { %v1372_v51 = vmul.f32 %v5836_v11, %v994_v46 }
 0x198   : > { %v1651_v58 = vpop.f32.mrf.mxu1 }
 0x199   : > { %1426 = vst [vmem:[#allocation2 + $0xc8] sm:$0xff] %v1372_v51  ;;  %v1789_v21 = vadd.f32 %v1788_v59, %v1651_v58  ;;  %v6087_v22 = vpack.c.bf16 %v1372_v51, %v1371_v1  ;;  %v4698_v51 = vld [vmem:[#allocation6 + $0x118] sm:$0xff] }
 0x19a   : > { %v899_v12 = vpop.f32.mrf.mxu0  ;;  %v4690_v59 = vld [vmem:[#allocation6 + $0xd8] sm:$0xff]  ;;  %2444 = vmatpush.bf16.msra.mxu2 %v4698_v51 }
 0x19b   : > { %v900_v29 = vadd.f32 %v5789_v63, %v899_v12  ;;  %1817 = vmatmul.bf16.gmra.mxu2 %v6087_v22  ;;  %2210 = vmatpush.bf16.msra.mxu1 %v4690_v59 }
 0x19d   : > { %v995_v36 = vmax.f32 %v900_v29, 0.0  ;;  %2927 = vmatmul.bf16.gmra.mxu0 %v5999_v38 }
 0x19f   : > { %v1990_v4 = vpop.f32.mrf.mxu3  ;;  %v1373_v41 = vmul.f32 %v5798_v0, %v995_v36 }
 0x1a0   : > { %v6093_v55 = vadd.f32 %v1990_v4, %v1789_v21  ;;  %v1535_v13 = vld [vmem:[#allocation2 + $0xc1] sm:$0xff]  ;;  %v6099_v7 = vpop.f32.mrf.mxu1 }
 0x1a1   : > { %1427 = vst [vmem:[#allocation2 + $0xd0] sm:$0xff] %v1373_v41  ;;  %v1874_v62 = vld [vmem:[#allocation2 + $0xc2] sm:$0xff] }
 0x1a2   : > { %v901_v11 = vpop.f32.mrf.mxu0 }
 0x1a3   : > { %v902_v24 = vadd.f32 %v5789_v63, %v901_v11  ;;  %v6104_v63 = vld [vmem:[%s6969_s5] ss:$0 sm:$0xff] }
 0x1a5   : > { %v996_v49 = vmax.f32 %v902_v24, 0.0 }
 0x1a6   : > { %v1793_v36 = vpop.f32.mrf.mxu2 }
 0x1a7   : > { %v1374_v1 = vmul.f32 %v5853_v19, %v996_v49  ;;  %v6108_v12 = vpop.f32.mrf.mxu3 }
 0x1a8   : > { %v1536_v14 = vld [vmem:[#allocation2 + $0xc9] sm:$0xff] }
 0x1a9   : > { %v1875_v38 = vld [vmem:[#allocation2 + $0xca] sm:$0xff]  ;;  %1428 = vst [vmem:[#allocation2 + $0xd8] sm:$0xff] %v1374_v1  ;;  %v1559_v46 = vpack.c.bf16 %v1536_v14, %v1535_v13 }
 0x1aa   : > { %v1898_v0 = vpack.c.bf16 %v1875_v38, %v1874_v62  ;;  %v904_v58 = vpop.f32.mrf.mxu0  ;;  %v4710_v38 = vld [vmem:[#allocation6 + $0x178] sm:$0xff] }
 0x1ab   : > { %v905_v19 = vadd.f32 %v6104_v63, %v904_v58  ;;  %1680 = vmatmul.bf16.gmra.mxu1 %v1559_v46  ;;  %2674 = vmatpush.bf16.msra.mxu3 %v4710_v38  ;;  %v4697_v38 = vld [vmem:[#allocation6 + $0x110] sm:$0xff] }
 0x1ac   : > { %2019 = vmatmul.bf16.gmra.mxu3 %v1898_v0  ;;  %2445 = vmatpush.bf16.msra.mxu2 %v4697_v38 }
 0x1ad   : > { %v997_v21 = vmax.f32 %v905_v19, 0.0  ;;  %2932 = vmatmul.bf16.gmra.mxu0 %v6027_v30 }
 0x1ae   : > { %v6121_v59 = vpop.f32.mrf.mxu2 }
 0x1af   : > { %v1375_v29 = vmul.f32 %v5851_v9, %v997_v21 }
 0x1b0   : > { %v1656_v4 = vpop.f32.mrf.mxu1 }
 0x1b1   : > { %1429 = vst [vmem:[#allocation2 + $0xe0] sm:$0xff] %v1375_v29  ;;  %v1794_v41 = vadd.f32 %v1793_v36, %v1656_v4  ;;  %v6111_v11 = vpack.c.bf16 %v1375_v29, %v1374_v1 }
 0x1b2   : > { %v906_v24 = vpop.f32.mrf.mxu0 }
 0x1b3   : > { %v907_v49 = vadd.f32 %v6104_v63, %v906_v24  ;;  %1822 = vmatmul.bf16.gmra.mxu2 %v6111_v11 }
 0x1b5   : > { %v998_v13 = vmax.f32 %v907_v49, 0.0 }
 0x1b7   : > { %v1995_v14 = vpop.f32.mrf.mxu3  ;;  %v1376_v62 = vmul.f32 %v5814_v16, %v998_v13 }
 0x1b8   : > { %v6116_v30 = vadd.f32 %v1995_v14, %v1794_v41  ;;  %v1537_v51 = vld [vmem:[#allocation2 + $0xd9] sm:$0xff]  ;;  %v6123_v58 = vpop.f32.mrf.mxu1 }
 0x1b9   : > { %1430 = vst [vmem:[#allocation2 + $0xe8] sm:$0xff] %v1376_v62  ;;  %v1876_v16 = vld [vmem:[#allocation2 + $0xda] sm:$0xff] }
 0x1ba   : > { %v909_v9 = vpop.f32.mrf.mxu0 }
 0x1bb   : > { %v910_v46 = vadd.f32 %v6104_v63, %v909_v9  ;;  %v4689_v9 = vld [vmem:[#allocation6 + $0xd0] sm:$0xff] }
 0x1bc   : > { %2211 = vmatpush.bf16.msra.mxu1 %v4689_v9 }
 0x1bd   : > { %v999_v0 = vmax.f32 %v910_v46, 0.0  ;;  %2937 = vmatmul.bf16.gmra.mxu0 %v6051_v60 }
 0x1be   : > { %v1798_v49 = vpop.f32.mrf.mxu2 }
 0x1bf   : > { %v1377_v1 = vmul.f32 %v5870_v45, %v999_v0  ;;  %v6132_v60 = vpop.f32.mrf.mxu3 }
 0x1c0   : > { %v1538_v19 = vld [vmem:[#allocation2 + $0xe1] sm:$0xff] }
 0x1c1   : > { %v1877_v21 = vld [vmem:[#allocation2 + $0xe2] sm:$0xff]  ;;  %1431 = vst [vmem:[#allocation2 + $0xf0] sm:$0xff] %v1377_v1  ;;  %v6125_v29 = vpack.c.bf16 %v1538_v19, %v1537_v51 }
 0x1c2   : > { %v6127_v36 = vpack.c.bf16 %v1877_v21, %v1876_v16  ;;  %v911_v4 = vpop.f32.mrf.mxu0 }
 0x1c3   : > { %v912_v41 = vadd.f32 %v6104_v63, %v911_v4  ;;  %1685 = vmatmul.bf16.gmra.mxu1 %v6125_v29 }
 0x1c4   : > { %2024 = vmatmul.bf16.gmra.mxu3 %v6127_v36 }
 0x1c5   : > { %v1000_v45 = vmax.f32 %v912_v41, 0.0 }
 0x1c7   : > { %v1378_v24 = vmul.f32 %v5868_v10, %v1000_v45 }
 0x1c8   : > { %v1661_v13 = vpop.f32.mrf.mxu1 }
 0x1c9   : > { %1432 = vst [vmem:[#allocation2 + $0xf8] sm:$0xff] %v1378_v24  ;;  %v1799_v14 = vadd.f32 %v1798_v49, %v1661_v13  ;;  %v6135_v62 = vpack.c.bf16 %v1378_v24, %v1377_v1  ;;  %v6145_v24 = vpop.f32.mrf.mxu2 }
 0x1ca   : > { %v914_v46 = vpop.f32.mrf.mxu0 }
 0x1cb   : > { %v915_v0 = vadd.f32 %v6104_v63, %v914_v46  ;;  %1827 = vmatmul.bf16.gmra.mxu2 %v6135_v62 }
 0x1cd   : > { %v1001_v51 = vmax.f32 %v915_v0, 0.0  ;;  %2942 = vmatmul.bf16.gmra.mxu0 %v6069_v48 }
 0x1cf   : > { %v2000_v19 = vpop.f32.mrf.mxu3  ;;  %v1379_v10 = vmul.f32 %v5827_v27, %v1001_v51 }
 0x1d0   : > { %v6141_v16 = vadd.f32 %v2000_v19, %v1799_v14  ;;  %v1539_v45 = vld [vmem:[#allocation2 + $0xf1] sm:$0xff]  ;;  %v6147_v49 = vpop.f32.mrf.mxu1  ;;  %v4709_v14 = vld [vmem:[#allocation6 + $0x170] sm:$0xff] }
 0x1d1   : > { %1433 = vst [vmem:[#allocation2 + $0x100] sm:$0xff] %v1379_v10  ;;  %v1878_v38 = vld [vmem:[#allocation2 + $0xf2] sm:$0xff]  ;;  %2675 = vmatpush.bf16.msra.mxu3 %v4709_v14 }
 0x1d2   : > { %v916_v1 = vpop.f32.mrf.mxu0 }
 0x1d3   : > { %v917_v21 = vadd.f32 %v6104_v63, %v916_v1 }
 0x1d5   : > { %v1002_v4 = vmax.f32 %v917_v21, 0.0 }
 0x1d6   : > { %v1803_v10 = vpop.f32.mrf.mxu2 }
 0x1d7   : > { %v1380_v41 = vmul.f32 %v5881_v54, %v1002_v4  ;;  %v6157_v51 = vpop.f32.mrf.mxu3 }
 0x1d8   : > { %v1540_v13 = vld [vmem:[#allocation2 + $0xf9] sm:$0xff] }
 0x1d9   : > { %v1879_v48 = vld [vmem:[#allocation2 + $0xfa] sm:$0xff]  ;;  %1434 = vst [vmem:[#allocation2 + $0x108] sm:$0xff] %v1380_v41  ;;  %v6149_v9 = vpack.c.bf16 %v1540_v13, %v1539_v45 }
 0x1da   : > { %v6151_v27 = vpack.c.bf16 %v1879_v48, %v1878_v38  ;;  %v919_v46 = vpop.f32.mrf.mxu0  ;;  %v4696_v38 = vld [vmem:[#allocation6 + $0x108] sm:$0xff] }
 0x1db   : > { %v920_v0 = vadd.f32 %v6104_v63, %v919_v46  ;;  %1690 = vmatmul.bf16.gmra.mxu1 %v6149_v9  ;;  %2446 = vmatpush.bf16.msra.mxu2 %v4696_v38 }
 0x1dc   : > { %2029 = vmatmul.bf16.gmra.mxu3 %v6151_v27 }
 0x1dd   : > { %v1003_v54 = vmax.f32 %v920_v0, 0.0  ;;  %2947 = vmatmul.bf16.gmra.mxu0 %v6087_v22 }
 0x1df   : > { %v6160_v19 = vmul.f32 %v5879_v32, %v1003_v54  ;;  %v4688_v32 = vld [vmem:[#allocation6 + $0xc8] sm:$0xff] }
 0x1e0   : > { %v1666_v1 = vpop.f32.mrf.mxu1  ;;  %2212 = vmatpush.bf16.msra.mxu1 %v4688_v32 }
 0x1e1   : > { %1435 = vst [vmem:[#allocation2 + $0x110] sm:$0xff] %v6160_v19  ;;  %v1804_v21 = vadd.f32 %v1803_v10, %v1666_v1  ;;  %v1498_v4 = vpack.c.bf16 %v6160_v19, %v1380_v41 }
 0x1e2   : > { %v921_v45 = vpop.f32.mrf.mxu0 }
 0x1e3   : > { %v922_v13 = vadd.f32 %v6104_v63, %v921_v45  ;;  %1832 = vmatmul.bf16.gmra.mxu2 %v1498_v4  ;;  %v6171_v45 = vpop.f32.mrf.mxu2 }
 0x1e5   : > { %v1004_v48 = vmax.f32 %v922_v13, 0.0 }
 0x1e7   : > { %v2005_v14 = vpop.f32.mrf.mxu3  ;;  %v1382_v22 = vmul.f32 %v5845_v2, %v1004_v48 }
 0x1e8   : > { %v6166_v46 = vadd.f32 %v2005_v14, %v1804_v21  ;;  %v1541_v1 = vld [vmem:[#allocation2 + $0x109] sm:$0xff]  ;;  %v6173_v13 = vpop.f32.mrf.mxu1 }
 0x1e9   : > { %1436 = vst [vmem:[#allocation2 + $0x118] sm:$0xff] %v1382_v22  ;;  %v1880_v2 = vld [vmem:[#allocation2 + $0x10a] sm:$0xff] }
 0x1ea   : > { %v924_v0 = vpop.f32.mrf.mxu0 }
 0x1eb   : > { %v925_v54 = vadd.f32 %v6104_v63, %v924_v0 }
 0x1ed   : > { %v1005_v10 = vmax.f32 %v925_v54, 0.0  ;;  %2952 = vmatmul.bf16.gmra.mxu0 %v6111_v11  ;;  %v4708_v54 = vld [vmem:[#allocation6 + $0x168] sm:$0xff] }
 0x1ee   : > { %2676 = vmatpush.bf16.msra.mxu3 %v4708_v54  ;;  %v1482_v54 = vld [vmem:[#allocation2 + $0x140] sm:$0xff] }
 0x1ef   : > { %v1383_v41 = vmul.f32 %v5900_v56, %v1005_v10  ;;  %v6182_v11 = vpop.f32.mrf.mxu3  ;;  %v1808_v10 = vpop.f32.mrf.mxu2 }
 0x1f0   : > { %v1542_v38 = vld [vmem:[#allocation2 + $0x111] sm:$0xff] }
 0x1f1   : > { %v1881_v21 = vld [vmem:[#allocation2 + $0x112] sm:$0xff]  ;;  %1437 = vst [vmem:[#allocation2 + $0x120] sm:$0xff] %v1383_v41  ;;  %v6175_v48 = vpack.c.bf16 %v1542_v38, %v1541_v1 }
 0x1f2   : > { %v6177_v14 = vpack.c.bf16 %v1881_v21, %v1880_v2  ;;  %v926_v22 = vpop.f32.mrf.mxu0  ;;  %2677 = vmatpush.bf16.msra.mxu3 %v4707_v5  ;;  %v1548_v5 = vld [vmem:[#allocation2 + $0x159] sm:$0xff] }
 0x1f3   : > { %v927_v32 = vadd.f32 %v6104_v63, %v926_v22  ;;  %1695 = vmatmul.bf16.gmra.mxu1 %v6175_v48 }
 0x1f4   : > { %2034 = vmatmul.bf16.gmra.mxu3 %v6177_v14 }
 0x1f5   : > { %v1006_v56 = vmax.f32 %v927_v32, 0.0 }
 0x1f7   : > { %v1384_v0 = vmul.f32 %v5898_v44, %v1006_v56 }
 0x1f8   : > { %v1671_v52 = vpop.f32.mrf.mxu1 }
 0x1f9   : > { %1438 = vst [vmem:[#allocation2 + $0x128] sm:$0xff] %v1384_v0  ;;  %v1809_v1 = vadd.f32 %v1808_v10, %v1671_v52  ;;  %v6185_v38 = vpack.c.bf16 %v1384_v0, %v1383_v41  ;;  %v4695_v52 = vld [vmem:[#allocation6 + $0x100] sm:$0xff]  ;;  %v1481_v0 = vld [vmem:[#allocation2 + $0x138] sm:$0xff] }
 0x1fa   : > { %v4687_v41 = vld [vmem:[#allocation6 + $0xc0] sm:$0xff]  ;;  %2447 = vmatpush.bf16.msra.mxu2 %v4695_v52  ;;  %v6230_v40 = vpop.f32.mrf.mxu0 }
 0x1fb   : > { %1837 = vmatmul.bf16.gmra.mxu2 %v6185_v38  ;;  %2213 = vmatpush.bf16.msra.mxu1 %v4687_v41  ;;  %7134 = vst [vmem:[#allocation52_spill] sm:$0xff] %v6230_v40 }
 0x1fd   : > { %2957 = vmatmul.bf16.gmra.mxu0 %v6135_v62  ;;  %v6197_v62 = vpop.f32.mrf.mxu2 }
 0x1fe   : > { %7128 = vst [vmem:[#allocation46_spill] sm:$0xff] %v6197_v62 }
 0x1ff   : > { %v2010_v63 = vpop.f32.mrf.mxu3  ;;  %3143 = vmatpush.bf16.msrb.mxu1 %v4726_v23  ;;  %v2328_v23 = vld [vmem:[#allocation2 + $0x21] sm:$0xff] }
 0x200   : > { %v6189_v2 = vadd.f32 %v2010_v63, %v1809_v1  ;;  %v1543_v21 = vld [vmem:[#allocation2 + $0x121] sm:$0xff]  ;;  %v1544_v22 = vld [vmem:[#allocation2 + $0x129] sm:$0xff]  ;;  %v6199_v10 = vpop.f32.mrf.mxu1  ;;  %v6201_v1 = vpack.c.bf16 %v1482_v54, %v1481_v0 }
 0x201   : > { %v1882_v32 = vld [vmem:[#allocation2 + $0x122] sm:$0xff]  ;;  %v6191_v34 = vpack.c.bf16 %v1544_v22, %v1543_v21  ;;  %v1883_v44 = vld [vmem:[#allocation2 + $0x12a] sm:$0xff]  ;;  %v1545_v21 = vld [vmem:[#allocation2 + $0x139] sm:$0xff] }
 0x202   : > { %v6193_v56 = vpack.c.bf16 %v1883_v44, %v1882_v32  ;;  %v1546_v22 = vld [vmem:[#allocation2 + $0x141] sm:$0xff]  ;;  %v1483_v54 = vld [vmem:[#allocation2 + $0x150] sm:$0xff]  ;;  %v6238_v39 = vpop.f32.mrf.mxu0 }
 0x203   : > { %1700 = vmatmul.bf16.gmra.mxu1 %v6191_v34  ;;  %v1884_v32 = vld [vmem:[#allocation2 + $0x13a] sm:$0xff]  ;;  %v1885_v44 = vld [vmem:[#allocation2 + $0x142] sm:$0xff]  ;;  %v6206_v41 = vpack.c.bf16 %v1546_v22, %v1545_v21  ;;  %v6214_v20 = vpack.c.bf16 %v1484_v28, %v1483_v54  ;;  %v1886_v21 = vld [vmem:[#allocation2 + $0x152] sm:$0xff]  ;;  %7136 = vst [vmem:[#allocation54_spill] sm:$0xff] %v6238_v39 }
 0x204   : > { %2039 = vmatmul.bf16.gmra.mxu3 %v6193_v56  ;;  %v6208_v8 = vpack.c.bf16 %v1885_v44, %v1884_v32  ;;  %v4706_v0 = vld [vmem:[#allocation6 + $0x158] sm:$0xff]  ;;  %v1887_v22 = vld [vmem:[#allocation2 + $0x15a] sm:$0xff]  ;;  %v4703_v32 = vld [vmem:[#allocation6 + $0x140] sm:$0xff] }
 0x205   : > { %2678 = vmatpush.bf16.msra.mxu3 %v4706_v0  ;;  %v6224_v28 = vpack.c.bf16 %v1887_v22, %v1886_v21  ;;  %v1485_v54 = vld [vmem:[#allocation2 + $0x168] sm:$0xff]  ;;  %v2093_v39 = vld [vmem:[#allocation2 + $0x18] sm:$0xff] }
 0x206   : > { %v1813_v53 = vpop.f32.mrf.mxu2  ;;  %v1549_v22 = vld [vmem:[#allocation2 + $0x169] sm:$0xff] }
 0x207   : > { %v6204_v63 = vpop.f32.mrf.mxu3 }
 0x208   : > { %7129 = vst [vmem:[#allocation47_spill] sm:$0xff] %v6204_v63 }
 0x209   : > { %2679 = vmatpush.bf16.msra.mxu3 %v4705_v15  ;;  %v4734_v15 = vld [vmem:[#allocation6 + $0x238] sm:$0xff] }
 0x20a   : > { %3377 = vmatpush.bf16.msrb.mxu2 %v4734_v15  ;;  %v1889_v15 = vld [vmem:[#allocation2 + $0x172] sm:$0xff] }
 0x20b   : > { %1842 = vmatmul.bf16.gmra.mxu2 %v6201_v1  ;;  %v6242_v40 = vpack.c.bf16 %v1889_v15, %v1888_v57  ;;  %v2094_v57 = vld [vmem:[#allocation2 + $0x20] sm:$0xff] }
 0x20d   : > { %2962 = vmatmul.bf16.gmra.mxu0 %v1498_v4 }
 0x20e   : > { %v6218_v44 = vpop.f32.mrf.mxu2 }
 0x20f   : > { %7131 = vst [vmem:[#allocation49_spill] sm:$0xff] %v6218_v44  ;;  %v2561_v44 = vld [vmem:[#allocation2 + $0x1a] sm:$0xff] }
 0x210   : > { %v1676_v6 = vpop.f32.mrf.mxu1 }
 0x211   : > { %v1814_v52 = vadd.f32 %v1813_v53, %v1676_v6  ;;  %v4704_v6 = vld [vmem:[#allocation6 + $0x148] sm:$0xff] }
 0x212   : > { %2680 = vmatpush.bf16.msra.mxu3 %v4704_v6  ;;  %v1547_v53 = vld [vmem:[#allocation2 + $0x151] sm:$0xff] }
 0x213   : > { %1705 = vmatmul.bf16.gmra.mxu1 %v6206_v41  ;;  %v1486_v6 = vld [vmem:[#allocation2 + $0x170] sm:$0xff] }
 0x214   : > { %2044 = vmatmul.bf16.gmra.mxu3 %v6208_v8 }
 0x216   : > { %2681 = vmatpush.bf16.msra.mxu3 %v4703_v32  ;;  %v1550_v32 = vld [vmem:[#allocation2 + $0x171] sm:$0xff] }
 0x217   : > { %v2015_v4 = vpop.f32.mrf.mxu3  ;;  %v6240_v17 = vpack.c.bf16 %v1550_v32, %v1549_v22  ;;  %v2562_v22 = vld [vmem:[#allocation2 + $0x22] sm:$0xff] }
 0x218   : > { %v6212_v3 = vadd.f32 %v2015_v4, %v1814_v52  ;;  %v6220_v0 = vpop.f32.mrf.mxu1  ;;  %v6222_v52 = vpack.c.bf16 %v1548_v5, %v1547_v53  ;;  %v6232_v5 = vpack.c.bf16 %v1486_v6, %v1485_v54  ;;  %v2327_v54 = vld [vmem:[#allocation2 + $0x19] sm:$0xff] }
 0x219   : > { %7132 = vst [vmem:[#allocation50_spill] sm:$0xff] %v6220_v0  ;;  %v2359_v6 = vpack.c.bf16 %v2328_v23, %v2327_v54  ;;  %v2329_v0 = vld [vmem:[#allocation2 + $0x31] sm:$0xff] }
 0x21a   : > { %7130 = vst [vmem:[#allocation48_spill] sm:$0xff] %v6212_v3 }
 0x21b   : > { %1847 = vmatmul.bf16.gmra.mxu2 %v6214_v20 }
 0x21d   : > { %2967 = vmatmul.bf16.gmra.mxu0 %v6185_v38 }
 0x21e   : > { %v1818_v61 = vpop.f32.mrf.mxu2 }
 0x21f   : > { %v6228_v4 = vpop.f32.mrf.mxu3 }
 0x220   : > { %7133 = vst [vmem:[#allocation51_spill] sm:$0xff] %v6228_v4  ;;  %v2125_v4 = vpack.c.bf16 %v2094_v57, %v2093_v39  ;;  %v2096_v39 = vld [vmem:[#allocation2 + $0x38] sm:$0xff] }
 0x223   : > { %1710 = vmatmul.bf16.gmra.mxu1 %v6222_v52 }
 0x224   : > { %2049 = vmatmul.bf16.gmra.mxu3 %v6224_v28 }
 0x228   : > { %v1681_v26 = vpop.f32.mrf.mxu1 }
 0x229   : > { %v1819_v53 = vadd.f32 %v1818_v61, %v1681_v26  ;;  %v6246_v26 = vpop.f32.mrf.mxu2 }
 0x22a   : > { %7137 = vst [vmem:[#allocation55_spill] sm:$0xff] %v6246_v26  ;;  %v2593_v26 = vpack.c.bf16 %v2562_v22, %v2561_v44  ;;  %v2563_v22 = vld [vmem:[#allocation2 + $0x32] sm:$0xff] }
 0x22b   : > { %1852 = vmatmul.bf16.gmra.mxu2 %v6232_v5 }
 0x22d   : > { %2972 = vmatmul.bf16.gmra.mxu0 %v6201_v1 }
 0x22f   : > { %v2020_v21 = vpop.f32.mrf.mxu3 }
 0x230   : > { %v6236_v25 = vadd.f32 %v2020_v21, %v1819_v53  ;;  %v6248_v61 = vpop.f32.mrf.mxu1  ;;  %v6250_v53 = vpop.f32.mrf.mxu0 }
 0x231   : > { %7138 = vst [vmem:[#allocation56_spill] sm:$0xff] %v6248_v61  ;;  %v4733_v61 = vld [vmem:[#allocation6 + $0x230] sm:$0xff] }
 0x232   : > { %7135 = vst [vmem:[#allocation53_spill] sm:$0xff] %v6236_v25  ;;  %3378 = vmatpush.bf16.msrb.mxu2 %v4733_v61  ;;  %v2095_v61 = vld [vmem:[#allocation2 + $0x30] sm:$0xff] }
 0x233   : > { %1715 = vmatmul.bf16.gmra.mxu1 %v6240_v17  ;;  %7139 = vst [vmem:[#allocation57_spill] sm:$0xff] %v6250_v53 }
 0x234   : > { %2054 = vmatmul.bf16.gmra.mxu3 %v6242_v40 }
 0x236   : > { %v1823_v32 = vpop.f32.mrf.mxu2 }
 0x237   : > { %v6253_v21 = vpop.f32.mrf.mxu3 }
 0x238   : > { %7140 = vst [vmem:[#allocation58_spill] sm:$0xff] %v6253_v21  ;;  %v6255_v23 = vpop.f32.mrf.mxu0  ;;  %v4725_v21 = vld [vmem:[#allocation6 + $0x1f0] sm:$0xff] }
 0x239   : > { %7141 = vst [vmem:[#allocation59_spill] sm:$0xff] %v6255_v23  ;;  %3144 = vmatpush.bf16.msrb.mxu1 %v4725_v21  ;;  %v2332_v21 = vld [vmem:[#allocation2 + $0x51] sm:$0xff]  ;;  %v2331_v23 = vld [vmem:[#allocation2 + $0x49] sm:$0xff] }
 0x23b   : > { %2448 = vmatmul.bf16.vlgmr.msra.gmra.mxu2 %v2359_v6  ;;  %v2330_v6 = vld [vmem:[#allocation2 + $0x39] sm:$0xff] }
 0x23c   : > { %v6259_v3 = vpack.c.bf16 %v2330_v6, %v2329_v0  ;;  %v2824_v6 = vld [vmem:[#allocation2 + $0x180] sm:$0xff] }
 0x23d   : > { %2977 = vmatmul.bf16.gmra.mxu0 %v6214_v20 }
 0x23e   : > { %7143 = vst [vmem:[#allocation61_spill] sm:$0xff] %v6259_v3 }
 0x240   : > { %v1686_v15 = vpop.f32.mrf.mxu1  ;;  %v6263_v44 = vpop.f32.mrf.mxu0 }
 0x241   : > { %v1824_v25 = vadd.f32 %v1823_v32, %v1686_v15  ;;  %7144 = vst [vmem:[#allocation62_spill] sm:$0xff] %v6263_v44  ;;  %v2825_v44 = vld [vmem:[#allocation2 + $0x188] sm:$0xff] }
 0x243   : > { %2214 = vmatmul.bf16.vlgmr.msra.gmra.mxu1 %v2125_v4  ;;  %v2564_v4 = vld [vmem:[#allocation2 + $0x3a] sm:$0xff] }
 0x244   : > { %2682 = vmatmul.bf16.vlgmr.msra.gmra.mxu3 %v2593_v26  ;;  %v6265_v26 = vpop.f32.mrf.mxu2  ;;  %v6269_v32 = vpack.c.bf16 %v2564_v4, %v2563_v22  ;;  %v2566_v22 = vld [vmem:[#allocation2 + $0x52] sm:$0xff] }
 0x245   : > { %7145 = vst [vmem:[#allocation63_spill] sm:$0xff] %v6265_v26 }
 0x246   : > { %7147 = vst [vmem:[#allocation65_spill] sm:$0xff] %v6269_v32 }
 0x247   : > { %v2025_v54 = vpop.f32.mrf.mxu3 }
 0x248   : > { %v6257_v53 = vadd.f32 %v2025_v54, %v1824_v25  ;;  %v6267_v57 = vpop.f32.mrf.mxu1  ;;  %v2126_v25 = vpack.c.bf16 %v2096_v39, %v2095_v61  ;;  %v6278_v39 = vpack.c.bf16 %v2825_v44, %v2824_v6  ;;  %v2098_v61 = vld [vmem:[#allocation2 + $0x50] sm:$0xff]  ;;  %v4732_v44 = vld [vmem:[#allocation6 + $0x228] sm:$0xff] }
 0x249   : > { %7146 = vst [vmem:[#allocation64_spill] sm:$0xff] %v6267_v57  ;;  %v6276_v57 = vpack.c.bf16 %v2332_v21, %v2331_v23  ;;  %v2334_v6 = vld [vmem:[#allocation2 + $0x69] sm:$0xff]  ;;  %3379 = vmatpush.bf16.msrb.mxu2 %v4732_v44  ;;  %v2099_v44 = vld [vmem:[#allocation2 + $0x60] sm:$0xff] }
 0x24a   : > { %7142 = vst [vmem:[#allocation60_spill] sm:$0xff] %v6257_v53  ;;  %v6274_v53 = vpop.f32.mrf.mxu0 }
 0x24b   : > { %2453 = vmatmul.bf16.gmra.mxu2 %v6259_v3  ;;  %7149 = vst [vmem:[#allocation67_spill] sm:$0xff] %v6274_v53  ;;  %v2826_v53 = vld [vmem:[#allocation2 + $0x198] sm:$0xff] }
 0x24c   : > { %7150 = vst [vmem:[#allocation68_spill] sm:$0xff] %v6276_v57 }
 0x24d   : > { %2982 = vmatmul.bf16.gmra.mxu0 %v6232_v5  ;;  %7151 = vst [vmem:[#allocation69_spill] sm:$0xff] %v6278_v39 }
 0x24e   : > { %v1828_v15 = vpop.f32.mrf.mxu2 }
 0x24f   : > { %v6272_v0 = vpop.f32.mrf.mxu3 }
 0x250   : > { %7148 = vst [vmem:[#allocation66_spill] sm:$0xff] %v6272_v0  ;;  %v2097_v0 = vld [vmem:[#allocation2 + $0x48] sm:$0xff] }
 0x251   : > { %v2127_v3 = vpack.c.bf16 %v2098_v61, %v2097_v0  ;;  %v2333_v0 = vld [vmem:[#allocation2 + $0x61] sm:$0xff]  ;;  %v4724_v61 = vld [vmem:[#allocation6 + $0x1e8] sm:$0xff] }
 0x252   : > { %3145 = vmatpush.bf16.msrb.mxu1 %v4724_v61 }
 0x253   : > { %2219 = vmatmul.bf16.gmra.mxu1 %v2126_v25 }
 0x254   : > { %2687 = vmatmul.bf16.gmra.mxu3 %v6269_v32  ;;  %v2565_v32 = vld [vmem:[#allocation2 + $0x4a] sm:$0xff] }
 0x255   : > { %v6284_v62 = vpack.c.bf16 %v2566_v22, %v2565_v32 }
 0x256   : > { %v1830_v23 = vpop.f32.mrf.mxu2 }
 0x257   : > { %7153 = vst [vmem:[#allocation71_spill] sm:$0xff] %v6284_v62 }
 0x258   : > { %v1691_v54 = vpop.f32.mrf.mxu1 }
 0x259   : > { %v1829_v26 = vadd.f32 %v1828_v15, %v1691_v54  ;;  %v6286_v15 = vpop.f32.mrf.mxu0 }
 0x25a   : > { %7154 = vst [vmem:[#allocation72_spill] sm:$0xff] %v6286_v15 }
 0x25b   : > { %2458 = vmatmul.bf16.gmra.mxu2 %v6276_v57 }
 0x25d   : > { %2987 = vmatmul.bf16.gmra.mxu0 %v6278_v39 }
 0x25f   : > { %v2030_v4 = vpop.f32.mrf.mxu3 }
 0x260   : > { %v6282_v25 = vadd.f32 %v2030_v4, %v1829_v26  ;;  %v1693_v63 = vpop.f32.mrf.mxu1  ;;  %v2827_v4 = vld [vmem:[#allocation2 + $0x1a0] sm:$0xff] }
 0x261   : > { %v1831_v21 = vadd.f32 %v1830_v23, %v1693_v63  ;;  %v2843_v32 = vpack.c.bf16 %v2827_v4, %v2826_v53  ;;  %v6294_v22 = vpop.f32.mrf.mxu0  ;;  %v2100_v63 = vld [vmem:[#allocation2 + $0x68] sm:$0xff] }
 0x262   : > { %7152 = vst [vmem:[#allocation70_spill] sm:$0xff] %v6282_v25  ;;  %v6291_v25 = vpack.c.bf16 %v2334_v6, %v2333_v0  ;;  %v2568_v23 = vld [vmem:[#allocation2 + $0x6a] sm:$0xff]  ;;  %v2336_v4 = vld [vmem:[#allocation2 + $0x81] sm:$0xff] }
 0x263   : > { %2224 = vmatmul.bf16.gmra.mxu1 %v2127_v3  ;;  %7157 = vst [vmem:[#allocation75_spill] sm:$0xff] %v6294_v22  ;;  %v2335_v22 = vld [vmem:[#allocation2 + $0x79] sm:$0xff] }
 0x264   : > { %2692 = vmatmul.bf16.gmra.mxu3 %v6284_v62  ;;  %7156 = vst [vmem:[#allocation74_spill] sm:$0xff] %v6291_v25  ;;  %v2569_v62 = vld [vmem:[#allocation2 + $0x7a] sm:$0xff] }
 0x266   : > { %v1833_v3 = vpop.f32.mrf.mxu2 }
 0x267   : > { %v2032_v54 = vpop.f32.mrf.mxu3 }
 0x268   : > { %v6289_v26 = vadd.f32 %v2032_v54, %v1831_v21  ;;  %v2128_v54 = vpack.c.bf16 %v2100_v63, %v2099_v44 }
 0x26a   : > { %7155 = vst [vmem:[#allocation73_spill] sm:$0xff] %v6289_v26  ;;  %v2567_v26 = vld [vmem:[#allocation2 + $0x62] sm:$0xff] }
 0x26b   : > { %2463 = vmatmul.bf16.gmra.mxu2 %v6291_v25  ;;  %v6296_v57 = vpack.c.bf16 %v2568_v23, %v2567_v26  ;;  %v6301_v25 = vpack.c.bf16 %v2336_v4, %v2335_v22  ;;  %v2570_v23 = vld [vmem:[#allocation2 + $0x82] sm:$0xff]  ;;  %v4731_v22 = vld [vmem:[#allocation6 + $0x220] sm:$0xff] }
 0x26c   : > { %3380 = vmatpush.bf16.msrb.mxu2 %v4731_v22 }
 0x26d   : > { %2992 = vmatmul.bf16.gmra.mxu0 %v2843_v32  ;;  %7158 = vst [vmem:[#allocation76_spill] sm:$0xff] %v6296_v57 }
 0x26e   : > { %v1835_v6 = vpop.f32.mrf.mxu2  ;;  %7160 = vst [vmem:[#allocation78_spill] sm:$0xff] %v6301_v25 }
 0x270   : > { %v1696_v15 = vpop.f32.mrf.mxu1 }
 0x271   : > { %v1834_v21 = vadd.f32 %v1833_v3, %v1696_v15  ;;  %v2102_v3 = vld [vmem:[#allocation2 + $0x80] sm:$0xff] }
 0x273   : > { %2229 = vmatmul.bf16.gmra.mxu1 %v2128_v54  ;;  %v2101_v54 = vld [vmem:[#allocation2 + $0x78] sm:$0xff] }
 0x274   : > { %2697 = vmatmul.bf16.gmra.mxu3 %v6296_v57  ;;  %v2129_v57 = vpack.c.bf16 %v2102_v3, %v2101_v54  ;;  %v2103_v54 = vld [vmem:[#allocation2 + $0x90] sm:$0xff] }
 0x277   : > { %v2035_v53 = vpop.f32.mrf.mxu3 }
 0x278   : > { %v6299_v0 = vadd.f32 %v2035_v53, %v1834_v21  ;;  %v1698_v61 = vpop.f32.mrf.mxu1  ;;  %v6306_v21 = vpack.c.bf16 %v2570_v23, %v2569_v62  ;;  %v2338_v53 = vld [vmem:[#allocation2 + $0x99] sm:$0xff] }
 0x279   : > { %v1836_v32 = vadd.f32 %v1835_v6, %v1698_v61  ;;  %v2104_v62 = vld [vmem:[#allocation2 + $0x98] sm:$0xff] }
 0x27a   : > { %7159 = vst [vmem:[#allocation77_spill] sm:$0xff] %v6299_v0  ;;  %v2130_v22 = vpack.c.bf16 %v2104_v62, %v2103_v54  ;;  %v2106_v62 = vld [vmem:[#allocation2 + $0xb0] sm:$0xff] }
 0x27b   : > { %2468 = vmatmul.bf16.gmra.mxu2 %v6301_v25  ;;  %7162 = vst [vmem:[#allocation80_spill] sm:$0xff] %v6306_v21 }
 0x27e   : > { %v1838_v63 = vpop.f32.mrf.mxu2 }
 0x27f   : > { %v2037_v15 = vpop.f32.mrf.mxu3 }
 0x280   : > { %v6304_v26 = vadd.f32 %v2037_v15, %v1836_v32  ;;  %v1701_v44 = vpop.f32.mrf.mxu1  ;;  %v2337_v15 = vld [vmem:[#allocation2 + $0x91] sm:$0xff] }
 0x281   : > { %v1839_v39 = vadd.f32 %v1838_v63, %v1701_v44  ;;  %v6311_v0 = vpack.c.bf16 %v2338_v53, %v2337_v15  ;;  %v2572_v63 = vld [vmem:[#allocation2 + $0x9a] sm:$0xff] }
 0x282   : > { %7161 = vst [vmem:[#allocation79_spill] sm:$0xff] %v6304_v26  ;;  %v4723_v26 = vld [vmem:[#allocation6 + $0x1e0] sm:$0xff] }
 0x283   : > { %2234 = vmatmul.bf16.gmra.mxu1 %v2129_v57  ;;  %7164 = vst [vmem:[#allocation82_spill] sm:$0xff] %v6311_v0 }
 0x284   : > { %2702 = vmatmul.bf16.gmra.mxu3 %v6306_v21  ;;  %3146 = vmatpush.bf16.msrb.mxu1 %v4723_v26  ;;  %v2340_v26 = vld [vmem:[#allocation2 + $0xb1] sm:$0xff] }
 0x286   : > { %v1840_v6 = vpop.f32.mrf.mxu2 }
 0x287   : > { %v2040_v4 = vpop.f32.mrf.mxu3 }
 0x288   : > { %v6309_v61 = vadd.f32 %v2040_v4, %v1839_v39  ;;  %v1703_v32 = vpop.f32.mrf.mxu1  ;;  %v2571_v39 = vld [vmem:[#allocation2 + $0x92] sm:$0xff] }
 0x289   : > { %v1841_v25 = vadd.f32 %v1840_v6, %v1703_v32 }
 0x28a   : > { %7163 = vst [vmem:[#allocation81_spill] sm:$0xff] %v6309_v61  ;;  %v6316_v61 = vpack.c.bf16 %v2572_v63, %v2571_v39  ;;  %v2574_v63 = vld [vmem:[#allocation2 + $0xb2] sm:$0xff] }
 0x28b   : > { %2473 = vmatmul.bf16.gmra.mxu2 %v6311_v0  ;;  %v2339_v0 = vld [vmem:[#allocation2 + $0xa9] sm:$0xff] }
 0x28c   : > { %7166 = vst [vmem:[#allocation84_spill] sm:$0xff] %v6316_v61 }
 0x28e   : > { %v1843_v57 = vpop.f32.mrf.mxu2 }
 0x28f   : > { %v2042_v3 = vpop.f32.mrf.mxu3 }
 0x290   : > { %v6314_v23 = vadd.f32 %v2042_v3, %v1841_v25  ;;  %v1706_v44 = vpop.f32.mrf.mxu1  ;;  %v6321_v25 = vpack.c.bf16 %v2340_v26, %v2339_v0  ;;  %v4730_v0 = vld [vmem:[#allocation6 + $0x218] sm:$0xff] }
 0x291   : > { %v1844_v4 = vadd.f32 %v1843_v57, %v1706_v44  ;;  %v2342_v26 = vld [vmem:[#allocation2 + $0xc9] sm:$0xff]  ;;  %3381 = vmatpush.bf16.msrb.mxu2 %v4730_v0 }
 0x292   : > { %7165 = vst [vmem:[#allocation83_spill] sm:$0xff] %v6314_v23  ;;  %v2573_v23 = vld [vmem:[#allocation2 + $0xaa] sm:$0xff] }
 0x293   : > { %2239 = vmatmul.bf16.gmra.mxu1 %v2130_v22  ;;  %7168 = vst [vmem:[#allocation86_spill] sm:$0xff] %v6321_v25  ;;  %v2105_v22 = vld [vmem:[#allocation2 + $0xa8] sm:$0xff] }
 0x294   : > { %2707 = vmatmul.bf16.gmra.mxu3 %v6316_v61  ;;  %v2131_v39 = vpack.c.bf16 %v2106_v62, %v2105_v22 }
 0x296   : > { %v1845_v6 = vpop.f32.mrf.mxu2 }
 0x297   : > { %v2045_v53 = vpop.f32.mrf.mxu3 }
 0x298   : > { %v6319_v32 = vadd.f32 %v2045_v53, %v1844_v4  ;;  %v1708_v15 = vpop.f32.mrf.mxu1  ;;  %v6326_v4 = vpack.c.bf16 %v2574_v63, %v2573_v23  ;;  %v2108_v23 = vld [vmem:[#allocation2 + $0xc8] sm:$0xff] }
 0x299   : > { %v1846_v21 = vadd.f32 %v1845_v6, %v1708_v15  ;;  %v2576_v63 = vld [vmem:[#allocation2 + $0xca] sm:$0xff] }
 0x29a   : > { %7167 = vst [vmem:[#allocation85_spill] sm:$0xff] %v6319_v32 }
 0x29b   : > { %2478 = vmatmul.bf16.gmra.mxu2 %v6321_v25 }
 0x29e   : > { %v1848_v3 = vpop.f32.mrf.mxu2 }
 0x29f   : > { %v2047_v57 = vpop.f32.mrf.mxu3 }
 0x2a0   : > { %v6324_v44 = vadd.f32 %v2047_v57, %v1846_v21  ;;  %v1711_v54 = vpop.f32.mrf.mxu1  ;;  %v2341_v21 = vld [vmem:[#allocation2 + $0xc1] sm:$0xff] }
 0x2a1   : > { %v1849_v61 = vadd.f32 %v1848_v3, %v1711_v54  ;;  %v4722_v57 = vld [vmem:[#allocation6 + $0x1d8] sm:$0xff]  ;;  %v6331_v32 = vpack.c.bf16 %v2342_v26, %v2341_v21 }
 0x2a2   : > { %7169 = vst [vmem:[#allocation87_spill] sm:$0xff] %v6324_v44  ;;  %3147 = vmatpush.bf16.msrb.mxu1 %v4722_v57  ;;  %v4742_v57 = vld [vmem:[#allocation8 + $0x38] sm:$0xff] }
 0x2a3   : > { %2244 = vmatmul.bf16.gmra.mxu1 %v2131_v39  ;;  %7171 = vst [vmem:[#allocation89_spill] sm:$0xff] %v6331_v32  ;;  %v2107_v39 = vld [vmem:[#allocation2 + $0xc0] sm:$0xff]  ;;  %3650 = vmatpush.bf16.msrb.mxu3 %v4742_v57 }
 0x2a4   : > { %2712 = vmatmul.bf16.gmra.mxu3 %v6326_v4  ;;  %v2132_v0 = vpack.c.bf16 %v2108_v23, %v2107_v39 }
 0x2a6   : > { %v1850_v6 = vpop.f32.mrf.mxu2 }
 0x2a7   : > { %v2050_v53 = vpop.f32.mrf.mxu3 }
 0x2a8   : > { %v6329_v15 = vadd.f32 %v2050_v53, %v1849_v61  ;;  %v1713_v25 = vpop.f32.mrf.mxu1  ;;  %v2575_v61 = vld [vmem:[#allocation2 + $0xc2] sm:$0xff] }
 0x2a9   : > { %v1851_v44 = vadd.f32 %v1850_v6, %v1713_v25 }
 0x2aa   : > { %7170 = vst [vmem:[#allocation88_spill] sm:$0xff] %v6329_v15  ;;  %v6336_v15 = vpack.c.bf16 %v2576_v63, %v2575_v61  ;;  %v2109_v63 = vld [vmem:[#allocation2 + $0xd8] sm:$0xff] }
 0x2ab   : > { %2483 = vmatmul.bf16.gmra.mxu2 %v6331_v32 }
 0x2ae   : > { %v1853_v62 = vpop.f32.mrf.mxu2 }
 0x2af   : > { %v2052_v3 = vpop.f32.mrf.mxu3 }
 0x2b0   : > { %v6334_v54 = vadd.f32 %v2052_v3, %v1851_v44  ;;  %v1716_v22 = vpop.f32.mrf.mxu1  ;;  %v2110_v44 = vld [vmem:[#allocation2 + $0xe0] sm:$0xff] }
 0x2b1   : > { %v1854_v53 = vadd.f32 %v1853_v62, %v1716_v22  ;;  %v4750_v22 = vld [vmem:[#allocation9 + $0x38] sm:$0xff]  ;;  %v2133_v61 = vpack.c.bf16 %v2110_v44, %v2109_v63 }
 0x2b2   : > { %3980 = vmatpush.bf16.msra.mxu0 %v4750_v22 }
 0x2b3   : > { %2249 = vmatmul.bf16.gmra.mxu1 %v2132_v0 }
 0x2b4   : > { %2717 = vmatmul.bf16.gmra.mxu3 %v6336_v15 }
 0x2b6   : > { %v1855_v25 = vpop.f32.mrf.mxu2 }
 0x2b7   : > { %v2055_v6 = vpop.f32.mrf.mxu3 }
 0x2b8   : > { %v6339_v26 = vadd.f32 %v2055_v6, %v1854_v53  ;;  %v1718_v21 = vpop.f32.mrf.mxu1 }
 0x2b9   : > { %v1856_v32 = vadd.f32 %v1855_v25, %v1718_v21  ;;  %v4729_v25 = vld [vmem:[#allocation6 + $0x210] sm:$0xff] }
 0x2ba   : > { %3382 = vmatpush.bf16.msrb.mxu2 %v4729_v25 }
 0x2bb   : > { %2488 = vmatmul.bf16.gmra.mxu2 %v6125_v29  ;;  %v1781_v29 = vadd.f32 %v6060_v47, %v6062_v33  ;;  %v2111_v33 = vld [vmem:[#allocation2 + $0xf0] sm:$0xff] }
 0x2be   : > { %v2449_v3 = vpop.f32.mrf.mxu2 }
 0x2bf   : > { %v2057_v23 = vpop.f32.mrf.mxu3 }
 0x2c0   : > { %v6342_v39 = vadd.f32 %v2057_v23, %v1856_v32  ;;  %v2215_v62 = vpop.f32.mrf.mxu1  ;;  %v2061_v32 = vadd.f32 %v6066_v42, %v1781_v29 }
 0x2c1   : > { %v2295_v0 = vadd.f32 %v2215_v62, %v6056_v37 }
 0x2c2   : > { %7172 = vst [vmem:[#allocation90_spill] sm:$0xff] %v6342_v39  ;;  %v4721_v39 = vld [vmem:[#allocation6 + $0x1d0] sm:$0xff] }
 0x2c3   : > { %2254 = vmatmul.bf16.gmra.mxu1 %v2133_v61  ;;  %v2529_v53 = vadd.f32 %v2449_v3, %v2295_v0  ;;  %v2112_v3 = vld [vmem:[#allocation2 + $0xf8] sm:$0xff] }
 0x2c4   : > { %2722 = vmatmul.bf16.gmra.mxu3 %v6127_v36  ;;  %3148 = vmatpush.bf16.msrb.mxu1 %v4721_v39  ;;  %v2134_v42 = vpack.c.bf16 %v2112_v3, %v2111_v33  ;;  %v1786_v39 = vadd.f32 %v6079_v50, %v6081_v18  ;;  %v4749_v50 = vld [vmem:[#allocation9 + $0x30] sm:$0xff] }
 0x2c5   : > { %3981 = vmatpush.bf16.msra.mxu0 %v4749_v50  ;;  %v1801_v50 = vadd.f32 %v6145_v24, %v6147_v49 }
 0x2c6   : > { %v2451_v6 = vpop.f32.mrf.mxu2 }
 0x2c7   : > { %v2683_v21 = vpop.f32.mrf.mxu3 }
 0x2c8   : > { %v6349_v57 = vadd.f32 %v2683_v21, %v2529_v53  ;;  %v2217_v23 = vpop.f32.mrf.mxu1 }
 0x2c9   : > { %v2296_v37 = vadd.f32 %v2217_v23, %v2061_v32 }
 0x2cb   : > { %v2530_v44 = vadd.f32 %v2451_v6, %v2296_v37  ;;  %2493 = vmatmul.bf16.gmra.mxu2 %v6149_v9  ;;  %v2063_v9 = vadd.f32 %v6084_v43, %v1786_v39  ;;  %v4741_v6 = vld [vmem:[#allocation8 + $0x30] sm:$0xff] }
 0x2cc   : > { %3651 = vmatpush.bf16.msrb.mxu3 %v4741_v6 }
 0x2ce   : > { %v2454_v36 = vpop.f32.mrf.mxu2 }
 0x2cf   : > { %v2685_v62 = vpop.f32.mrf.mxu3 }
 0x2d0   : > { %v6352_v63 = vadd.f32 %v2685_v62, %v2530_v44  ;;  %v2220_v47 = vpop.f32.mrf.mxu1 }
 0x2d1   : > { %v2297_v22 = vadd.f32 %v2220_v47, %v6074_v31  ;;  %v2113_v31 = vld [vmem:[#allocation2 + $0x108] sm:$0xff] }
 0x2d2   : > { %v2135_v43 = vpack.c.bf16 %v6160_v19, %v2113_v31 }
 0x2d3   : > { %2259 = vmatmul.bf16.gmra.mxu1 %v2134_v42  ;;  %v2531_v0 = vadd.f32 %v2454_v36, %v2297_v22  ;;  %v4728_v36 = vld [vmem:[#allocation6 + $0x208] sm:$0xff] }
 0x2d4   : > { %2727 = vmatmul.bf16.gmra.mxu3 %v6151_v27  ;;  %3383 = vmatpush.bf16.msrb.mxu2 %v4728_v36 }
 0x2d6   : > { %v2456_v61 = vpop.f32.mrf.mxu2 }
 0x2d7   : > { %v2688_v53 = vpop.f32.mrf.mxu3 }
 0x2d8   : > { %v6359_v25 = vadd.f32 %v2688_v53, %v2531_v0  ;;  %v2222_v29 = vpop.f32.mrf.mxu1 }
 0x2d9   : > { %v2298_v32 = vadd.f32 %v2222_v29, %v2063_v9 }
 0x2db   : > { %v2532_v21 = vadd.f32 %v2456_v61, %v2298_v32  ;;  %2498 = vmatmul.bf16.gmra.mxu2 %v6175_v48  ;;  %v1791_v48 = vadd.f32 %v6097_v35, %v6099_v7 }
 0x2dd   : > { %v2065_v47 = vadd.f32 %v6108_v12, %v1791_v48  ;;  %v1796_v12 = vadd.f32 %v6121_v59, %v6123_v58  ;;  %v4719_v48 = vld [vmem:[#allocation6 + $0x1c0] sm:$0xff] }
 0x2de   : > { %v2459_v23 = vpop.f32.mrf.mxu2 }
 0x2df   : > { %v2690_v37 = vpop.f32.mrf.mxu3  ;;  %v2067_v29 = vadd.f32 %v6132_v60, %v1796_v12  ;;  %v4727_v60 = vld [vmem:[#allocation6 + $0x200] sm:$0xff]  ;;  %v2357_v12 = vld [vmem:[#allocation2 + $0x181] sm:$0xff] }
 0x2e0   : > { %v6362_v27 = vadd.f32 %v2690_v37, %v2532_v21  ;;  %v2225_v44 = vpop.f32.mrf.mxu1  ;;  %v4740_v21 = vld [vmem:[#allocation8 + $0x28] sm:$0xff]  ;;  %3384 = vmatpush.bf16.msrb.mxu2 %v4727_v60 }
 0x2e1   : > { %v2299_v18 = vadd.f32 %v2225_v44, %v6093_v55  ;;  %v4720_v55 = vld [vmem:[#allocation6 + $0x1c8] sm:$0xff]  ;;  %3652 = vmatpush.bf16.msrb.mxu3 %v4740_v21 }
 0x2e2   : > { %3149 = vmatpush.bf16.msrb.mxu1 %v4720_v55  ;;  %v4748_v44 = vld [vmem:[#allocation9 + $0x28] sm:$0xff] }
 0x2e3   : > { %2264 = vmatmul.bf16.gmra.mxu1 %v2135_v43  ;;  %v2533_v3 = vadd.f32 %v2459_v23, %v2299_v18  ;;  %3982 = vmatpush.bf16.msra.mxu0 %v4748_v44 }
 0x2e4   : > { %2732 = vmatmul.bf16.gmra.mxu3 %v6177_v14 }
 0x2e6   : > { %v2461_v62 = vpop.f32.mrf.mxu2  ;;  %3150 = vmatpush.bf16.msrb.mxu1 %v4719_v48 }
 0x2e7   : > { %v2693_v33 = vpop.f32.mrf.mxu3 }
 0x2e8   : > { %v6370_v22 = vadd.f32 %v2693_v33, %v2533_v3  ;;  %v2227_v42 = vpop.f32.mrf.mxu1 }
 0x2e9   : > { %v2300_v0 = vadd.f32 %v2227_v42, %v2065_v47 }
 0x2eb   : > { %v2534_v19 = vadd.f32 %v2461_v62, %v2300_v0  ;;  %2503 = vmatmul.bf16.gmra.mxu2 %v6191_v34 }
 0x2ee   : > { %v2464_v39 = vpop.f32.mrf.mxu2 }
 0x2ef   : > { %v2695_v14 = vpop.f32.mrf.mxu3 }
 0x2f0   : > { %v6373_v61 = vadd.f32 %v2695_v14, %v2534_v19  ;;  %v2230_v9 = vpop.f32.mrf.mxu1  ;;  %v4739_v19 = vld [vmem:[#allocation8 + $0x20] sm:$0xff] }
 0x2f1   : > { %v2301_v35 = vadd.f32 %v2230_v9, %v6116_v30  ;;  %3653 = vmatpush.bf16.msrb.mxu3 %v4739_v19  ;;  %v4747_v9 = vld [vmem:[#allocation9 + $0x20] sm:$0xff]  ;;  %v4746_v19 = vld [vmem:[#allocation9 + $0x18] sm:$0xff] }
 0x2f2   : > { %3983 = vmatpush.bf16.msra.mxu0 %v4747_v9 }
 0x2f3   : > { %2269 = vmatmul.bf16.gmra.mxu1 %v6185_v38  ;;  %v2535_v7 = vadd.f32 %v2464_v39, %v2301_v35 }
 0x2f4   : > { %2737 = vmatmul.bf16.gmra.mxu3 %v6193_v56 }
 0x2f6   : > { %v2466_v53 = vpop.f32.mrf.mxu2  ;;  %3984 = vmatpush.bf16.msra.mxu0 %v4746_v19 }
 0x2f7   : > { %v2698_v6 = vpop.f32.mrf.mxu3 }
 0x2f8   : > { %v6381_v34 = vadd.f32 %v2698_v6, %v2535_v7  ;;  %v2232_v32 = vpop.f32.mrf.mxu1 }
 0x2f9   : > { %v2302_v31 = vadd.f32 %v2232_v32, %v2067_v29 }
 0x2fb   : > { %v2536_v23 = vadd.f32 %v2466_v53, %v2302_v31  ;;  %2508 = vmatmul.bf16.gmra.mxu2 %v6206_v41  ;;  %v2069_v41 = vadd.f32 %v6157_v51, %v1801_v50  ;;  %v1806_v51 = vadd.f32 %v6171_v45, %v6173_v13  ;;  %v2358_v53 = vld [vmem:[#allocation2 + $0x189] sm:$0xff]  ;;  %v7177_v50 = vld [vmem:[#allocation50_spill] sm:$0xff] }
 0x2fd   : > { %v2071_v42 = vadd.f32 %v6182_v11, %v1806_v51  ;;  %v7173_v11 = vld [vmem:[#allocation46_spill] sm:$0xff] }
 0x2fe   : > { %v2469_v30 = vpop.f32.mrf.mxu2  ;;  %v1811_v35 = vadd.f32 %v7173_v11, %v6199_v10  ;;  %v2591_v10 = vld [vmem:[#allocation2 + $0x182] sm:$0xff] }
 0x2ff   : > { %v2700_v38 = vpop.f32.mrf.mxu3 }
 0x300   : > { %v6384_v37 = vadd.f32 %v2700_v38, %v2536_v23  ;;  %v2235_v56 = vpop.f32.mrf.mxu1 }
 0x301   : > { %v2303_v59 = vadd.f32 %v2235_v56, %v6141_v16  ;;  %v7175_v56 = vld [vmem:[#allocation48_spill] sm:$0xff] }
 0x303   : > { %2274 = vmatmul.bf16.gmra.mxu1 %v6201_v1  ;;  %v2537_v58 = vadd.f32 %v2469_v30, %v2303_v59  ;;  %v2592_v30 = vld [vmem:[#allocation2 + $0x18a] sm:$0xff] }
 0x304   : > { %2742 = vmatmul.bf16.gmra.mxu3 %v6208_v8  ;;  %v6428_v59 = vpack.c.bf16 %v2592_v30, %v2591_v10 }
 0x306   : > { %v2471_v18 = vpop.f32.mrf.mxu2 }
 0x307   : > { %v2703_v43 = vpop.f32.mrf.mxu3 }
 0x308   : > { %v6392_v3 = vadd.f32 %v2703_v43, %v2537_v58  ;;  %v2237_v36 = vpop.f32.mrf.mxu1  ;;  %v7176_v58 = vld [vmem:[#allocation69_spill] sm:$0xff] }
 0x309   : > { %v2304_v16 = vadd.f32 %v2237_v36, %v2069_v41  ;;  %v7179_v36 = vld [vmem:[#allocation51_spill] sm:$0xff] }
 0x30b   : > { %v6394_v62 = vadd.f32 %v2471_v18, %v2304_v16  ;;  %2513 = vmatmul.bf16.gmra.mxu2 %v6222_v52  ;;  %v7178_v18 = vld [vmem:[#allocation49_spill] sm:$0xff] }
 0x30c   : > { %v1816_v41 = vadd.f32 %v7178_v18, %v7177_v50  ;;  %v7189_v18 = vld [vmem:[#allocation64_spill] sm:$0xff] }
 0x30e   : > { %v2474_v8 = vpop.f32.mrf.mxu2  ;;  %v2075_v48 = vadd.f32 %v7179_v36, %v1816_v41  ;;  %v7190_v41 = vld [vmem:[#allocation63_spill] sm:$0xff] }
 0x30f   : > { %v6397_v1 = vpop.f32.mrf.mxu3 }
 0x310   : > { %v2240_v47 = vpop.f32.mrf.mxu1 }
 0x311   : > { %v2305_v24 = vadd.f32 %v2240_v47, %v6166_v46 }
 0x313   : > { %2279 = vmatmul.bf16.gmra.mxu1 %v6214_v20  ;;  %v2539_v49 = vadd.f32 %v2474_v8, %v2305_v24  ;;  %v4738_v24 = vld [vmem:[#allocation8 + $0x18] sm:$0xff] }
 0x314   : > { %2747 = vmatmul.bf16.gmra.mxu3 %v6224_v28 }
 0x315   : > { %3654 = vmatpush.bf16.msrb.mxu3 %v4738_v24 }
 0x316   : > { %v2476_v33 = vpop.f32.mrf.mxu2 }
 0x317   : > { %v2708_v55 = vpop.f32.mrf.mxu3 }
 0x318   : > { %v6405_v0 = vadd.f32 %v2708_v55, %v2539_v49  ;;  %v2242_v52 = vpop.f32.mrf.mxu1 }
 0x319   : > { %v2306_v39 = vadd.f32 %v2242_v52, %v2071_v42 }
 0x31b   : > { %v6407_v14 = vadd.f32 %v2476_v33, %v2306_v39  ;;  %2518 = vmatmul.bf16.gmra.mxu2 %v6240_v17  ;;  %v7174_v17 = vld [vmem:[#allocation47_spill] sm:$0xff]  ;;  %v7180_v33 = vld [vmem:[#allocation65_spill] sm:$0xff] }
 0x31c   : > { %v2073_v29 = vadd.f32 %v7174_v17, %v1811_v35  ;;  %v7181_v39 = vld [vmem:[#allocation53_spill] sm:$0xff] }
 0x31e   : > { %v2479_v20 = vpop.f32.mrf.mxu2 }
 0x31f   : > { %v6410_v46 = vpop.f32.mrf.mxu3 }
 0x320   : > { %v2245_v28 = vpop.f32.mrf.mxu1 }
 0x321   : > { %v2307_v45 = vadd.f32 %v2245_v28, %v6189_v2  ;;  %v6420_v2 = vpack.c.bf16 %v2358_v53, %v2357_v12  ;;  %v7182_v28 = vld [vmem:[#allocation61_spill] sm:$0xff]  ;;  %v6447_v53 = vpop.f32.mrf.mxu0 }
 0x323   : > { %2284 = vmatmul.bf16.gmra.mxu1 %v6232_v5  ;;  %v2541_v13 = vadd.f32 %v2479_v20, %v2307_v45  ;;  %v7183_v45 = vld [vmem:[#allocation56_spill] sm:$0xff] }
 0x324   : > { %2752 = vmatmul.bf16.gmra.mxu3 %v6242_v40 }
 0x326   : > { %v2481_v7 = vpop.f32.mrf.mxu2 }
 0x327   : > { %v2713_v6 = vpop.f32.mrf.mxu3 }
 0x328   : > { %v6418_v32 = vadd.f32 %v2713_v6, %v2541_v13  ;;  %v2247_v21 = vpop.f32.mrf.mxu1  ;;  %v7184_v13 = vld [vmem:[#allocation55_spill] sm:$0xff] }
 0x329   : > { %v2308_v31 = vadd.f32 %v2247_v21, %v2073_v29  ;;  %v1821_v11 = vadd.f32 %v7184_v13, %v7183_v45  ;;  %v4745_v45 = vld [vmem:[#allocation9 + $0x10] sm:$0xff]  ;;  %v7193_v13 = vld [vmem:[#allocation70_spill] sm:$0xff] }
 0x32a   : > { %3985 = vmatpush.bf16.msra.mxu0 %v4745_v45 }
 0x32b   : > { %v6422_v23 = vadd.f32 %v2481_v7, %v2308_v31  ;;  %2523 = vmatmul.bf16.gmra.mxu2 %v6420_v2  ;;  %v7185_v7 = vld [vmem:[#allocation58_spill] sm:$0xff] }
 0x32c   : > { %v2077_v12 = vadd.f32 %v7185_v7, %v1821_v11 }
 0x32e   : > { %v2484_v40 = vpop.f32.mrf.mxu2 }
 0x32f   : > { %v6425_v5 = vpop.f32.mrf.mxu3 }
 0x330   : > { %v2250_v38 = vpop.f32.mrf.mxu1 }
 0x331   : > { %v2309_v44 = vadd.f32 %v2250_v38, %v7175_v56  ;;  %v6456_v56 = vpop.f32.mrf.mxu0 }
 0x333   : > { %2289 = vmatmul.bf16.gmra.mxu1 %v7176_v58  ;;  %v2543_v60 = vadd.f32 %v2484_v40, %v2309_v44  ;;  %v7186_v40 = vld [vmem:[#allocation71_spill] sm:$0xff]  ;;  %v7187_v44 = vld [vmem:[#allocation60_spill] sm:$0xff] }
 0x334   : > { %2757 = vmatmul.bf16.gmra.mxu3 %v6428_v59 }
 0x336   : > { %v2486_v43 = vpop.f32.mrf.mxu2 }
 0x337   : > { %v2718_v16 = vpop.f32.mrf.mxu3 }
 0x338   : > { %v6435_v8 = vadd.f32 %v2718_v16, %v2543_v60  ;;  %v2252_v47 = vpop.f32.mrf.mxu1  ;;  %v7188_v60 = vld [vmem:[#allocation68_spill] sm:$0xff] }
 0x339   : > { %v2310_v49 = vadd.f32 %v2252_v47, %v2075_v48  ;;  %v7191_v48 = vld [vmem:[#allocation66_spill] sm:$0xff] }
 0x33b   : > { %v6437_v51 = vadd.f32 %v2486_v43, %v2310_v49  ;;  %3385 = vmatmul.bf16.vlgmr.msrb.gmra.mxu2 %v7180_v33  ;;  %v1826_v43 = vadd.f32 %v7190_v41, %v7189_v18  ;;  %v4737_v33 = vld [vmem:[#allocation8 + $0x10] sm:$0xff] }
 0x33c   : > { %3655 = vmatpush.bf16.msrb.mxu3 %v4737_v33 }
 0x33d   : > { %v2079_v16 = vadd.f32 %v7191_v48, %v1826_v43  ;;  %v7199_v43 = vld [vmem:[#allocation77_spill] sm:$0xff]  ;;  %v7200_v48 = vld [vmem:[#allocation78_spill] sm:$0xff] }
 0x33e   : > { %v2489_v42 = vpop.f32.mrf.mxu2 }
 0x33f   : > { %v6440_v55 = vpop.f32.mrf.mxu3 }
 0x340   : > { %v2255_v52 = vpop.f32.mrf.mxu1 }
 0x341   : > { %v2311_v20 = vadd.f32 %v2255_v52, %v7181_v39  ;;  %v6465_v52 = vpop.f32.mrf.mxu0  ;;  %v7192_v39 = vld [vmem:[#allocation76_spill] sm:$0xff] }
 0x343   : > { %3151 = vmatmul.bf16.vlgmr.msrb.gmra.mxu1 %v7182_v28  ;;  %v2545_v9 = vadd.f32 %v2489_v42, %v2311_v20 }
 0x346   : > { %v2491_v35 = vpop.f32.mrf.mxu2 }
 0x347   : > { %v2723_v17 = vpop.f32.mrf.mxu3 }
 0x348   : > { %v6449_v29 = vadd.f32 %v2723_v17, %v2545_v9  ;;  %v2257_v6 = vpop.f32.mrf.mxu1 }
 0x349   : > { %v2312_v21 = vadd.f32 %v2257_v6, %v2077_v12  ;;  %v6474_v12 = vpop.f32.mrf.mxu0 }
 0x34b   : > { %v6451_v31 = vadd.f32 %v2491_v35, %v2312_v21  ;;  %3390 = vmatmul.bf16.gmra.mxu2 %v7186_v40  ;;  %v7194_v35 = vld [vmem:[#allocation74_spill] sm:$0xff] }
 0x34e   : > { %v2494_v10 = vpop.f32.mrf.mxu2 }
 0x34f   : > { %v6454_v30 = vpop.f32.mrf.mxu3 }
 0x350   : > { %v2260_v38 = vpop.f32.mrf.mxu1 }
 0x351   : > { %v2313_v58 = vadd.f32 %v2260_v38, %v7187_v44 }
 0x353   : > { %3156 = vmatmul.bf16.gmra.mxu1 %v7188_v60  ;;  %v2547_v50 = vadd.f32 %v2494_v10, %v2313_v58  ;;  %v7195_v10 = vld [vmem:[#allocation73_spill] sm:$0xff]  ;;  %v7197_v58 = vld [vmem:[#allocation80_spill] sm:$0xff] }
 0x356   : > { %v2496_v36 = vpop.f32.mrf.mxu2 }
 0x357   : > { %v2728_v47 = vpop.f32.mrf.mxu3 }
 0x358   : > { %v6463_v24 = vadd.f32 %v2728_v47, %v2547_v50  ;;  %v2262_v49 = vpop.f32.mrf.mxu1  ;;  %v6482_v50 = vpop.f32.mrf.mxu0 }
 0x359   : > { %v2314_v42 = vadd.f32 %v2262_v49, %v2079_v16 }
 0x35b   : > { %v6467_v19 = vadd.f32 %v2496_v36, %v2314_v42  ;;  %3395 = vmatmul.bf16.gmra.mxu2 %v7192_v39  ;;  %v4736_v39 = vld [vmem:[#allocation8 + $0x8] sm:$0xff] }
 0x35c   : > { %3656 = vmatpush.bf16.msrb.mxu3 %v4736_v39 }
 0x35e   : > { %v2499_v20 = vpop.f32.mrf.mxu2 }
 0x35f   : > { %v6470_v28 = vpop.f32.mrf.mxu3 }
 0x360   : > { %v2265_v9 = vpop.f32.mrf.mxu1 }
 0x361   : > { %v2315_v11 = vadd.f32 %v2265_v9, %v7193_v13  ;;  %v7202_v9 = vld [vmem:[#allocation79_spill] sm:$0xff] }
 0x363   : > { %3161 = vmatmul.bf16.gmra.mxu1 %v7194_v35  ;;  %v2549_v7 = vadd.f32 %v2499_v20, %v2315_v11  ;;  %v6490_v20 = vpop.f32.mrf.mxu0  ;;  %v7204_v11 = vld [vmem:[#allocation84_spill] sm:$0xff] }
 0x366   : > { %v2501_v17 = vpop.f32.mrf.mxu2 }
 0x367   : > { %v2733_v6 = vpop.f32.mrf.mxu3 }
 0x368   : > { %v6476_v21 = vadd.f32 %v2733_v6, %v2549_v7  ;;  %v2267_v40 = vpop.f32.mrf.mxu1  ;;  %v4744_v6 = vld [vmem:[#allocation9 + $0x8] sm:$0xff] }
 0x369   : > { %v2316_v38 = vadd.f32 %v2267_v40, %v7195_v10  ;;  %v7206_v40 = vld [vmem:[#allocation81_spill] sm:$0xff]  ;;  %3986 = vmatpush.bf16.msra.mxu0 %v4744_v6 }
 0x36b   : > { %v6479_v44 = vadd.f32 %v2501_v17, %v2316_v38  ;;  %3400 = vmatmul.bf16.gmra.mxu2 %v7197_v58  ;;  %v6499_v38 = vpop.f32.mrf.mxu0  ;;  %v7207_v58 = vld [vmem:[#allocation82_spill] sm:$0xff] }
 0x36d   : > { %7196 = vst [vmem:[#allocation46_spill] sm:$0xff] %v6479_v44 }
 0x36e   : > { %v2504_v60 = vpop.f32.mrf.mxu2 }
 0x36f   : > { %v6484_v18 = vpop.f32.mrf.mxu3 }
 0x370   : > { %7198 = vst [vmem:[#allocation47_spill] sm:$0xff] %v6484_v18  ;;  %v2270_v41 = vpop.f32.mrf.mxu1 }
 0x371   : > { %v2317_v36 = vadd.f32 %v2270_v41, %v7199_v43 }
 0x373   : > { %3166 = vmatmul.bf16.gmra.mxu1 %v7200_v48  ;;  %v2551_v16 = vadd.f32 %v2504_v60, %v2317_v36 }
 0x376   : > { %v2506_v47 = vpop.f32.mrf.mxu2 }
 0x377   : > { %v2738_v49 = vpop.f32.mrf.mxu3 }
 0x378   : > { %v6488_v33 = vadd.f32 %v2738_v49, %v2551_v16  ;;  %v2272_v42 = vpop.f32.mrf.mxu1  ;;  %v7209_v16 = vld [vmem:[#allocation83_spill] sm:$0xff] }
 0x379   : > { %v2318_v45 = vadd.f32 %v2272_v42, %v7202_v9  ;;  %v6508_v42 = vpop.f32.mrf.mxu0 }
 0x37a   : > { %7201 = vst [vmem:[#allocation48_spill] sm:$0xff] %v6488_v33  ;;  %v3283_v33 = vld [vmem:[#allocation2 + $0x112] sm:$0xff] }
 0x37b   : > { %v6493_v13 = vadd.f32 %v2506_v47, %v2318_v45  ;;  %3405 = vmatmul.bf16.gmra.mxu2 %v7204_v11  ;;  %v7212_v11 = vld [vmem:[#allocation85_spill] sm:$0xff] }
 0x37d   : > { %7203 = vst [vmem:[#allocation69_spill] sm:$0xff] %v6493_v13 }
 0x37e   : > { %v2509_v35 = vpop.f32.mrf.mxu2 }
 0x37f   : > { %v6496_v7 = vpop.f32.mrf.mxu3 }
 0x380   : > { %7205 = vst [vmem:[#allocation50_spill] sm:$0xff] %v6496_v7  ;;  %v2275_v17 = vpop.f32.mrf.mxu1 }
 0x381   : > { %v2319_v10 = vadd.f32 %v2275_v17, %v7206_v40 }
 0x383   : > { %3171 = vmatmul.bf16.gmra.mxu1 %v7207_v58  ;;  %v2553_v60 = vadd.f32 %v2509_v35, %v2319_v10  ;;  %v7213_v35 = vld [vmem:[#allocation86_spill] sm:$0xff]  ;;  %v6514_v10 = vpop.f32.mrf.mxu0 }
 0x386   : > { %v2511_v41 = vpop.f32.mrf.mxu2 }
 0x387   : > { %v2743_v43 = vpop.f32.mrf.mxu3 }
 0x388   : > { %v6502_v36 = vadd.f32 %v2743_v43, %v2553_v60  ;;  %v2277_v48 = vpop.f32.mrf.mxu1  ;;  %v4735_v43 = vld [vmem:[#allocation8] sm:$0xff] }
 0x389   : > { %v2320_v47 = vadd.f32 %v2277_v48, %v7209_v16  ;;  %3657 = vmatpush.bf16.msrb.mxu3 %v4735_v43 }
 0x38a   : > { %7208 = vst [vmem:[#allocation49_spill] sm:$0xff] %v6502_v36 }
 0x38b   : > { %v6505_v49 = vadd.f32 %v2511_v41, %v2320_v47  ;;  %3410 = vmatmul.bf16.gmra.mxu2 %v6326_v4  ;;  %v7215_v4 = vld [vmem:[#allocation87_spill] sm:$0xff] }
 0x38d   : > { %7210 = vst [vmem:[#allocation51_spill] sm:$0xff] %v6505_v49 }
 0x38e   : > { %v2514_v39 = vpop.f32.mrf.mxu2 }
 0x38f   : > { %v6510_v9 = vpop.f32.mrf.mxu3 }
 0x390   : > { %7211 = vst [vmem:[#allocation65_spill] sm:$0xff] %v6510_v9  ;;  %v2280_v45 = vpop.f32.mrf.mxu1 }
 0x391   : > { %v2321_v17 = vadd.f32 %v2280_v45, %v7212_v11 }
 0x393   : > { %3176 = vmatmul.bf16.gmra.mxu1 %v7213_v35  ;;  %v2555_v6 = vadd.f32 %v2514_v39, %v2321_v17  ;;  %v4743_v39 = vld [vmem:[#allocation9] sm:$0xff]  ;;  %v6524_v17 = vpop.f32.mrf.mxu0  ;;  %v7218_v35 = vld [vmem:[#allocation88_spill] sm:$0xff] }
 0x394   : > { %3987 = vmatpush.bf16.msra.mxu0 %v4743_v39 }
 0x396   : > { %v2516_v40 = vpop.f32.mrf.mxu2 }
 0x397   : > { %v2748_v58 = vpop.f32.mrf.mxu3 }
 0x398   : > { %v6516_v60 = vadd.f32 %v2748_v58, %v2555_v6  ;;  %v2282_v41 = vpop.f32.mrf.mxu1  ;;  %v7219_v6 = vld [vmem:[#allocation89_spill] sm:$0xff] }
 0x399   : > { %v2322_v48 = vadd.f32 %v2282_v41, %v7215_v4  ;;  %v3279_v41 = vld [vmem:[#allocation2 + $0xe2] sm:$0xff] }
 0x39a   : > { %7214 = vst [vmem:[#allocation53_spill] sm:$0xff] %v6516_v60 }
 0x39b   : > { %v6519_v16 = vadd.f32 %v2516_v40, %v2322_v48  ;;  %3415 = vmatmul.bf16.gmra.mxu2 %v6336_v15  ;;  %v3278_v15 = vld [vmem:[#allocation2 + $0xda] sm:$0xff] }
 0x39d   : > { %7216 = vst [vmem:[#allocation61_spill] sm:$0xff] %v6519_v16  ;;  %v6531_v16 = vpop.f32.mrf.mxu0 }
 0x39e   : > { %v2519_v47 = vpop.f32.mrf.mxu2 }
 0x39f   : > { %v6522_v45 = vpop.f32.mrf.mxu3 }
 0x3a0   : > { %7217 = vst [vmem:[#allocation56_spill] sm:$0xff] %v6522_v45  ;;  %v2285_v11 = vpop.f32.mrf.mxu1  ;;  %v3303_v45 = vpack.c.bf16 %v3279_v41, %v3278_v15 }
 0x3a1   : > { %v2323_v9 = vadd.f32 %v2285_v11, %v7218_v35  ;;  %v3045_v11 = vld [vmem:[#allocation2 + $0xe1] sm:$0xff] }
 0x3a3   : > { %3181 = vmatmul.bf16.gmra.mxu1 %v7219_v6  ;;  %v2557_v58 = vadd.f32 %v2519_v47, %v2323_v9  ;;  %v7223_v9 = vld [vmem:[#allocation21_spill] sm:$0xff] }
 0x3a4   : > { %v7224_v47 = vunpack.c.h.bf16 %v7223_v9 }
 0x3a5   : > { %v6544_v15 = vpop.f32.mrf.mxu0 }
 0x3a6   : > { %v2521_v60 = vpop.f32.mrf.mxu2  ;;  %v3788_v6 = vrot.slane %v7224_v47, 1 }
 0x3a7   : > { %v2753_v43 = vpop.f32.mrf.mxu3 }
 0x3a8   : > { %v6528_v40 = vadd.f32 %v2753_v43, %v2557_v58  ;;  %v2287_v4 = vpop.f32.mrf.mxu1  ;;  %v3044_v58 = vld [vmem:[#allocation2 + $0xd9] sm:$0xff] }
 0x3a9   : > { %v2324_v48 = vadd.f32 %v2287_v4, %v6334_v54  ;;  %v7225_v43 = vld [vmem:[#allocation23_spill] sm:$0xff] }
 0x3aa   : > { %7220 = vst [vmem:[#allocation55_spill] sm:$0xff] %v6528_v40  ;;  %v7226_v40 = vunpack.c.l.bf16 %v7225_v43  ;;  %v7227_v54 = vunpack.c.h.bf16 %v7225_v43 }
 0x3ab   : > { %v6533_v49 = vadd.f32 %v2521_v60, %v2324_v48  ;;  %3420 = vmatmul.bf16.gmra.mxu2 %v3303_v45  ;;  %v3069_v60 = vpack.c.bf16 %v3045_v11, %v3044_v58  ;;  %v3047_v58 = vld [vmem:[#allocation2 + $0xf9] sm:$0xff] }
 0x3ac   : > { %v3789_v7 = vrot.slane %v7226_v40, 1  ;;  %v3791_v41 = vrot.slane %v7227_v54, 1  ;;  %v3280_v54 = vld [vmem:[#allocation2 + $0xf2] sm:$0xff] }
 0x3ad   : > { %7221 = vst [vmem:[#allocation58_spill] sm:$0xff] %v6533_v49 }
 0x3ae   : > { %v2524_v39 = vpop.f32.mrf.mxu2  ;;  %v3790_v48 = vsel %vm3787_vm0, %v3788_v6, %v3789_v7  ;;  %v3792_v9 = vsel %vm3787_vm0, %v3789_v7, %v3791_v41  ;;  %v6553_v6 = vpop.f32.mrf.mxu0  ;;  %v3046_v41 = vld [vmem:[#allocation2 + $0xf1] sm:$0xff] }
 0x3af   : > { %v6535_v35 = vpop.f32.mrf.mxu3  ;;  %v3900_v49 = vpack.c.bf16 %v3792_v9, %v3790_v48  ;;  %v7232_v9 = vld [vmem:[#allocation27_spill] sm:$0xff] }
 0x3b0   : > { %7222 = vst [vmem:[#allocation71_spill] sm:$0xff] %v6535_v35  ;;  %v2290_v36 = vpop.f32.mrf.mxu1  ;;  %v3281_v35 = vld [vmem:[#allocation2 + $0xfa] sm:$0xff] }
 0x3b1   : > { %v2325_v4 = vadd.f32 %v2290_v36, %v6339_v26  ;;  %3988 = vmatmul.bf16.vlgmr.msra.gmra.mxu0 %v3900_v49  ;;  %v7229_v26 = vld [vmem:[#allocation90_spill] sm:$0xff]  ;;  %v3304_v11 = vpack.c.bf16 %v3281_v35, %v3280_v54  ;;  %v7233_v49 = vunpack.c.l.bf16 %v7232_v9  ;;  %v7234_v35 = vunpack.c.h.bf16 %v7232_v9 }
 0x3b3   : > { %3186 = vmatmul.bf16.gmra.mxu1 %v3069_v60  ;;  %v2559_v45 = vadd.f32 %v2524_v39, %v2325_v4  ;;  %v7231_v60 = vld [vmem:[#allocation52_spill] sm:$0xff] }
 0x3b4   : > { %v2998_v48 = vadd.f32 %v7231_v60, %v6349_v57 }
 0x3b6   : > { %v2526_v47 = vpop.f32.mrf.mxu2 }
 0x3b7   : > { %v2758_v13 = vpop.f32.mrf.mxu3 }
 0x3b8   : > { %v6548_v40 = vadd.f32 %v2758_v13, %v2559_v45  ;;  %v2292_v43 = vpop.f32.mrf.mxu1  ;;  %v3070_v13 = vpack.c.bf16 %v3047_v58, %v3046_v41  ;;  %v6568_v58 = vld [vmem:[%s6971_s7] ss:$0 sm:$0xff] }
 0x3b9   : > { %v2326_v36 = vadd.f32 %v2292_v43, %v7229_v26  ;;  %v7235_v43 = vld [vmem:[#allocation30_spill] sm:$0xff] }
 0x3ba   : > { %7228 = vst [vmem:[#allocation60_spill] sm:$0xff] %v6548_v40  ;;  %v3793_v40 = vrot.slane %v7233_v49, 1  ;;  %v7236_v54 = vunpack.c.l.bf16 %v7235_v43 }
 0x3bb   : > { %v6551_v39 = vadd.f32 %v2526_v47, %v2326_v36  ;;  %3425 = vmatmul.bf16.gmra.mxu2 %v3304_v11  ;;  %v3794_v47 = vrot.slane %v7234_v35, 1 }
 0x3bc   : > { %v3796_v26 = vrot.slane %v7236_v54, 1 }
 0x3bd   : > { %7230 = vst [vmem:[#allocation68_spill] sm:$0xff] %v6551_v39  ;;  %v3795_v36 = vsel %vm3787_vm0, %v3793_v40, %v3794_v47 }
 0x3be   : > { %v3386_v4 = vpop.f32.mrf.mxu2  ;;  %v3797_v11 = vsel %vm3787_vm0, %v3794_v47, %v3796_v26 }
 0x3bf   : > { %v3901_v18 = vpack.c.bf16 %v3797_v11, %v3795_v36  ;;  %v3048_v11 = vld [vmem:[#allocation2 + $0x109] sm:$0xff] }
 0x3c0   : > { %v3152_v7 = vpop.f32.mrf.mxu1 }
 0x3c1   : > { %v3232_v45 = vadd.f32 %v3152_v7, %v2998_v48  ;;  %v7237_v7 = vld [vmem:[#allocation54_spill] sm:$0xff]  ;;  %v3282_v48 = vld [vmem:[#allocation2 + $0x10a] sm:$0xff]  ;;  %3993 = vmatmul.bf16.gmra.mxu0 %v3901_v18 }
 0x3c2   : > { %v2999_v41 = vadd.f32 %v7237_v7, %v6352_v63  ;;  %v3305_v9 = vpack.c.bf16 %v3283_v33, %v3282_v48  ;;  %v7239_v7 = vld [vmem:[#allocation57_spill] sm:$0xff] }
 0x3c3   : > { %3191 = vmatmul.bf16.gmra.mxu1 %v3070_v13  ;;  %v3466_v57 = vadd.f32 %v3386_v4, %v3232_v45  ;;  %v6572_v13 = vpop.f32.mrf.mxu0  ;;  %v3049_v45 = vld [vmem:[#allocation2 + $0x111] sm:$0xff]  ;;  %v3000_v18 = vadd.f32 %v7239_v7, %v6359_v25 }
 0x3c4   : > { %7238 = vst [vmem:[#allocation64_spill] sm:$0xff] %v6572_v13  ;;  %v3071_v44 = vpack.c.bf16 %v3049_v45, %v3048_v11  ;;  %v3285_v45 = vld [vmem:[#allocation2 + $0x12a] sm:$0xff] }
 0x3c5   : > { %v3502_v49 = vadd.f32 %v6568_v58, %v3466_v57 }
 0x3c6   : > { %v3388_v39 = vpop.f32.mrf.mxu2 }
 0x3c7   : > { %v3534_v54 = vmax.f32 %v3502_v49, 0.0 }
 0x3c8   : > { %v3154_v60 = vpop.f32.mrf.mxu1 }
 0x3c9   : > { %v3233_v40 = vadd.f32 %v3154_v60, %v2999_v41  ;;  %v7241_v41 = vld [vmem:[#allocation32_spill] sm:$0xff] }
 0x3ca   : > { %v7242_v60 = vunpack.c.l.bf16 %v7241_v41 }
 0x3cb   : > { %v3467_v35 = vadd.f32 %v3388_v39, %v3233_v40  ;;  %3430 = vmatmul.bf16.gmra.mxu2 %v3305_v9  ;;  %v6578_v13 = vpop.f32.mrf.mxu0  ;;  %v7240_v39 = vunpack.c.h.bf16 %v7235_v43  ;;  %v7243_v40 = vunpack.c.h.bf16 %v7241_v41  ;;  %v3050_v41 = vld [vmem:[#allocation2 + $0x121] sm:$0xff] }
 0x3cc   : > { %v3799_v48 = vrot.slane %v7242_v60, 1  ;;  %v3051_v60 = vld [vmem:[#allocation2 + $0x129] sm:$0xff] }
 0x3cd   : > { %v3503_v4 = vadd.f32 %v6568_v58, %v3467_v35  ;;  %v3798_v57 = vrot.slane %v7240_v39, 1  ;;  %v3801_v9 = vrot.slane %v7243_v40, 1 }
 0x3ce   : > { %v3391_v47 = vpop.f32.mrf.mxu2 }
 0x3cf   : > { %v3535_v26 = vmax.f32 %v3503_v4, 0.0  ;;  %v3800_v49 = vsel %vm3787_vm0, %v3798_v57, %v3799_v48  ;;  %v3802_v35 = vsel %vm3787_vm0, %v3799_v48, %v3801_v9  ;;  %v3284_v4 = vld [vmem:[#allocation2 + $0x122] sm:$0xff] }
 0x3d0   : > { %v3157_v36 = vpop.f32.mrf.mxu1 }
 0x3d1   : > { %v3566_v63 = vpack.c.bf16 %v3535_v26, %v3534_v54  ;;  %v3234_v33 = vadd.f32 %v3157_v36, %v3000_v18  ;;  %v3902_v54 = vpack.c.bf16 %v3802_v35, %v3800_v49  ;;  %v3072_v49 = vpack.c.bf16 %v3051_v60, %v3050_v41 }
 0x3d3   : > { %3196 = vmatmul.bf16.gmra.mxu1 %v3071_v44  ;;  %3658 = vmatmul.bf16.vlgmr.msrb.gmra.mxu3 %v3566_v63  ;;  %v3468_v26 = vadd.f32 %v3391_v47, %v3234_v33  ;;  %v7244_v44 = vld [vmem:[#allocation59_spill] sm:$0xff]  ;;  %v3306_v63 = vpack.c.bf16 %v3285_v45, %v3284_v4  ;;  %v6591_v39 = vpop.f32.mrf.mxu0 }
 0x3d4   : > { %v3001_v36 = vadd.f32 %v7244_v44, %v6362_v27  ;;  %3998 = vmatmul.bf16.gmra.mxu0 %v3902_v54  ;;  %v7245_v27 = vld [vmem:[#allocation62_spill] sm:$0xff] }
 0x3d5   : > { %v3504_v7 = vadd.f32 %v6568_v58, %v3468_v26  ;;  %v3002_v9 = vadd.f32 %v7245_v27, %v6370_v22  ;;  %v3286_v22 = vld [vmem:[#allocation2 + $0x13a] sm:$0xff] }
 0x3d6   : > { %v3393_v25 = vpop.f32.mrf.mxu2 }
 0x3d7   : > { %v3536_v40 = vmax.f32 %v3504_v7, 0.0 }
 0x3d8   : > { %v3159_v43 = vpop.f32.mrf.mxu1 }
 0x3d9   : > { %v3235_v11 = vadd.f32 %v3159_v43, %v3001_v36  ;;  %v7249_v36 = vld [vmem:[#allocation34_spill] sm:$0xff] }
 0x3da   : > { %v7250_v43 = vunpack.c.l.bf16 %v7249_v36 }
 0x3db   : > { %v3469_v18 = vadd.f32 %v3393_v25, %v3235_v11  ;;  %3435 = vmatmul.bf16.gmra.mxu2 %v3306_v63  ;;  %v7246_v25 = vld [vmem:[#allocation33_spill] sm:$0xff]  ;;  %v6604_v60 = vpop.f32.mrf.mxu0 }
 0x3dc   : > { %v7247_v45 = vunpack.c.l.bf16 %v7246_v25  ;;  %v7248_v26 = vunpack.c.h.bf16 %v7246_v25  ;;  %v3806_v11 = vrot.slane %v7250_v43, 1 }
 0x3dd   : > { %v3505_v57 = vadd.f32 %v6568_v58, %v3469_v18 }
 0x3de   : > { %v3396_v48 = vpop.f32.mrf.mxu2  ;;  %v3803_v54 = vrot.slane %v7247_v45, 1  ;;  %v3804_v44 = vrot.slane %v7248_v26, 1  ;;  %v3053_v26 = vld [vmem:[#allocation2 + $0x141] sm:$0xff] }
 0x3df   : > { %v3537_v47 = vmax.f32 %v3505_v57, 0.0  ;;  %v3287_v57 = vld [vmem:[#allocation2 + $0x142] sm:$0xff] }
 0x3e0   : > { %v3162_v33 = vpop.f32.mrf.mxu1  ;;  %v3805_v63 = vsel %vm3787_vm0, %v3803_v54, %v3804_v44  ;;  %v3807_v7 = vsel %vm3787_vm0, %v3804_v44, %v3806_v11  ;;  %v3052_v54 = vld [vmem:[#allocation2 + $0x139] sm:$0xff] }
 0x3e1   : > { %v3567_v35 = vpack.c.bf16 %v3537_v47, %v3536_v40  ;;  %v3236_v4 = vadd.f32 %v3162_v33, %v3002_v9  ;;  %v3903_v41 = vpack.c.bf16 %v3807_v7, %v3805_v63  ;;  %v7251_v47 = vld [vmem:[#allocation67_spill] sm:$0xff]  ;;  %v3073_v7 = vpack.c.bf16 %v3053_v26, %v3052_v54 }
 0x3e2   : > { %v3003_v33 = vadd.f32 %v7251_v47, %v6373_v61  ;;  %v7252_v61 = vld [vmem:[#allocation72_spill] sm:$0xff] }
 0x3e3   : > { %3201 = vmatmul.bf16.gmra.mxu1 %v3072_v49  ;;  %3663 = vmatmul.bf16.gmra.mxu3 %v3567_v35  ;;  %v3470_v40 = vadd.f32 %v3396_v48, %v3236_v4  ;;  %v3307_v49 = vpack.c.bf16 %v3287_v57, %v3286_v22  ;;  %v6610_v48 = vpop.f32.mrf.mxu0  ;;  %v3004_v4 = vadd.f32 %v7252_v61, %v6381_v34  ;;  %v3288_v34 = vld [vmem:[#allocation2 + $0x152] sm:$0xff] }
 0x3e4   : > { %4003 = vmatmul.bf16.gmra.mxu0 %v3903_v41 }
 0x3e5   : > { %v3506_v35 = vadd.f32 %v6568_v58, %v3470_v40  ;;  %v7254_v40 = vld [vmem:[#allocation35_spill] sm:$0xff] }
 0x3e6   : > { %v3398_v18 = vpop.f32.mrf.mxu2  ;;  %v7255_v47 = vunpack.c.l.bf16 %v7254_v40 }
 0x3e7   : > { %v3538_v43 = vmax.f32 %v3506_v35, 0.0 }
 0x3e8   : > { %v3164_v27 = vpop.f32.mrf.mxu1 }
 0x3e9   : > { %v3237_v9 = vadd.f32 %v3164_v27, %v3003_v33  ;;  %v3809_v33 = vrot.slane %v7255_v47, 1  ;;  %v7256_v27 = vunpack.c.h.bf16 %v7254_v40  ;;  %v3055_v40 = vld [vmem:[#allocation2 + $0x159] sm:$0xff] }
 0x3eb   : > { %v3471_v25 = vadd.f32 %v3398_v18, %v3237_v9  ;;  %3440 = vmatmul.bf16.gmra.mxu2 %v3307_v49  ;;  %v7253_v18 = vunpack.c.h.bf16 %v7249_v36  ;;  %v3811_v9 = vrot.slane %v7256_v27, 1 }
 0x3ed   : > { %v3507_v45 = vadd.f32 %v6568_v58, %v3471_v25  ;;  %v3808_v57 = vrot.slane %v7253_v18, 1  ;;  %v3812_v35 = vsel %vm3787_vm0, %v3809_v33, %v3811_v9 }
 0x3ee   : > { %v3401_v44 = vpop.f32.mrf.mxu2 }
 0x3ef   : > { %v3539_v11 = vmax.f32 %v3507_v45, 0.0  ;;  %v3810_v49 = vsel %vm3787_vm0, %v3808_v57, %v3809_v33  ;;  %v3289_v45 = vld [vmem:[#allocation2 + $0x15a] sm:$0xff]  ;;  %v3054_v57 = vld [vmem:[#allocation2 + $0x151] sm:$0xff] }
 0x3f0   : > { %v3167_v63 = vpop.f32.mrf.mxu1  ;;  %v3904_v54 = vpack.c.bf16 %v3812_v35, %v3810_v49  ;;  %v3308_v61 = vpack.c.bf16 %v3289_v45, %v3288_v34  ;;  %v3074_v27 = vpack.c.bf16 %v3055_v40, %v3054_v57  ;;  %v2772_v49 = vadd.f32 %v6397_v1, %v6394_v62  ;;  %v3290_v62 = vld [vmem:[#allocation2 + $0x16a] sm:$0xff]  ;;  %v3291_v1 = vld [vmem:[#allocation2 + $0x172] sm:$0xff] }
 0x3f1   : > { %v3568_v41 = vpack.c.bf16 %v3539_v11, %v3538_v43  ;;  %v3238_v22 = vadd.f32 %v3167_v63, %v3004_v4  ;;  %v7257_v43 = vld [vmem:[#allocation75_spill] sm:$0xff]  ;;  %v6624_v4 = vpop.f32.mrf.mxu0 }
 0x3f2   : > { %v3005_v11 = vadd.f32 %v7257_v43, %v6384_v37  ;;  %v3006_v37 = vadd.f32 %v6447_v53, %v6392_v3  ;;  %v7261_v43 = vld [vmem:[#allocation37_spill] sm:$0xff] }
 0x3f3   : > { %3206 = vmatmul.bf16.gmra.mxu1 %v3073_v7  ;;  %3668 = vmatmul.bf16.gmra.mxu3 %v3568_v41  ;;  %v3472_v26 = vadd.f32 %v3401_v44, %v3238_v22 }
 0x3f4   : > { %4008 = vmatmul.bf16.gmra.mxu0 %v3904_v54 }
 0x3f5   : > { %v3508_v7 = vadd.f32 %v6568_v58, %v3472_v26 }
 0x3f6   : > { %v3403_v25 = vpop.f32.mrf.mxu2 }
 0x3f7   : > { %v3540_v33 = vmax.f32 %v3508_v7, 0.0 }
 0x3f8   : > { %v3169_v36 = vpop.f32.mrf.mxu1 }
 0x3f9   : > { %v3239_v63 = vadd.f32 %v3169_v36, %v3005_v11  ;;  %v7262_v11 = vunpack.c.l.bf16 %v7261_v43 }
 0x3fb   : > { %v3473_v41 = vadd.f32 %v3403_v25, %v3239_v63  ;;  %3445 = vmatmul.bf16.gmra.mxu2 %v3308_v61  ;;  %v7258_v25 = vld [vmem:[#allocation36_spill] sm:$0xff]  ;;  %v3816_v36 = vrot.slane %v7262_v11, 1  ;;  %v6638_v63 = vpop.f32.mrf.mxu0 }
 0x3fc   : > { %v7259_v34 = vunpack.c.l.bf16 %v7258_v25  ;;  %v7260_v54 = vunpack.c.h.bf16 %v7258_v25 }
 0x3fd   : > { %v3509_v18 = vadd.f32 %v6568_v58, %v3473_v41 }
 0x3fe   : > { %v3406_v47 = vpop.f32.mrf.mxu2  ;;  %v3813_v45 = vrot.slane %v7259_v34, 1  ;;  %v3814_v26 = vrot.slane %v7260_v54, 1 }
 0x3ff   : > { %v3541_v44 = vmax.f32 %v3509_v18, 0.0  ;;  %v3007_v18 = vadd.f32 %v6456_v56, %v2772_v49  ;;  %v3008_v56 = vadd.f32 %v6465_v52, %v6405_v0 }
 0x400   : > { %v3172_v22 = vpop.f32.mrf.mxu1  ;;  %v3815_v3 = vsel %vm3787_vm0, %v3813_v45, %v3814_v26  ;;  %v3817_v53 = vsel %vm3787_vm0, %v3814_v26, %v3816_v36  ;;  %v2774_v26 = vadd.f32 %v6410_v46, %v6407_v14  ;;  %v7263_v36 = vunpack.c.h.bf16 %v7261_v43 }
 0x401   : > { %v3569_v9 = vpack.c.bf16 %v3541_v44, %v3540_v33  ;;  %v3240_v35 = vadd.f32 %v3172_v22, %v3006_v37  ;;  %v3905_v7 = vpack.c.bf16 %v3817_v53, %v3815_v3  ;;  %v3309_v33 = vpack.c.bf16 %v3291_v1, %v3290_v62  ;;  %v7264_v53 = vld [vmem:[#allocation38_spill] sm:$0xff] }
 0x402   : > { %v3818_v3 = vrot.slane %v7263_v36, 1  ;;  %v7266_v1 = vunpack.c.h.bf16 %v7264_v53  ;;  %v3009_v14 = vadd.f32 %v6474_v12, %v2774_v26  ;;  %v7270_v36 = vld [vmem:[#allocation40_spill] sm:$0xff] }
 0x403   : > { %3211 = vmatmul.bf16.gmra.mxu1 %v3074_v27  ;;  %3673 = vmatmul.bf16.gmra.mxu3 %v3569_v9  ;;  %v3474_v41 = vadd.f32 %v3406_v47, %v3240_v35  ;;  %v3056_v27 = vld [vmem:[#allocation2 + $0x169] sm:$0xff]  ;;  %v3057_v9 = vld [vmem:[#allocation2 + $0x171] sm:$0xff]  ;;  %v6645_v34 = vpop.f32.mrf.mxu0 }
 0x404   : > { %4013 = vmatmul.bf16.gmra.mxu0 %v3905_v7  ;;  %v3075_v49 = vpack.c.bf16 %v3057_v9, %v3056_v27  ;;  %v3821_v7 = vrot.slane %v7266_v1, 1 }
 0x405   : > { %v3510_v44 = vadd.f32 %v6568_v58, %v3474_v41 }
 0x406   : > { %v3408_v61 = vpop.f32.mrf.mxu2 }
 0x407   : > { %v3542_v45 = vmax.f32 %v3510_v44, 0.0 }
 0x408   : > { %v3174_v57 = vpop.f32.mrf.mxu1 }
 0x409   : > { %v3241_v40 = vadd.f32 %v3174_v57, %v3007_v18 }
 0x40b   : > { %v3475_v22 = vadd.f32 %v3408_v61, %v3241_v40  ;;  %3450 = vmatmul.bf16.gmra.mxu2 %v3309_v33  ;;  %v7265_v61 = vunpack.c.l.bf16 %v7264_v53  ;;  %v6660_v40 = vpop.f32.mrf.mxu0 }
 0x40d   : > { %v3511_v37 = vadd.f32 %v6568_v58, %v3475_v22  ;;  %v3819_v62 = vrot.slane %v7265_v61, 1  ;;  %v3295_v61 = vld [vmem:[#allocation2 + $0x1a2] sm:$0xff] }
 0x40e   : > { %v3411_v25 = vpop.f32.mrf.mxu2 }
 0x40f   : > { %v3543_v54 = vmax.f32 %v3511_v37, 0.0  ;;  %v3820_v41 = vsel %vm3787_vm0, %v3818_v3, %v3819_v62  ;;  %v3822_v0 = vsel %vm3787_vm0, %v3819_v62, %v3821_v7  ;;  %v7271_v3 = vunpack.c.l.bf16 %v7270_v36 }
 0x410   : > { %v3177_v47 = vpop.f32.mrf.mxu1  ;;  %v3906_v18 = vpack.c.bf16 %v3822_v0, %v3820_v41 }
 0x411   : > { %v3570_v35 = vpack.c.bf16 %v3543_v54, %v3542_v45  ;;  %v3242_v11 = vadd.f32 %v3177_v47, %v3008_v56  ;;  %v2776_v54 = vadd.f32 %v6425_v5, %v6422_v23  ;;  %v3826_v53 = vrot.slane %v7271_v3, 1  ;;  %v3294_v5 = vld [vmem:[#allocation2 + $0x19a] sm:$0xff] }
 0x412   : > { %v3311_v0 = vpack.c.bf16 %v3295_v61, %v3294_v5 }
 0x413   : > { %3216 = vmatmul.bf16.gmra.mxu1 %v3075_v49  ;;  %3678 = vmatmul.bf16.gmra.mxu3 %v3570_v35  ;;  %v3476_v57 = vadd.f32 %v3411_v25, %v3242_v11  ;;  %v3010_v25 = vadd.f32 %v6482_v50, %v6418_v32  ;;  %v6669_v47 = vpop.f32.mrf.mxu0 }
 0x414   : > { %4018 = vmatmul.bf16.gmra.mxu0 %v3906_v18 }
 0x415   : > { %v3512_v33 = vadd.f32 %v6568_v58, %v3476_v57 }
 0x416   : > { %v3413_v52 = vpop.f32.mrf.mxu2 }
 0x417   : > { %v3544_v27 = vmax.f32 %v3512_v33, 0.0 }
 0x418   : > { %v3179_v46 = vpop.f32.mrf.mxu1 }
 0x419   : > { %v3243_v43 = vadd.f32 %v3179_v46, %v3009_v14  ;;  %v3060_v46 = vld [vmem:[#allocation2 + $0x199] sm:$0xff] }
 0x41b   : > { %v3477_v44 = vadd.f32 %v3413_v52, %v3243_v43  ;;  %3455 = vmatmul.bf16.gmra.mxu2 %v6428_v59  ;;  %v7267_v59 = vld [vmem:[#allocation39_spill] sm:$0xff]  ;;  %v6682_v57 = vpop.f32.mrf.mxu0 }
 0x41c   : > { %v7268_v49 = vunpack.c.l.bf16 %v7267_v59  ;;  %v7269_v26 = vunpack.c.h.bf16 %v7267_v59  ;;  %v3061_v43 = vld [vmem:[#allocation2 + $0x1a1] sm:$0xff] }
 0x41d   : > { %v3513_v22 = vadd.f32 %v6568_v58, %v3477_v44 }
 0x41e   : > { %v3416_v37 = vpop.f32.mrf.mxu2  ;;  %v3823_v35 = vrot.slane %v7268_v49, 1  ;;  %v3824_v11 = vrot.slane %v7269_v26, 1 }
 0x41f   : > { %v3545_v9 = vmax.f32 %v3513_v22, 0.0 }
 0x420   : > { %v3182_v45 = vpop.f32.mrf.mxu1  ;;  %v3825_v32 = vsel %vm3787_vm0, %v3823_v35, %v3824_v11  ;;  %v3827_v50 = vsel %vm3787_vm0, %v3824_v11, %v3826_v53 }
 0x421   : > { %v3571_v12 = vpack.c.bf16 %v3545_v9, %v3544_v27  ;;  %v3244_v56 = vadd.f32 %v3182_v45, %v3010_v25  ;;  %v3907_v62 = vpack.c.bf16 %v3827_v50, %v3825_v32  ;;  %v3077_v27 = vpack.c.bf16 %v3061_v43, %v3060_v46 }
 0x422   : > { %v2778_v45 = vadd.f32 %v6440_v55, %v6437_v51 }
 0x423   : > { %3221 = vmatmul.bf16.gmra.mxu1 %v6420_v2  ;;  %3683 = vmatmul.bf16.gmra.mxu3 %v3571_v12  ;;  %v3478_v1 = vadd.f32 %v3416_v37, %v3244_v56  ;;  %v3011_v2 = vadd.f32 %v6490_v20, %v2776_v54  ;;  %v3012_v20 = vadd.f32 %v6499_v38, %v6435_v8  ;;  %v7272_v12 = vunpack.c.h.bf16 %v7270_v36  ;;  %v7273_v56 = vld [vmem:[#allocation41_spill] sm:$0xff] }
 0x424   : > { %4023 = vmatmul.bf16.gmra.mxu0 %v3907_v62  ;;  %v7274_v59 = vunpack.c.l.bf16 %v7273_v56  ;;  %v7275_v35 = vunpack.c.h.bf16 %v7273_v56  ;;  %v3013_v53 = vadd.f32 %v6508_v42, %v2778_v45  ;;  %v2780_v42 = vadd.f32 %v6454_v30, %v6451_v31 }
 0x425   : > { %v3514_v52 = vadd.f32 %v6568_v58, %v3478_v1  ;;  %v3828_v54 = vrot.slane %v7272_v12, 1 }
 0x426   : > { %v3418_v23 = vpop.f32.mrf.mxu2  ;;  %v3829_v49 = vrot.slane %v7274_v59, 1  ;;  %v3831_v26 = vrot.slane %v7275_v35, 1  ;;  %v3015_v30 = vadd.f32 %v6524_v17, %v2780_v42  ;;  %v3016_v17 = vadd.f32 %v6531_v16, %v6463_v24 }
 0x427   : > { %v3546_v44 = vmax.f32 %v3514_v52, 0.0 }
 0x428   : > { %v3184_v7 = vpop.f32.mrf.mxu1  ;;  %v3830_v8 = vsel %vm3787_vm0, %v3828_v54, %v3829_v49  ;;  %v3832_v38 = vsel %vm3787_vm0, %v3829_v49, %v3831_v26  ;;  %v6723_v49 = vpop.f32.mrf.mxu3 }
 0x429   : > { %v3245_v41 = vadd.f32 %v3184_v7, %v3011_v2  ;;  %v3908_v51 = vpack.c.bf16 %v3832_v38, %v3830_v8 }
 0x42b   : > { %v3479_v18 = vadd.f32 %v3418_v23, %v3245_v41  ;;  %3460 = vmatmul.bf16.gmra.mxu2 %v3311_v0  ;;  %v3014_v41 = vadd.f32 %v6514_v10, %v6449_v29 }
 0x42d   : > { %v3515_v14 = vadd.f32 %v6568_v58, %v3479_v18  ;;  %v7276_v18 = vld [vmem:[#allocation42_spill] sm:$0xff] }
 0x42e   : > { %v3421_v33 = vpop.f32.mrf.mxu2  ;;  %v6695_v11 = vpop.f32.mrf.mxu0  ;;  %v7278_v43 = vunpack.c.h.bf16 %v7276_v18 }
 0x42f   : > { %v3547_v22 = vmax.f32 %v3515_v14, 0.0  ;;  %v7277_v14 = vunpack.c.l.bf16 %v7276_v18 }
 0x430   : > { %v3187_v37 = vpop.f32.mrf.mxu1 }
 0x431   : > { %v3572_v9 = vpack.c.bf16 %v3547_v22, %v3546_v44  ;;  %v3246_v25 = vadd.f32 %v3187_v37, %v3012_v20  ;;  %v3833_v46 = vrot.slane %v7277_v14, 1  ;;  %v7279_v44 = vld [vmem:[#allocation43_spill] sm:$0xff] }
 0x432   : > { %v7280_v22 = vunpack.c.l.bf16 %v7279_v44 }
 0x433   : > { %3226 = vmatmul.bf16.gmra.mxu1 %v3077_v27  ;;  %3688 = vmatmul.bf16.gmra.mxu3 %v3572_v9  ;;  %v3480_v55 = vadd.f32 %v3421_v33, %v3246_v25  ;;  %v3834_v33 = vrot.slane %v7278_v43, 1 }
 0x434   : > { %4028 = vmatmul.bf16.gmra.mxu0 %v3908_v51  ;;  %v3836_v37 = vrot.slane %v7280_v22, 1  ;;  %v2782_v51 = vadd.f32 %v6470_v28, %v6467_v19 }
 0x435   : > { %v3516_v50 = vadd.f32 %v6568_v58, %v3480_v55  ;;  %v3835_v27 = vsel %vm3787_vm0, %v3833_v46, %v3834_v33 }
 0x436   : > { %v3423_v3 = vpop.f32.mrf.mxu2  ;;  %v6702_v61 = vpop.f32.mrf.mxu0  ;;  %v3837_v29 = vsel %vm3787_vm0, %v3834_v33, %v3836_v37 }
 0x437   : > { %v3548_v1 = vmax.f32 %v3516_v50, 0.0  ;;  %v3909_v9 = vpack.c.bf16 %v3837_v29, %v3835_v27  ;;  %v7282_v50 = vld [vmem:[#allocation44_spill] sm:$0xff] }
 0x438   : > { %v3189_v32 = vpop.f32.mrf.mxu1  ;;  %v7284_v24 = vunpack.c.h.bf16 %v7282_v50 }
 0x439   : > { %v3247_v36 = vadd.f32 %v3189_v32, %v3013_v53  ;;  %v6733_v53 = vld [vmem:[%s6973_s9] ss:$0 sm:$0xff]  ;;  %v7281_v32 = vunpack.c.h.bf16 %v7279_v44 }
 0x43a   : > { %v3841_v16 = vrot.slane %v7284_v24, 1 }
 0x43b   : > { %v3481_v23 = vadd.f32 %v3423_v3, %v3247_v36  ;;  %v3838_v36 = vrot.slane %v7281_v32, 1 }
 0x43d   : > { %v3517_v5 = vadd.f32 %v6568_v58, %v3481_v23  ;;  %v7283_v23 = vunpack.c.l.bf16 %v7282_v50  ;;  %v7292_v50 = vld [vmem:[#allocation64_spill] sm:$0xff] }
 0x43e   : > { %v3426_v62 = vpop.f32.mrf.mxu2  ;;  %v6714_v20 = vpop.f32.mrf.mxu0 }
 0x43f   : > { %v3549_v2 = vmax.f32 %v3517_v5, 0.0  ;;  %v3839_v5 = vrot.slane %v7283_v23, 1 }
 0x440   : > { %v3192_v7 = vpop.f32.mrf.mxu1 }
 0x441   : > { %v3573_v0 = vpack.c.bf16 %v3549_v2, %v3548_v1  ;;  %v3248_v52 = vadd.f32 %v3192_v7, %v3014_v41  ;;  %v3840_v28 = vsel %vm3787_vm0, %v3838_v36, %v3839_v5 }
 0x443   : > { %3693 = vmatmul.bf16.gmra.mxu3 %v3573_v0  ;;  %v3482_v31 = vadd.f32 %v3426_v62, %v3248_v52  ;;  %v3842_v62 = vsel %vm3787_vm0, %v3839_v5, %v3841_v16  ;;  %v3017_v0 = vadd.f32 %v6544_v15, %v2782_v51 }
 0x444   : > { %4033 = vmatmul.bf16.gmra.mxu0 %v3909_v9  ;;  %v3910_v7 = vpack.c.bf16 %v3842_v62, %v3840_v28 }
 0x445   : > { %v3518_v12 = vadd.f32 %v6568_v58, %v3482_v31 }
 0x446   : > { %v3428_v10 = vpop.f32.mrf.mxu2  ;;  %v6721_v59 = vpop.f32.mrf.mxu0 }
 0x447   : > { %v3550_v26 = vmax.f32 %v3518_v12, 0.0 }
 0x448   : > { %v3194_v45 = vpop.f32.mrf.mxu1 }
 0x449   : > { %v3249_v25 = vadd.f32 %v3194_v45, %v3015_v30  ;;  %v7285_v30 = vld [vmem:[#allocation46_spill] sm:$0xff]  ;;  %v7286_v45 = vld [vmem:[#allocation47_spill] sm:$0xff] }
 0x44b   : > { %v3483_v54 = vadd.f32 %v3428_v10, %v3249_v25  ;;  %v2784_v25 = vadd.f32 %v7286_v45, %v7285_v30 }
 0x44d   : > { %v3519_v56 = vadd.f32 %v6568_v58, %v3483_v54  ;;  %v7287_v54 = vld [vmem:[#allocation45_spill] sm:$0xff]  ;;  %v3019_v23 = vadd.f32 %v7292_v50, %v2784_v25 }
 0x44e   : > { %v3431_v35 = vpop.f32.mrf.mxu2 }
 0x44f   : > { %v3551_v8 = vmax.f32 %v3519_v56, 0.0  ;;  %v7288_v56 = vunpack.c.l.bf16 %v7287_v54 }
 0x450   : > { %v3197_v38 = vpop.f32.mrf.mxu1 }
 0x451   : > { %v3574_v3 = vpack.c.bf16 %v3551_v8, %v3550_v26  ;;  %v3250_v55 = vadd.f32 %v3197_v38, %v3016_v17  ;;  %v6743_v19 = vpop.f32.mrf.mxu0  ;;  %v7289_v26 = vunpack.c.h.bf16 %v7287_v54  ;;  %v7290_v38 = vld [vmem:[#allocation24_spill] sm:$0xff] }
 0x452   : > { %v7291_v17 = vunpack.c.l.bf16 %v7290_v38 }
 0x453   : > { %3698 = vmatmul.bf16.gmra.mxu3 %v3574_v3  ;;  %v3484_v41 = vadd.f32 %v3431_v35, %v3250_v55  ;;  %v3843_v35 = vrot.slane %v7288_v56, 1  ;;  %v3844_v8 = vrot.slane %v7289_v26, 1 }
 0x454   : > { %4038 = vmatmul.bf16.gmra.mxu0 %v3910_v7  ;;  %v3846_v3 = vrot.slane %v7291_v17, 1 }
 0x455   : > { %v3520_v46 = vadd.f32 %v6568_v58, %v3484_v41 }
 0x456   : > { %v3659_v1 = vpop.f32.mrf.mxu3  ;;  %v3433_v2 = vpop.f32.mrf.mxu2 }
 0x457   : > { %v3660_v42 = vadd.f32 %v6733_v53, %v3659_v1  ;;  %v3552_v37 = vmax.f32 %v3520_v46, 0.0  ;;  %v7293_v46 = vld [vmem:[#allocation48_spill] sm:$0xff] }
 0x458   : > { %v3199_v52 = vpop.f32.mrf.mxu1 }
 0x459   : > { %v3251_v18 = vadd.f32 %v3199_v52, %v3017_v0  ;;  %v4069_v14 = vadd.f32 %v6695_v11, %v3660_v42  ;;  %v6755_v44 = vpop.f32.mrf.mxu0  ;;  %v3018_v11 = vadd.f32 %v6553_v6, %v6476_v21  ;;  %v3845_v6 = vsel %vm3787_vm0, %v3843_v35, %v3844_v8 }
 0x45b   : > { %4101 = vst [vmem:[%s6751_s17] sm:$0xff] %v4069_v14  ;;  %v3485_v43 = vadd.f32 %v3433_v2, %v3251_v18 }
 0x45d   : > { %v3521_v33 = vadd.f32 %v6568_v58, %v3485_v43  ;;  %v3020_v43 = vadd.f32 %v6578_v13, %v7293_v46  ;;  %v7306_v46 = vld [vmem:[#allocation25_spill] sm:$0xff] }
 0x45e   : > { %v3661_v15 = vpop.f32.mrf.mxu3  ;;  %v3436_v22 = vpop.f32.mrf.mxu2 }
 0x45f   : > { %v3553_v27 = vmax.f32 %v3521_v33, 0.0  ;;  %v3662_v29 = vadd.f32 %v6733_v53, %v3661_v15  ;;  %v7294_v15 = vld [vmem:[#allocation69_spill] sm:$0xff] }
 0x460   : > { %v3202_v10 = vpop.f32.mrf.mxu1 }
 0x461   : > { %v4070_v9 = vadd.f32 %v6702_v61, %v3662_v29  ;;  %v3575_v31 = vpack.c.bf16 %v3553_v27, %v3552_v37  ;;  %v3252_v12 = vadd.f32 %v3202_v10, %v3018_v11  ;;  %v6770_v21 = vpop.f32.mrf.mxu0  ;;  %v3847_v61 = vsel %vm3787_vm0, %v3844_v8, %v3846_v3  ;;  %v7297_v11 = vld [vmem:[#allocation28_spill] sm:$0xff] }
 0x462   : > { %v3911_v32 = vpack.c.bf16 %v3847_v61, %v3845_v6  ;;  %v7296_v29 = vunpack.c.h.bf16 %v7290_v38  ;;  %v7299_v30 = vunpack.c.h.bf16 %v7297_v11 }
 0x463   : > { %4102 = vst [vmem:[%s6751_s17 + $0x8] sm:$0xff] %v4070_v9  ;;  %3703 = vmatmul.bf16.gmra.mxu3 %v3575_v31  ;;  %v3486_v36 = vadd.f32 %v3436_v22, %v3252_v12  ;;  %v7295_v22 = vld [vmem:[#allocation50_spill] sm:$0xff]  ;;  %v7298_v9 = vunpack.c.l.bf16 %v7297_v11 }
 0x464   : > { %4043 = vmatmul.bf16.gmra.mxu0 %v3911_v32  ;;  %v2786_v37 = vadd.f32 %v7295_v22, %v7294_v15  ;;  %v3848_v10 = vrot.slane %v7296_v29, 1  ;;  %v3851_v45 = vrot.slane %v7299_v30, 1 }
 0x465   : > { %v3522_v62 = vadd.f32 %v6568_v58, %v3486_v36  ;;  %v3849_v31 = vrot.slane %v7298_v9, 1 }
 0x466   : > { %v3664_v51 = vpop.f32.mrf.mxu3  ;;  %v3438_v55 = vpop.f32.mrf.mxu2  ;;  %v3021_v26 = vadd.f32 %v6591_v39, %v2786_v37 }
 0x467   : > { %v3665_v5 = vadd.f32 %v6733_v53, %v3664_v51  ;;  %v3554_v42 = vmax.f32 %v3522_v62, 0.0  ;;  %v3852_v25 = vsel %vm3787_vm0, %v3849_v31, %v3851_v45  ;;  %v7301_v62 = vld [vmem:[#allocation51_spill] sm:$0xff] }
 0x468   : > { %v3204_v24 = vpop.f32.mrf.mxu1 }
 0x469   : > { %v3253_v16 = vadd.f32 %v3204_v24, %v3019_v23  ;;  %v4071_v28 = vadd.f32 %v6714_v20, %v3665_v5  ;;  %v6780_v7 = vpop.f32.mrf.mxu0  ;;  %v7300_v24 = vld [vmem:[#allocation49_spill] sm:$0xff] }
 0x46b   : > { %4103 = vst [vmem:[%s6751_s17 + $0x10] sm:$0xff] %v4071_v28  ;;  %v3487_v1 = vadd.f32 %v3438_v55, %v3253_v16  ;;  %v3022_v16 = vadd.f32 %v6604_v60, %v7300_v24 }
 0x46d   : > { %v3523_v2 = vadd.f32 %v6568_v58, %v3487_v1  ;;  %v7302_v1 = vld [vmem:[#allocation65_spill] sm:$0xff] }
 0x46e   : > { %v3666_v41 = vpop.f32.mrf.mxu3  ;;  %v3441_v0 = vpop.f32.mrf.mxu2 }
 0x46f   : > { %v3555_v52 = vmax.f32 %v3523_v2, 0.0  ;;  %v3667_v18 = vadd.f32 %v6733_v53, %v3666_v41  ;;  %v2788_v2 = vadd.f32 %v7302_v1, %v7301_v62 }
 0x470   : > { %v3207_v14 = vpop.f32.mrf.mxu1 }
 0x471   : > { %v4072_v20 = vadd.f32 %v6721_v59, %v3667_v18  ;;  %v3576_v33 = vpack.c.bf16 %v3555_v52, %v3554_v42  ;;  %v3254_v27 = vadd.f32 %v3207_v14, %v3020_v43  ;;  %v6795_v13 = vpop.f32.mrf.mxu0  ;;  %v3850_v59 = vsel %vm3787_vm0, %v3848_v10, %v3849_v31 }
 0x472   : > { %v3912_v56 = vpack.c.bf16 %v3852_v25, %v3850_v59  ;;  %v7307_v43 = vunpack.c.l.bf16 %v7306_v46  ;;  %v3023_v29 = vadd.f32 %v6610_v48, %v2788_v2 }
 0x473   : > { %4104 = vst [vmem:[%s6751_s17 + $0x18] sm:$0xff] %v4072_v20  ;;  %3708 = vmatmul.bf16.gmra.mxu3 %v3576_v33  ;;  %v3488_v35 = vadd.f32 %v3441_v0, %v3254_v27  ;;  %v7303_v0 = vld [vmem:[#allocation31_spill] sm:$0xff] }
 0x474   : > { %4048 = vmatmul.bf16.gmra.mxu0 %v3912_v56  ;;  %v7304_v42 = vunpack.c.l.bf16 %v7303_v0  ;;  %v7305_v18 = vunpack.c.h.bf16 %v7303_v0  ;;  %v3856_v20 = vrot.slane %v7307_v43, 1 }
 0x475   : > { %v3524_v6 = vadd.f32 %v6568_v58, %v3488_v35 }
 0x476   : > { %v3669_v12 = vpop.f32.mrf.mxu3  ;;  %v3443_v54 = vpop.f32.mrf.mxu2  ;;  %v3853_v52 = vrot.slane %v7304_v42, 1  ;;  %v3854_v14 = vrot.slane %v7305_v18, 1 }
 0x477   : > { %v3670_v8 = vadd.f32 %v6733_v53, %v3669_v12  ;;  %v3556_v50 = vmax.f32 %v3524_v6, 0.0  ;;  %v7310_v6 = vld [vmem:[#allocation56_spill] sm:$0xff] }
 0x478   : > { %v3209_v38 = vpop.f32.mrf.mxu1  ;;  %v3857_v33 = vsel %vm3787_vm0, %v3854_v14, %v3856_v20 }
 0x479   : > { %v3255_v17 = vadd.f32 %v3209_v38, %v3021_v26  ;;  %v4073_v3 = vadd.f32 %v6743_v19, %v3670_v8  ;;  %v6805_v55 = vpop.f32.mrf.mxu0  ;;  %v7308_v8 = vld [vmem:[#allocation53_spill] sm:$0xff] }
 0x47a   : > { %v3024_v38 = vadd.f32 %v6624_v4, %v7308_v8 }
 0x47b   : > { %4105 = vst [vmem:[%s6751_s17 + $0x20] sm:$0xff] %v4073_v3  ;;  %v3489_v61 = vadd.f32 %v3443_v54, %v3255_v17  ;;  %v7309_v3 = vld [vmem:[#allocation61_spill] sm:$0xff] }
 0x47d   : > { %v3525_v51 = vadd.f32 %v6568_v58, %v3489_v61  ;;  %v2790_v61 = vadd.f32 %v7310_v6, %v7309_v3 }
 0x47e   : > { %v3671_v32 = vpop.f32.mrf.mxu3  ;;  %v3446_v36 = vpop.f32.mrf.mxu2 }
 0x47f   : > { %v3557_v39 = vmax.f32 %v3525_v51, 0.0  ;;  %v3672_v23 = vadd.f32 %v6733_v53, %v3671_v32  ;;  %v7311_v32 = vunpack.c.h.bf16 %v7306_v46  ;;  %v3025_v2 = vadd.f32 %v6638_v63, %v2790_v61 }
 0x480   : > { %v3212_v5 = vpop.f32.mrf.mxu1 }
 0x481   : > { %v4074_v19 = vadd.f32 %v6755_v44, %v3672_v23  ;;  %v3577_v28 = vpack.c.bf16 %v3557_v39, %v3556_v50  ;;  %v3256_v41 = vadd.f32 %v3212_v5, %v3022_v16  ;;  %v6820_v60 = vpop.f32.mrf.mxu0  ;;  %v3855_v44 = vsel %vm3787_vm0, %v3853_v52, %v3854_v14  ;;  %v7312_v50 = vld [vmem:[#allocation29_spill] sm:$0xff] }
 0x482   : > { %v3913_v37 = vpack.c.bf16 %v3857_v33, %v3855_v44  ;;  %v7313_v39 = vunpack.c.l.bf16 %v7312_v50  ;;  %v7314_v5 = vunpack.c.h.bf16 %v7312_v50 }
 0x483   : > { %4106 = vst [vmem:[%s6751_s17 + $0x28] sm:$0xff] %v4074_v19  ;;  %3713 = vmatmul.bf16.gmra.mxu3 %v3577_v28  ;;  %v3490_v27 = vadd.f32 %v3446_v36, %v3256_v41  ;;  %v3858_v36 = vrot.slane %v7311_v32, 1 }
 0x484   : > { %4053 = vmatmul.bf16.gmra.mxu0 %v3913_v37  ;;  %v3859_v23 = vrot.slane %v7313_v39, 1  ;;  %v3861_v24 = vrot.slane %v7314_v5, 1  ;;  %v7315_v37 = vld [vmem:[#allocation55_spill] sm:$0xff] }
 0x485   : > { %v3526_v30 = vadd.f32 %v6568_v58, %v3490_v27  ;;  %v3026_v27 = vadd.f32 %v6645_v34, %v7315_v37 }
 0x486   : > { %v3674_v15 = vpop.f32.mrf.mxu3  ;;  %v3448_v22 = vpop.f32.mrf.mxu2  ;;  %v3862_v16 = vsel %vm3787_vm0, %v3859_v23, %v3861_v24 }
 0x487   : > { %v3675_v10 = vadd.f32 %v6733_v53, %v3674_v15  ;;  %v3558_v56 = vmax.f32 %v3526_v30, 0.0  ;;  %v7318_v30 = vld [vmem:[#allocation22_spill] sm:$0xff] }
 0x488   : > { %v3214_v11 = vpop.f32.mrf.mxu1 }
 0x489   : > { %v3257_v9 = vadd.f32 %v3214_v11, %v3023_v29  ;;  %v4075_v31 = vadd.f32 %v6770_v21, %v3675_v10  ;;  %v6830_v25 = vpop.f32.mrf.mxu0  ;;  %v7316_v10 = vld [vmem:[#allocation58_spill] sm:$0xff]  ;;  %v7317_v11 = vld [vmem:[#allocation71_spill] sm:$0xff] }
 0x48b   : > { %4107 = vst [vmem:[%s6751_s17 + $0x30] sm:$0xff] %v4075_v31  ;;  %v3491_v45 = vadd.f32 %v3448_v22, %v3257_v9  ;;  %v2792_v9 = vadd.f32 %v7317_v11, %v7316_v10 }
 0x48d   : > { %v3527_v59 = vadd.f32 %v6568_v58, %v3491_v45  ;;  %v7319_v45 = vunpack.c.l.bf16 %v7318_v30  ;;  %v3027_v3 = vadd.f32 %v6660_v40, %v2792_v9 }
 0x48e   : > { %v3676_v12 = vpop.f32.mrf.mxu3  ;;  %v3451_v54 = vpop.f32.mrf.mxu2 }
 0x48f   : > { %v3559_v48 = vmax.f32 %v3527_v59, 0.0  ;;  %v3677_v35 = vadd.f32 %v6733_v53, %v3676_v12  ;;  %v3863_v59 = vrot.slane %v7319_v45, 1  ;;  %v7320_v12 = vunpack.c.h.bf16 %v7318_v30 }
 0x490   : > { %v3217_v26 = vpop.f32.mrf.mxu1 }
 0x491   : > { %v4076_v21 = vadd.f32 %v6780_v7, %v3677_v35  ;;  %v3578_v17 = vpack.c.bf16 %v3559_v48, %v3558_v56  ;;  %v3258_v51 = vadd.f32 %v3217_v26, %v3024_v38  ;;  %v6845_v4 = vpop.f32.mrf.mxu0  ;;  %v3860_v7 = vsel %vm3787_vm0, %v3858_v36, %v3859_v23  ;;  %v7321_v56 = vld [vmem:[#allocation26_spill] sm:$0xff] }
 0x492   : > { %v3914_v62 = vpack.c.bf16 %v3862_v16, %v3860_v7  ;;  %v7322_v48 = vunpack.c.l.bf16 %v7321_v56 }
 0x493   : > { %4108 = vst [vmem:[%s6751_s17 + $0x38] sm:$0xff] %v4076_v21  ;;  %3718 = vmatmul.bf16.gmra.mxu3 %v3578_v17  ;;  %v3492_v1 = vadd.f32 %v3451_v54, %v3258_v51  ;;  %v3864_v54 = vrot.slane %v7320_v12, 1 }
 0x494   : > { %4058 = vmatmul.bf16.gmra.mxu0 %v3914_v62  ;;  %v3866_v35 = vrot.slane %v7322_v48, 1 }
 0x495   : > { %v3528_v18 = vadd.f32 %v6568_v58, %v3492_v1 }
 0x496   : > { %v3679_v19 = vpop.f32.mrf.mxu3  ;;  %v3453_v28 = vpop.f32.mrf.mxu2  ;;  %v3867_v26 = vsel %vm3787_vm0, %v3864_v54, %v3866_v35 }
 0x497   : > { %v3680_v41 = vadd.f32 %v6733_v53, %v3679_v19  ;;  %v3560_v33 = vmax.f32 %v3528_v18, 0.0 }
 0x498   : > { %v3219_v0 = vpop.f32.mrf.mxu1 }
 0x499   : > { %v3259_v42 = vadd.f32 %v3219_v0, %v3025_v2  ;;  %v4077_v52 = vadd.f32 %v6795_v13, %v3680_v41  ;;  %v6855_v43 = vpop.f32.mrf.mxu0  ;;  %v7324_v2 = vld [vmem:[#allocation68_spill] sm:$0xff] }
 0x49a   : > { %v2794_v41 = vadd.f32 %v6723_v49, %v7324_v2 }
 0x49b   : > { %4109 = vst [vmem:[%s6751_s17 + $0x40] sm:$0xff] %v4077_v52  ;;  %v3493_v14 = vadd.f32 %v3453_v28, %v3259_v42  ;;  %v7323_v28 = vld [vmem:[#allocation60_spill] sm:$0xff] }
 0x49c   : > { %v3028_v62 = vadd.f32 %v6669_v47, %v7323_v28  ;;  %v3029_v18 = vadd.f32 %v6682_v57, %v2794_v41 }
 0x49d   : > { %v3529_v46 = vadd.f32 %v6568_v58, %v3493_v14 }
 0x49e   : > { %v3681_v20 = vpop.f32.mrf.mxu3  ;;  %v3456_v44 = vpop.f32.mrf.mxu2 }
 0x49f   : > { %v3561_v63 = vmax.f32 %v3529_v46, 0.0  ;;  %v3682_v15 = vadd.f32 %v6733_v53, %v3681_v20 }
 0x4a0   : > { %v3222_v22 = vpop.f32.mrf.mxu1 }
 0x4a1   : > { %v4078_v13 = vadd.f32 %v6805_v55, %v3682_v15  ;;  %v3579_v29 = vpack.c.bf16 %v3561_v63, %v3560_v33  ;;  %v3260_v31 = vadd.f32 %v3222_v22, %v3026_v27  ;;  %v4024_v34 = vpop.f32.mrf.mxu0  ;;  %v3865_v55 = vsel %vm3787_vm0, %v3863_v59, %v3864_v54 }
 0x4a2   : > { %v3915_v21 = vpack.c.bf16 %v3867_v26, %v3865_v55 }
 0x4a3   : > { %4110 = vst [vmem:[%s6751_s17 + $0x48] sm:$0xff] %v4078_v13  ;;  %3723 = vmatmul.bf16.gmra.mxu3 %v3579_v29  ;;  %v3494_v17 = vadd.f32 %v3456_v44, %v3260_v31 }
 0x4a4   : > { %4063 = vmatmul.bf16.gmra.mxu0 %v3915_v21 }
 0x4a5   : > { %v3530_v36 = vadd.f32 %v6568_v58, %v3494_v17 }
 0x4a6   : > { %v3684_v8 = vpop.f32.mrf.mxu3  ;;  %v3458_v38 = vpop.f32.mrf.mxu2 }
 0x4a7   : > { %v3685_v6 = vadd.f32 %v6733_v53, %v3684_v8  ;;  %v3562_v5 = vmax.f32 %v3530_v36, 0.0 }
 0x4a8   : > { %v3224_v61 = vpop.f32.mrf.mxu1 }
 0x4a9   : > { %v3261_v51 = vadd.f32 %v3224_v61, %v3027_v3  ;;  %v4079_v32 = vadd.f32 %v6820_v60, %v3685_v6  ;;  %v4026_v40 = vpop.f32.mrf.mxu0 }
 0x4ab   : > { %4111 = vst [vmem:[%s6751_s17 + $0x50] sm:$0xff] %v4079_v32  ;;  %v3495_v50 = vadd.f32 %v3458_v38, %v3261_v51 }
 0x4ad   : > { %v3531_v39 = vadd.f32 %v6568_v58, %v3495_v50 }
 0x4ae   : > { %v3686_v23 = vpop.f32.mrf.mxu3  ;;  %v3461_v19 = vpop.f32.mrf.mxu2 }
 0x4af   : > { %v3563_v24 = vmax.f32 %v3531_v39, 0.0  ;;  %v3687_v7 = vadd.f32 %v6733_v53, %v3686_v23 }
 0x4b0   : > { %v3227_v16 = vpop.f32.mrf.mxu1 }
 0x4b1   : > { %v4080_v60 = vadd.f32 %v6830_v25, %v3687_v7  ;;  %v3580_v1 = vpack.c.bf16 %v3563_v24, %v3562_v5  ;;  %v3262_v0 = vadd.f32 %v3227_v16, %v3028_v62  ;;  %v4029_v44 = vpop.f32.mrf.mxu0 }
 0x4b3   : > { %4112 = vst [vmem:[%s6751_s17 + $0x58] sm:$0xff] %v4080_v60  ;;  %3728 = vmatmul.bf16.gmra.mxu3 %v3580_v1  ;;  %v3496_v52 = vadd.f32 %v3461_v19, %v3262_v0 }
 0x4b5   : > { %v3532_v33 = vadd.f32 %v6568_v58, %v3496_v52 }
 0x4b6   : > { %v3689_v42 = vpop.f32.mrf.mxu3  ;;  %v3463_v25 = vpop.f32.mrf.mxu2 }
 0x4b7   : > { %v3690_v14 = vadd.f32 %v6733_v53, %v3689_v42  ;;  %v3564_v22 = vmax.f32 %v3532_v33, 0.0 }
 0x4b8   : > { %v3229_v46 = vpop.f32.mrf.mxu1 }
 0x4b9   : > { %v3263_v20 = vadd.f32 %v3229_v46, %v3029_v18  ;;  %v4081_v47 = vadd.f32 %v6845_v4, %v3690_v14  ;;  %v4031_v4 = vpop.f32.mrf.mxu0 }
 0x4bb   : > { %4113 = vst [vmem:[%s6751_s17 + $0x60] sm:$0xff] %v4081_v47  ;;  %v3497_v49 = vadd.f32 %v3463_v25, %v3263_v20 }
 0x4bd   : > { %v3533_v63 = vadd.f32 %v6568_v58, %v3497_v49 }
 0x4be   : > { %v3691_v15 = vpop.f32.mrf.mxu3 }
 0x4bf   : > { %v3565_v57 = vmax.f32 %v3533_v63, 0.0  ;;  %v3692_v37 = vadd.f32 %v6733_v53, %v3691_v15 }
 0x4c1   : > { %v4082_v27 = vadd.f32 %v6855_v43, %v3692_v37  ;;  %v3581_v13 = vpack.c.bf16 %v3565_v57, %v3564_v22  ;;  %v4034_v9 = vpop.f32.mrf.mxu0 }
 0x4c3   : > { %4114 = vst [vmem:[%s6751_s17 + $0x68] sm:$0xff] %v4082_v27  ;;  %3733 = vmatmul.bf16.gmra.mxu3 %v3581_v13 }
 0x4c6   : > { %v3694_v29 = vpop.f32.mrf.mxu3 }
 0x4c7   : > { %v3695_v10 = vadd.f32 %v6733_v53, %v3694_v29 }
 0x4c9   : > { %v4083_v11 = vadd.f32 %v4024_v34, %v3695_v10  ;;  %v4036_v59 = vpop.f32.mrf.mxu0 }
 0x4cb   : > { %4115 = vst [vmem:[%s6751_s17 + $0x70] sm:$0xff] %v4083_v11 }
 0x4ce   : > { %v3696_v58 = vpop.f32.mrf.mxu3 }
 0x4cf   : > { %v3697_v31 = vadd.f32 %v6733_v53, %v3696_v58 }
 0x4d1   : > { %v4084_v30 = vadd.f32 %v4026_v40, %v3697_v31  ;;  %v4039_v35 = vpop.f32.mrf.mxu0 }
 0x4d3   : > { %4116 = vst [vmem:[%s6751_s17 + $0x78] sm:$0xff] %v4084_v30 }
 0x4d6   : > { %v3699_v45 = vpop.f32.mrf.mxu3 }
 0x4d7   : > { %v3700_v43 = vadd.f32 %v6733_v53, %v3699_v45 }
 0x4d9   : > { %v4085_v12 = vadd.f32 %v4029_v44, %v3700_v43  ;;  %v4041_v8 = vpop.f32.mrf.mxu0 }
 0x4db   : > { %4117 = vst [vmem:[%s6751_s17 + $0x80] sm:$0xff] %v4085_v12 }
 0x4de   : > { %v3701_v54 = vpop.f32.mrf.mxu3 }
 0x4df   : > { %v3702_v56 = vadd.f32 %v6733_v53, %v3701_v54 }
 0x4e1   : > { %v4086_v48 = vadd.f32 %v4031_v4, %v3702_v56  ;;  %v4044_v6 = vpop.f32.mrf.mxu0 }
 0x4e3   : > { %4118 = vst [vmem:[%s6751_s17 + $0x88] sm:$0xff] %v4086_v48 }
 0x4e6   : > { %v3704_v34 = vpop.f32.mrf.mxu3 }
 0x4e7   : > { %v3705_v55 = vadd.f32 %v6733_v53, %v3704_v34 }
 0x4e9   : > { %v4087_v26 = vadd.f32 %v4034_v9, %v3705_v55  ;;  %v4046_v50 = vpop.f32.mrf.mxu0 }
 0x4eb   : > { %4119 = vst [vmem:[%s6751_s17 + $0x90] sm:$0xff] %v4087_v26 }
 0x4ee   : > { %v3706_v38 = vpop.f32.mrf.mxu3 }
 0x4ef   : > { %v3707_v21 = vadd.f32 %v6733_v53, %v3706_v38 }
 0x4f1   : > { %v4088_v17 = vadd.f32 %v4036_v59, %v3707_v21  ;;  %v4049_v7 = vpop.f32.mrf.mxu0 }
 0x4f3   : > { %4120 = vst [vmem:[%s6751_s17 + $0x98] sm:$0xff] %v4088_v17 }
 0x4f6   : > { %v3709_v3 = vpop.f32.mrf.mxu3 }
 0x4f7   : > { %v3710_v61 = vadd.f32 %v6733_v53, %v3709_v3 }
 0x4f9   : > { %v4089_v51 = vadd.f32 %v4039_v35, %v3710_v61  ;;  %v4051_v28 = vpop.f32.mrf.mxu0 }
 0x4fb   : > { %4121 = vst [vmem:[%s6751_s17 + $0xa0] sm:$0xff] %v4089_v51 }
 0x4fe   : > { %v3711_v32 = vpop.f32.mrf.mxu3 }
 0x4ff   : > { %v3712_v36 = vadd.f32 %v6733_v53, %v3711_v32 }
 0x501   : > { %v4090_v39 = vadd.f32 %v4041_v8, %v3712_v36  ;;  %v4054_v41 = vpop.f32.mrf.mxu0 }
 0x503   : > { %4122 = vst [vmem:[%s6751_s17 + $0xa8] sm:$0xff] %v4090_v39 }
 0x506   : > { %v3714_v23 = vpop.f32.mrf.mxu3 }
 0x507   : > { %v3715_v5 = vadd.f32 %v6733_v53, %v3714_v23 }
 0x509   : > { %v4091_v24 = vadd.f32 %v4044_v6, %v3715_v5  ;;  %v4056_v14 = vpop.f32.mrf.mxu0 }
 0x50b   : > { %4123 = vst [vmem:[%s6751_s17 + $0xb0] sm:$0xff] %v4091_v24 }
 0x50e   : > { %v3716_v40 = vpop.f32.mrf.mxu3 }
 0x50f   : > { %v3717_v16 = vadd.f32 %v6733_v53, %v3716_v40 }
 0x511   : > { %v4092_v19 = vadd.f32 %v4046_v50, %v3717_v16  ;;  %v4059_v44 = vpop.f32.mrf.mxu0 }
 0x513   : > { %4124 = vst [vmem:[%s6751_s17 + $0xb8] sm:$0xff] %v4092_v19 }
 0x516   : > { %v3719_v62 = vpop.f32.mrf.mxu3 }
 0x517   : > { %v3720_v60 = vadd.f32 %v6733_v53, %v3719_v62 }
 0x519   : > { %v4093_v1 = vadd.f32 %v4049_v7, %v3720_v60  ;;  %v4061_v15 = vpop.f32.mrf.mxu0 }
 0x51b   : > { %4125 = vst [vmem:[%s6751_s17 + $0xc0] sm:$0xff] %v4093_v1 }
 0x51e   : > { %v3721_v2 = vpop.f32.mrf.mxu3 }
 0x51f   : > { %v3722_v0 = vadd.f32 %v6733_v53, %v3721_v2 }
 0x521   : > { %v4094_v42 = vadd.f32 %v4051_v28, %v3722_v0  ;;  %v4064_v27 = vpop.f32.mrf.mxu0 }
 0x523   : > { %4126 = vst [vmem:[%s6751_s17 + $0xc8] sm:$0xff] %v4094_v42 }
 0x526   : > { %v3724_v52 = vpop.f32.mrf.mxu3 }
 0x527   : > { %v3725_v18 = vadd.f32 %v6733_v53, %v3724_v52 }
 0x529   : > { %v4095_v46 = vadd.f32 %v4054_v41, %v3725_v18  ;;  %v4066_v58 = vpop.f32.mrf.mxu0 }
 0x52b   : > { %4127 = vst [vmem:[%s6751_s17 + $0xd0] sm:$0xff] %v4095_v46 }
 0x52e   : > { %v3726_v20 = vpop.f32.mrf.mxu3 }
 0x52f   : > { %v3727_v47 = vadd.f32 %v6733_v53, %v3726_v20 }
 0x531   : > { %v4096_v25 = vadd.f32 %v4056_v14, %v3727_v47 }
 0x533   : > { %4128 = vst [vmem:[%s6751_s17 + $0xd8] sm:$0xff] %v4096_v25 }
 0x536   : > { %v3729_v33 = vpop.f32.mrf.mxu3 }
 0x537   : > { %v3730_v49 = vadd.f32 %v6733_v53, %v3729_v33 }
 0x539   : > { %v4097_v63 = vadd.f32 %v4059_v44, %v3730_v49 }
 0x53b   : > { %4129 = vst [vmem:[%s6751_s17 + $0xe0] sm:$0xff] %v4097_v63 }
 0x53e   : > { %v3731_v22 = vpop.f32.mrf.mxu3 }
 0x53f   : > { %v3732_v57 = vadd.f32 %v6733_v53, %v3731_v22 }
 0x541   : > { %v4098_v37 = vadd.f32 %v4061_v15, %v3732_v57 }
 0x543   : > { %4130 = vst [vmem:[%s6751_s17 + $0xe8] sm:$0xff] %v4098_v37 }
 0x546   : > { %v3734_v13 = vpop.f32.mrf.mxu3 }
 0x547   : > { %v3735_v4 = vadd.f32 %v6733_v53, %v3734_v13 }
 0x549   : > { %v4099_v29 = vadd.f32 %v4064_v27, %v3735_v4 }
 0x54b   : > { %4131 = vst [vmem:[%s6751_s17 + $0xf0] sm:$0xff] %v4099_v29 }
 0x54e   : > { %v3736_v10 = vpop.f32.mrf.mxu3 }
 0x54f   : > { %v3737_v11 = vadd.f32 %v6733_v53, %v3736_v10 }
 0x551   : > { %v4100_v9 = vadd.f32 %v4066_v58, %v3737_v11 }
 0x553   : > { %4132 = vst [vmem:[%s6751_s17 + $0xf8] sm:$0xff] %v4100_v9 }
 0x554   : > { %5154 = shalt.err (!%p5151_p8)
}
 0x555   : > { %s5210_s24 = smov 128   ;;  %s5211_s6 = smov 8  }
 0x556   : > { %4927 = dma.vmem_to_hbm [thread:$0]  (%p5310_p5), %s4147_s29, 4096, %s4149_s16, %s4134_s22, %s5210_s24, %s5210_s24, %s5211_s6  }
 0x557 PF: > { %s7325_s4 = sld [smem:[#allocation16_spill]]  ;;  %p4954_p9 = scmp.ge.s32.totalorder %s5201_s20, 2 }
 0x559   : > { %p4943_p10 = pnand %p4954_p9, %p5314_p6 }
 0x55b   : > { %p4944_p11 = pneg %p4943_p10 }
 0x55d   : > { %s4163_s19 = sand.u32 1, %s7325_s4  }
 0x55e   : > { %s4164_s23 = scalar_lea.sflag [#allocation5], %s4163_s19 }
 0x55f   : > { %5184 = dma.done.wait (%p4944_p11), %s4164_s23, 4096  }
 0x560   : > { %5186 = vsyncadd (%p4944_p11), %s4164_s23, 4294963200  ;;  %s7327_s20 = sld [smem:[#allocation18_spill]]  ;;  %s7330_s17 = smov %s5193_s18 }
 0x561   : > { %s7328_s26 = sld [smem:[#allocation17_spill]] }
 0x562   : > { %s7329_s19 = sld [smem:[#allocation19_spill]] }
 0x566   : > { %p24_p12 = scmp.ge.s32.totalorder %s7327_s20, 4  }
 0x567   : > { %s7331_s18 = smov %s7328_s26 }
 0x568   :  { %26 = sbr.rel (!%p24_p12) target bundleno = 9 (0x9), region = 126 }
 0x56d   :  { %4170 = vsyncpa [#allocation4], 1 }
 0x56e   :  { %4172 = vsyncpa [#allocation4 + $0x1], 1 }
 0x56f   :  { %4173 = vsyncpa [#allocation7], 1 }
 0x570   :  { %4174 = vsyncpa [#allocation10], 1 }
 0x571   :  { %4175 = vsyncpa [#allocation5], 1 }
 0x572   :  { %4177 = vsyncpa [#allocation5 + $0x1], 1 }

</bundles_post_ra>
